<compile_context>
chip_gen: v5e
topology: v5e:2x2
jax: 0.10.0
libtpu: 0.0.40
codegen_flags: <defaults>
</compile_context>

<pallas_src>
import jax
import jax.numpy as jnp
from jax import lax
from jax.experimental import pallas as pl
from jax.experimental.pallas import tpu as pltpu

EXPANSION = 4
BN_EPS = 1e-5
LANE = 128


def bottleneck_kernel(x_ref, w1_ref, b1_ref, w2_ref, b2_ref, w3_ref, b3_ref,
                      out_ref):
    _, H, W, Cin = x_ref.shape
    Cw = w1_ref.shape[1]          # padded bottleneck width (multiple of 128)
    Cout = w3_ref.shape[1]
    HW = H * W

    x2d = x_ref[...].reshape(HW, Cin)                       # f32, residual

    # ---- conv1 (1x1) + folded bn1 + relu --------------------------------
    h1 = jnp.dot(x2d.astype(jnp.bfloat16), w1_ref[...],
                 preferred_element_type=jnp.float32)
    h1 = jnp.maximum(h1 + b1_ref[...], 0.0)                 # (HW, Cw) f32

    # ---- conv2 (3x3, stride 1, pad 1) + folded bn2 + relu ----------------
    # 9 taps: roll the flattened (HW, Cw) activation by -(oy*W+ox) rows
    # (XLU rotate) and zero the rows whose source pixel is out of bounds.
    y_idx = lax.broadcasted_iota(jnp.int32, (H, W, Cw), 0).reshape(HW, Cw)
    x_idx = lax.broadcasted_iota(jnp.int32, (H, W, Cw), 1).reshape(HW, Cw)

    acc = jnp.zeros((HW, Cw), jnp.float32)
    for ky in range(3):
        for kx in range(3):
            oy, ox = ky - 1, kx - 1
            s = oy * W + ox
            shifted = pltpu.roll(h1, shift=(-s) % HW, axis=0) if s != 0 else h1
            valid = ((y_idx + oy >= 0) & (y_idx + oy < H) &
                     (x_idx + ox >= 0) & (x_idx + ox < W))
            tap = jnp.where(valid, shifted, 0.0).astype(jnp.bfloat16)
            acc = acc + jnp.dot(tap, w2_ref[ky * 3 + kx],
                                preferred_element_type=jnp.float32)
    h2 = jnp.maximum(acc + b2_ref[...], 0.0)                # (HW, Cw) f32

    # ---- conv3 (1x1) + folded bn3 ----------------------------------------
    h3 = jnp.dot(h2.astype(jnp.bfloat16), w3_ref[...],
                 preferred_element_type=jnp.float32)
    h3 = h3 + b3_ref[...]

    # ---- residual add (identity = x) + relu ------------------------------
    out = jnp.maximum(h3 + x2d, 0.0)
    out_ref[...] = out.reshape(1, H, W, Cout).astype(out_ref.dtype)


# ----------------------------------------------------------------------------
# Host-side parameter preparation: fold BN, pad width to lane multiple, bf16.
# ----------------------------------------------------------------------------
def _round_up(x, m):
    return (x + m - 1) // m * m


def fold_bn(gamma, beta, mean, var, eps=BN_EPS):
    scale = gamma / jnp.sqrt(var + eps)
    shift = beta - mean * scale
    return scale, shift


def prepare_params(w1, bn1, w2, bn2, w3, bn3):
    """w1: (Cin, width), w2: (3,3,width,width) HWIO, w3: (width, Cout)."""
    cin, width = w1.shape
    cout = w3.shape[1]

    s1, b1 = fold_bn(*bn1)
    s2, b2 = fold_bn(*bn2)
    s3, b3 = fold_bn(*bn3)

    # Fold BN scales into conv output channels.
    w1f = w1 * s1[None, :]
    w2f = w2 * s2[None, None, None, :]
    w3f = w3 * s3[None, :]

    # Pad the bottleneck width to a multiple of 128 (lane-dense, full MXU
    # tiles).  Padded weight rows/cols are zero, so the math is unchanged.
    wp = _round_up(width, LANE)
    pad = wp - width
    w1f = jnp.pad(w1f, ((0, 0), (0, pad)))
    b1p = jnp.pad(b1, (0, pad))
    w2f = jnp.pad(w2f, ((0, 0), (0, 0), (0, pad), (0, pad)))
    b2p = jnp.pad(b2, (0, pad))
    w3f = jnp.pad(w3f, ((0, pad), (0, 0)))

    return (w1f.astype(jnp.bfloat16),
            b1p.reshape(1, wp).astype(jnp.float32),
            w2f.reshape(9, wp, wp).astype(jnp.bfloat16),
            b2p.reshape(1, wp).astype(jnp.float32),
            w3f.astype(jnp.bfloat16),
            b3.reshape(1, cout).astype(jnp.float32))


# ----------------------------------------------------------------------------
# pallas_call wrappers
# ----------------------------------------------------------------------------
def bottleneck_forward_nhwc(x, kparams):
    """x: (N, H, W, Cin) f32.  Preferred entry point for stacked blocks."""
    w1, b1, w2, b2, w3, b3 = kparams
    N, H, W, Cin = x.shape
    Cout = w3.shape[1]

    img_map = lambda n: (n, 0, 0, 0)

    def const_map(ndim):
        return lambda n, ndim=ndim: (0,) * ndim

    in_specs = [
        pl.BlockSpec((1, H, W, Cin), img_map),      # x: one image per step
        pl.BlockSpec(w1.shape, const_map(2)),       # weights stay resident
        pl.BlockSpec(b1.shape, const_map(2)),
        pl.BlockSpec(w2.shape, const_map(3)),
        pl.BlockSpec(b2.shape, const_map(2)),
        pl.BlockSpec(w3.shape, const_map(2)),
        pl.BlockSpec(b3.shape, const_map(2)),
    ]
    out_specs = pl.BlockSpec((1, H, W, Cout), img_map)

    return pl.pallas_call(
        bottleneck_kernel,
        out_shape=jax.ShapeDtypeStruct((N, H, W, Cout), jnp.float32),
        grid=(N,),
        in_specs=in_specs,
        out_specs=out_specs,
        compiler_params=pltpu.CompilerParams(
            dimension_semantics=("parallel",)),
    )(x, w1, b1, w2, b2, w3, b3)


def bottleneck_forward(x_nchw, kparams):
    """PyTorch-layout wrapper: (N, Cin, H, W) -> (N, Cout, H, W)."""
    x = jnp.transpose(x_nchw, (0, 2, 3, 1))
    y = bottleneck_forward_nhwc(x, kparams)
    return jnp.transpose(y, (0, 3, 1, 2))


# ----------------------------------------------------------------------------
# Reference (pure JAX, f32, lax.conv) and test harness
# ----------------------------------------------------------------------------
def reference_forward(x_nchw, w1, bn1, w2, bn2, w3, bn3):
    x = jnp.transpose(x_nchw, (0, 2, 3, 1))
    dn = ('NHWC', 'HWIO', 'NHWC')

    def bn(h, p):
        g, b, m, v = p
        s = g / jnp.sqrt(v + BN_EPS)
        return h * s + (b - m * s)

    h = lax.conv_general_dilated(x, w1[None, None], (1, 1), 'VALID',
                                 dimension_numbers=dn)
    h = jnp.maximum(bn(h, bn1), 0.0)
    h = lax.conv_general_dilated(h, w2, (1, 1), ((1, 1), (1, 1)),
                                 dimension_numbers=dn)
    h = jnp.maximum(bn(h, bn2), 0.0)
    h = lax.conv_general_dilated(h, w3[None, None], (1, 1), 'VALID',
                                 dimension_numbers=dn)
    h = bn(h, bn3)
    out = jnp.maximum(h + x, 0.0)
    return jnp.transpose(out, (0, 3, 1, 2))


def make_params(key, inplanes, planes, base_width=64, groups=1):
    width = int(planes * (base_width / 64.0)) * groups
    cout = planes * EXPANSION
    ks = jax.random.split(key, 6)

    w1 = jax.random.normal(ks[0], (inplanes, width), jnp.float32) * 0.1
    w2 = jax.random.normal(ks[1], (3, 3, width, width), jnp.float32) * 0.1
    w3 = jax.random.normal(ks[2], (width, cout), jnp.float32) * 0.1

    def bn(k, c):
        k1, k2, k3, k4 = jax.random.split(k, 4)
        gamma = jax.random.uniform(k1, (c,), jnp.float32, 0.5, 1.5)
        beta = jax.random.normal(k2, (c,), jnp.float32) * 0.1
        mean = jax.random.normal(k3, (c,), jnp.float32) * 0.1
        var = jax.random.uniform(k4, (c,), jnp.float32, 0.5, 1.5)
        return (gamma, beta, mean, var)

    return w1, bn(ks[3], width), w2, bn(ks[4], width), w3, bn(ks[5], cout)


if __name__ == "__main__":
    key = jax.random.PRNGKey(0)
    k_x, k_p = jax.random.split(key)

    # Small Bottleneck config: identity residual requires inplanes == 4*planes.
    N, planes, H, W = 2, 64, 16, 16
    inplanes = planes * EXPANSION                      # 256

    x = jax.random.normal(k_x, (N, inplanes, H, W), jnp.float32)
    w1, bn1, w2, bn2, w3, bn3 = make_params(k_p, inplanes, planes)
    kparams = prepare_params(w1, bn1, w2, bn2, w3, bn3)

    out = jax.block_until_ready(bottleneck_forward(x, kparams))
    ref = jax.block_until_ready(reference_forward(x, w1, bn1, w2, bn2, w3, bn3))

    # bf16 matmul operands (f32 accumulation) -> compare with a bf16-level
    # tolerance relative to the output magnitude.
    err = float(jnp.max(jnp.abs(out - ref)))
    scale = float(jnp.max(jnp.abs(ref)))
    assert err <= 3e-2 * scale + 1e-3, f"max abs err {err} vs max ref {scale}"

    print("KERNEL_OK")
</pallas_src>

<mosaic_0001>
module attributes {stable_mosaic.version = 11 : i64} {
  func.func @bottleneck_kernel(%arg0: i32, %arg1: memref<1x16x16x256xf32, #tpu.memory_space<vmem>>, %arg2: memref<256x128xbf16, #tpu.memory_space<vmem>>, %arg3: memref<1x128xf32, #tpu.memory_space<vmem>>, %arg4: memref<9x128x128xbf16, #tpu.memory_space<vmem>>, %arg5: memref<1x128xf32, #tpu.memory_space<vmem>>, %arg6: memref<128x256xbf16, #tpu.memory_space<vmem>>, %arg7: memref<1x256xf32, #tpu.memory_space<vmem>>, %arg8: memref<1x16x16x256xf32, #tpu.memory_space<vmem>>) attributes {dimension_semantics = [#tpu.dimension_semantics<parallel>], iteration_bounds = array<i64: 2>, scalar_prefetch = 0 : i64, scratch_operands = 0 : i64, tpu.core_type = #tpu.core_type<tc>, window_params = [{transform_indices = @transform_0, window_bounds = array<i64: 1, 16, 16, 256>}, {pipeline_mode = #tpu.pipeline_mode<synchronous>, transform_indices = @transform_1, window_bounds = array<i64: 256, 128>}, {pipeline_mode = #tpu.pipeline_mode<synchronous>, transform_indices = @transform_2, window_bounds = array<i64: 1, 128>}, {pipeline_mode = #tpu.pipeline_mode<synchronous>, transform_indices = @transform_3, window_bounds = array<i64: 9, 128, 128>}, {pipeline_mode = #tpu.pipeline_mode<synchronous>, transform_indices = @transform_4, window_bounds = array<i64: 1, 128>}, {pipeline_mode = #tpu.pipeline_mode<synchronous>, transform_indices = @transform_5, window_bounds = array<i64: 128, 256>}, {pipeline_mode = #tpu.pipeline_mode<synchronous>, transform_indices = @transform_6, window_bounds = array<i64: 1, 256>}, {transform_indices = @transform_7, window_bounds = array<i64: 1, 16, 16, 256>}]} {
    %c0 = arith.constant 0 : index
    %c0_0 = arith.constant 0 : index
    %c0_1 = arith.constant 0 : index
    %c0_2 = arith.constant 0 : index
    %0 = vector.load %arg1[%c0, %c0_0, %c0_1, %c0_2] : memref<1x16x16x256xf32, #tpu.memory_space<vmem>>, vector<1x16x16x256xf32>
    %1 = vector.shape_cast %0 : vector<1x16x16x256xf32> to vector<256x256xf32>
    %2 = arith.truncf %1 : vector<256x256xf32> to vector<256x256xbf16>
    %c0_3 = arith.constant 0 : index
    %c0_4 = arith.constant 0 : index
    %3 = vector.load %arg2[%c0_3, %c0_4] : memref<256x128xbf16, #tpu.memory_space<vmem>>, vector<256x128xbf16>
    %cst = arith.constant dense<0.000000e+00> : vector<256x128xf32>
    %4 = tpu.matmul %2, %3, %cst {dimension_numbers = #tpu.dot_dimension_numbers<[1], [0], [0], [1], [0, 0, 1, 1], [], []>} : vector<256x256xbf16>, vector<256x128xbf16>, vector<256x128xf32> -> vector<256x128xf32>
    %c0_5 = arith.constant 0 : index
    %c0_6 = arith.constant 0 : index
    %5 = vector.load %arg3[%c0_5, %c0_6] : memref<1x128xf32, #tpu.memory_space<vmem>>, vector<1x128xf32>
    %6 = vector.broadcast %5 : vector<1x128xf32> to vector<256x128xf32>
    %7 = arith.addf %4, %6 : vector<256x128xf32>
    %cst_7 = arith.constant 0.000000e+00 : f32
    %8 = vector.broadcast %cst_7 : f32 to vector<256x128xf32>
    %9 = arith.maximumf %7, %8 : vector<256x128xf32>
    %10 = tpu.iota {dimensions = array<i32: 0>} : vector<16x16x128xi32>
    %11 = vector.shape_cast %10 : vector<16x16x128xi32> to vector<256x128xi32>
    %12 = tpu.iota {dimensions = array<i32: 1>} : vector<16x16x128xi32>
    %13 = vector.shape_cast %12 : vector<16x16x128xi32> to vector<256x128xi32>
    %cst_8 = arith.constant 0.000000e+00 : f32
    %14 = vector.broadcast %cst_8 : f32 to vector<256x128xf32>
    %c17_i32 = arith.constant 17 : i32
    %15 = tpu.dynamic_rotate %9 by %c17_i32 dim 0 : vector<256x128xf32>, i32 -> vector<256x128xf32>
    %c-1_i32 = arith.constant -1 : i32
    %16 = vector.broadcast %c-1_i32 : i32 to vector<256x128xi32>
    %17 = arith.addi %11, %16 : vector<256x128xi32>
    %c0_i32 = arith.constant 0 : i32
    %18 = vector.broadcast %c0_i32 : i32 to vector<256x128xi32>
    %19 = arith.cmpi sge, %17, %18 : vector<256x128xi32>
    %c-1_i32_9 = arith.constant -1 : i32
    %20 = vector.broadcast %c-1_i32_9 : i32 to vector<256x128xi32>
    %21 = arith.addi %11, %20 : vector<256x128xi32>
    %c16_i32 = arith.constant 16 : i32
    %22 = vector.broadcast %c16_i32 : i32 to vector<256x128xi32>
    %23 = arith.cmpi slt, %21, %22 : vector<256x128xi32>
    %24 = arith.andi %19, %23 : vector<256x128xi1>
    %c-1_i32_10 = arith.constant -1 : i32
    %25 = vector.broadcast %c-1_i32_10 : i32 to vector<256x128xi32>
    %26 = arith.addi %13, %25 : vector<256x128xi32>
    %c0_i32_11 = arith.constant 0 : i32
    %27 = vector.broadcast %c0_i32_11 : i32 to vector<256x128xi32>
    %28 = arith.cmpi sge, %26, %27 : vector<256x128xi32>
    %29 = arith.andi %24, %28 : vector<256x128xi1>
    %c-1_i32_12 = arith.constant -1 : i32
    %30 = vector.broadcast %c-1_i32_12 : i32 to vector<256x128xi32>
    %31 = arith.addi %13, %30 : vector<256x128xi32>
    %c16_i32_13 = arith.constant 16 : i32
    %32 = vector.broadcast %c16_i32_13 : i32 to vector<256x128xi32>
    %33 = arith.cmpi slt, %31, %32 : vector<256x128xi32>
    %34 = arith.andi %29, %33 : vector<256x128xi1>
    %cst_14 = arith.constant 0.000000e+00 : f32
    %35 = vector.broadcast %cst_14 : f32 to vector<256x128xf32>
    %36 = arith.select %34, %15, %35 : vector<256x128xi1>, vector<256x128xf32>
    %37 = arith.truncf %36 : vector<256x128xf32> to vector<256x128xbf16>
    %c0_15 = arith.constant 0 : index
    %c0_16 = arith.constant 0 : index
    %c0_17 = arith.constant 0 : index
    %38 = vector.load %arg4[%c0_15, %c0_16, %c0_17] : memref<9x128x128xbf16, #tpu.memory_space<vmem>>, vector<1x128x128xbf16>
    %39 = vector.shape_cast %38 : vector<1x128x128xbf16> to vector<128x128xbf16>
    %cst_18 = arith.constant dense<0.000000e+00> : vector<256x128xf32>
    %40 = tpu.matmul %37, %39, %cst_18 {dimension_numbers = #tpu.dot_dimension_numbers<[1], [0], [0], [1], [0, 0, 1, 1], [], []>} : vector<256x128xbf16>, vector<128x128xbf16>, vector<256x128xf32> -> vector<256x128xf32>
    %41 = arith.addf %14, %40 : vector<256x128xf32>
    %c16_i32_19 = arith.constant 16 : i32
    %42 = tpu.dynamic_rotate %9 by %c16_i32_19 dim 0 : vector<256x128xf32>, i32 -> vector<256x128xf32>
    %c-1_i32_20 = arith.constant -1 : i32
    %43 = vector.broadcast %c-1_i32_20 : i32 to vector<256x128xi32>
    %44 = arith.addi %11, %43 : vector<256x128xi32>
    %c0_i32_21 = arith.constant 0 : i32
    %45 = vector.broadcast %c0_i32_21 : i32 to vector<256x128xi32>
    %46 = arith.cmpi sge, %44, %45 : vector<256x128xi32>
    %c-1_i32_22 = arith.constant -1 : i32
    %47 = vector.broadcast %c-1_i32_22 : i32 to vector<256x128xi32>
    %48 = arith.addi %11, %47 : vector<256x128xi32>
    %c16_i32_23 = arith.constant 16 : i32
    %49 = vector.broadcast %c16_i32_23 : i32 to vector<256x128xi32>
    %50 = arith.cmpi slt, %48, %49 : vector<256x128xi32>
    %51 = arith.andi %46, %50 : vector<256x128xi1>
    %c0_i32_24 = arith.constant 0 : i32
    %52 = vector.broadcast %c0_i32_24 : i32 to vector<256x128xi32>
    %53 = arith.addi %13, %52 : vector<256x128xi32>
    %c0_i32_25 = arith.constant 0 : i32
    %54 = vector.broadcast %c0_i32_25 : i32 to vector<256x128xi32>
    %55 = arith.cmpi sge, %53, %54 : vector<256x128xi32>
    %56 = arith.andi %51, %55 : vector<256x128xi1>
    %c0_i32_26 = arith.constant 0 : i32
    %57 = vector.broadcast %c0_i32_26 : i32 to vector<256x128xi32>
    %58 = arith.addi %13, %57 : vector<256x128xi32>
    %c16_i32_27 = arith.constant 16 : i32
    %59 = vector.broadcast %c16_i32_27 : i32 to vector<256x128xi32>
    %60 = arith.cmpi slt, %58, %59 : vector<256x128xi32>
    %61 = arith.andi %56, %60 : vector<256x128xi1>
    %cst_28 = arith.constant 0.000000e+00 : f32
    %62 = vector.broadcast %cst_28 : f32 to vector<256x128xf32>
    %63 = arith.select %61, %42, %62 : vector<256x128xi1>, vector<256x128xf32>
    %64 = arith.truncf %63 : vector<256x128xf32> to vector<256x128xbf16>
    %c1 = arith.constant 1 : index
    %c0_29 = arith.constant 0 : index
    %c0_30 = arith.constant 0 : index
    %65 = vector.load %arg4[%c1, %c0_29, %c0_30] : memref<9x128x128xbf16, #tpu.memory_space<vmem>>, vector<1x128x128xbf16>
    %66 = vector.shape_cast %65 : vector<1x128x128xbf16> to vector<128x128xbf16>
    %cst_31 = arith.constant dense<0.000000e+00> : vector<256x128xf32>
    %67 = tpu.matmul %64, %66, %cst_31 {dimension_numbers = #tpu.dot_dimension_numbers<[1], [0], [0], [1], [0, 0, 1, 1], [], []>} : vector<256x128xbf16>, vector<128x128xbf16>, vector<256x128xf32> -> vector<256x128xf32>
    %68 = arith.addf %41, %67 : vector<256x128xf32>
    %c15_i32 = arith.constant 15 : i32
    %69 = tpu.dynamic_rotate %9 by %c15_i32 dim 0 : vector<256x128xf32>, i32 -> vector<256x128xf32>
    %c-1_i32_32 = arith.constant -1 : i32
    %70 = vector.broadcast %c-1_i32_32 : i32 to vector<256x128xi32>
    %71 = arith.addi %11, %70 : vector<256x128xi32>
    %c0_i32_33 = arith.constant 0 : i32
    %72 = vector.broadcast %c0_i32_33 : i32 to vector<256x128xi32>
    %73 = arith.cmpi sge, %71, %72 : vector<256x128xi32>
    %c-1_i32_34 = arith.constant -1 : i32
    %74 = vector.broadcast %c-1_i32_34 : i32 to vector<256x128xi32>
    %75 = arith.addi %11, %74 : vector<256x128xi32>
    %c16_i32_35 = arith.constant 16 : i32
    %76 = vector.broadcast %c16_i32_35 : i32 to vector<256x128xi32>
    %77 = arith.cmpi slt, %75, %76 : vector<256x128xi32>
    %78 = arith.andi %73, %77 : vector<256x128xi1>
    %c1_i32 = arith.constant 1 : i32
    %79 = vector.broadcast %c1_i32 : i32 to vector<256x128xi32>
    %80 = arith.addi %13, %79 : vector<256x128xi32>
    %c0_i32_36 = arith.constant 0 : i32
    %81 = vector.broadcast %c0_i32_36 : i32 to vector<256x128xi32>
    %82 = arith.cmpi sge, %80, %81 : vector<256x128xi32>
    %83 = arith.andi %78, %82 : vector<256x128xi1>
    %c1_i32_37 = arith.constant 1 : i32
    %84 = vector.broadcast %c1_i32_37 : i32 to vector<256x128xi32>
    %85 = arith.addi %13, %84 : vector<256x128xi32>
    %c16_i32_38 = arith.constant 16 : i32
    %86 = vector.broadcast %c16_i32_38 : i32 to vector<256x128xi32>
    %87 = arith.cmpi slt, %85, %86 : vector<256x128xi32>
    %88 = arith.andi %83, %87 : vector<256x128xi1>
    %cst_39 = arith.constant 0.000000e+00 : f32
    %89 = vector.broadcast %cst_39 : f32 to vector<256x128xf32>
    %90 = arith.select %88, %69, %89 : vector<256x128xi1>, vector<256x128xf32>
    %91 = arith.truncf %90 : vector<256x128xf32> to vector<256x128xbf16>
    %c2 = arith.constant 2 : index
    %c0_40 = arith.constant 0 : index
    %c0_41 = arith.constant 0 : index
    %92 = vector.load %arg4[%c2, %c0_40, %c0_41] : memref<9x128x128xbf16, #tpu.memory_space<vmem>>, vector<1x128x128xbf16>
    %93 = vector.shape_cast %92 : vector<1x128x128xbf16> to vector<128x128xbf16>
    %cst_42 = arith.constant dense<0.000000e+00> : vector<256x128xf32>
    %94 = tpu.matmul %91, %93, %cst_42 {dimension_numbers = #tpu.dot_dimension_numbers<[1], [0], [0], [1], [0, 0, 1, 1], [], []>} : vector<256x128xbf16>, vector<128x128xbf16>, vector<256x128xf32> -> vector<256x128xf32>
    %95 = arith.addf %68, %94 : vector<256x128xf32>
    %c1_i32_43 = arith.constant 1 : i32
    %96 = tpu.dynamic_rotate %9 by %c1_i32_43 dim 0 : vector<256x128xf32>, i32 -> vector<256x128xf32>
    %c0_i32_44 = arith.constant 0 : i32
    %97 = vector.broadcast %c0_i32_44 : i32 to vector<256x128xi32>
    %98 = arith.addi %11, %97 : vector<256x128xi32>
    %c0_i32_45 = arith.constant 0 : i32
    %99 = vector.broadcast %c0_i32_45 : i32 to vector<256x128xi32>
    %100 = arith.cmpi sge, %98, %99 : vector<256x128xi32>
    %c0_i32_46 = arith.constant 0 : i32
    %101 = vector.broadcast %c0_i32_46 : i32 to vector<256x128xi32>
    %102 = arith.addi %11, %101 : vector<256x128xi32>
    %c16_i32_47 = arith.constant 16 : i32
    %103 = vector.broadcast %c16_i32_47 : i32 to vector<256x128xi32>
    %104 = arith.cmpi slt, %102, %103 : vector<256x128xi32>
    %105 = arith.andi %100, %104 : vector<256x128xi1>
    %c-1_i32_48 = arith.constant -1 : i32
    %106 = vector.broadcast %c-1_i32_48 : i32 to vector<256x128xi32>
    %107 = arith.addi %13, %106 : vector<256x128xi32>
    %c0_i32_49 = arith.constant 0 : i32
    %108 = vector.broadcast %c0_i32_49 : i32 to vector<256x128xi32>
    %109 = arith.cmpi sge, %107, %108 : vector<256x128xi32>
    %110 = arith.andi %105, %109 : vector<256x128xi1>
    %c-1_i32_50 = arith.constant -1 : i32
    %111 = vector.broadcast %c-1_i32_50 : i32 to vector<256x128xi32>
    %112 = arith.addi %13, %111 : vector<256x128xi32>
    %c16_i32_51 = arith.constant 16 : i32
    %113 = vector.broadcast %c16_i32_51 : i32 to vector<256x128xi32>
    %114 = arith.cmpi slt, %112, %113 : vector<256x128xi32>
    %115 = arith.andi %110, %114 : vector<256x128xi1>
    %cst_52 = arith.constant 0.000000e+00 : f32
    %116 = vector.broadcast %cst_52 : f32 to vector<256x128xf32>
    %117 = arith.select %115, %96, %116 : vector<256x128xi1>, vector<256x128xf32>
    %118 = arith.truncf %117 : vector<256x128xf32> to vector<256x128xbf16>
    %c3 = arith.constant 3 : index
    %c0_53 = arith.constant 0 : index
    %c0_54 = arith.constant 0 : index
    %119 = vector.load %arg4[%c3, %c0_53, %c0_54] : memref<9x128x128xbf16, #tpu.memory_space<vmem>>, vector<1x128x128xbf16>
    %120 = vector.shape_cast %119 : vector<1x128x128xbf16> to vector<128x128xbf16>
    %cst_55 = arith.constant dense<0.000000e+00> : vector<256x128xf32>
    %121 = tpu.matmul %118, %120, %cst_55 {dimension_numbers = #tpu.dot_dimension_numbers<[1], [0], [0], [1], [0, 0, 1, 1], [], []>} : vector<256x128xbf16>, vector<128x128xbf16>, vector<256x128xf32> -> vector<256x128xf32>
    %122 = arith.addf %95, %121 : vector<256x128xf32>
    %c0_i32_56 = arith.constant 0 : i32
    %123 = vector.broadcast %c0_i32_56 : i32 to vector<256x128xi32>
    %124 = arith.addi %11, %123 : vector<256x128xi32>
    %c0_i32_57 = arith.constant 0 : i32
    %125 = vector.broadcast %c0_i32_57 : i32 to vector<256x128xi32>
    %126 = arith.cmpi sge, %124, %125 : vector<256x128xi32>
    %c0_i32_58 = arith.constant 0 : i32
    %127 = vector.broadcast %c0_i32_58 : i32 to vector<256x128xi32>
    %128 = arith.addi %11, %127 : vector<256x128xi32>
    %c16_i32_59 = arith.constant 16 : i32
    %129 = vector.broadcast %c16_i32_59 : i32 to vector<256x128xi32>
    %130 = arith.cmpi slt, %128, %129 : vector<256x128xi32>
    %131 = arith.andi %126, %130 : vector<256x128xi1>
    %c0_i32_60 = arith.constant 0 : i32
    %132 = vector.broadcast %c0_i32_60 : i32 to vector<256x128xi32>
    %133 = arith.addi %13, %132 : vector<256x128xi32>
    %c0_i32_61 = arith.constant 0 : i32
    %134 = vector.broadcast %c0_i32_61 : i32 to vector<256x128xi32>
    %135 = arith.cmpi sge, %133, %134 : vector<256x128xi32>
    %136 = arith.andi %131, %135 : vector<256x128xi1>
    %c0_i32_62 = arith.constant 0 : i32
    %137 = vector.broadcast %c0_i32_62 : i32 to vector<256x128xi32>
    %138 = arith.addi %13, %137 : vector<256x128xi32>
    %c16_i32_63 = arith.constant 16 : i32
    %139 = vector.broadcast %c16_i32_63 : i32 to vector<256x128xi32>
    %140 = arith.cmpi slt, %138, %139 : vector<256x128xi32>
    %141 = arith.andi %136, %140 : vector<256x128xi1>
    %cst_64 = arith.constant 0.000000e+00 : f32
    %142 = vector.broadcast %cst_64 : f32 to vector<256x128xf32>
    %143 = arith.select %141, %9, %142 : vector<256x128xi1>, vector<256x128xf32>
    %144 = arith.truncf %143 : vector<256x128xf32> to vector<256x128xbf16>
    %c4 = arith.constant 4 : index
    %c0_65 = arith.constant 0 : index
    %c0_66 = arith.constant 0 : index
    %145 = vector.load %arg4[%c4, %c0_65, %c0_66] : memref<9x128x128xbf16, #tpu.memory_space<vmem>>, vector<1x128x128xbf16>
    %146 = vector.shape_cast %145 : vector<1x128x128xbf16> to vector<128x128xbf16>
    %cst_67 = arith.constant dense<0.000000e+00> : vector<256x128xf32>
    %147 = tpu.matmul %144, %146, %cst_67 {dimension_numbers = #tpu.dot_dimension_numbers<[1], [0], [0], [1], [0, 0, 1, 1], [], []>} : vector<256x128xbf16>, vector<128x128xbf16>, vector<256x128xf32> -> vector<256x128xf32>
    %148 = arith.addf %122, %147 : vector<256x128xf32>
    %c255_i32 = arith.constant 255 : i32
    %149 = tpu.dynamic_rotate %9 by %c255_i32 dim 0 : vector<256x128xf32>, i32 -> vector<256x128xf32>
    %c0_i32_68 = arith.constant 0 : i32
    %150 = vector.broadcast %c0_i32_68 : i32 to vector<256x128xi32>
    %151 = arith.addi %11, %150 : vector<256x128xi32>
    %c0_i32_69 = arith.constant 0 : i32
    %152 = vector.broadcast %c0_i32_69 : i32 to vector<256x128xi32>
    %153 = arith.cmpi sge, %151, %152 : vector<256x128xi32>
    %c0_i32_70 = arith.constant 0 : i32
    %154 = vector.broadcast %c0_i32_70 : i32 to vector<256x128xi32>
    %155 = arith.addi %11, %154 : vector<256x128xi32>
    %c16_i32_71 = arith.constant 16 : i32
    %156 = vector.broadcast %c16_i32_71 : i32 to vector<256x128xi32>
    %157 = arith.cmpi slt, %155, %156 : vector<256x128xi32>
    %158 = arith.andi %153, %157 : vector<256x128xi1>
    %c1_i32_72 = arith.constant 1 : i32
    %159 = vector.broadcast %c1_i32_72 : i32 to vector<256x128xi32>
    %160 = arith.addi %13, %159 : vector<256x128xi32>
    %c0_i32_73 = arith.constant 0 : i32
    %161 = vector.broadcast %c0_i32_73 : i32 to vector<256x128xi32>
    %162 = arith.cmpi sge, %160, %161 : vector<256x128xi32>
    %163 = arith.andi %158, %162 : vector<256x128xi1>
    %c1_i32_74 = arith.constant 1 : i32
    %164 = vector.broadcast %c1_i32_74 : i32 to vector<256x128xi32>
    %165 = arith.addi %13, %164 : vector<256x128xi32>
    %c16_i32_75 = arith.constant 16 : i32
    %166 = vector.broadcast %c16_i32_75 : i32 to vector<256x128xi32>
    %167 = arith.cmpi slt, %165, %166 : vector<256x128xi32>
    %168 = arith.andi %163, %167 : vector<256x128xi1>
    %cst_76 = arith.constant 0.000000e+00 : f32
    %169 = vector.broadcast %cst_76 : f32 to vector<256x128xf32>
    %170 = arith.select %168, %149, %169 : vector<256x128xi1>, vector<256x128xf32>
    %171 = arith.truncf %170 : vector<256x128xf32> to vector<256x128xbf16>
    %c5 = arith.constant 5 : index
    %c0_77 = arith.constant 0 : index
    %c0_78 = arith.constant 0 : index
    %172 = vector.load %arg4[%c5, %c0_77, %c0_78] : memref<9x128x128xbf16, #tpu.memory_space<vmem>>, vector<1x128x128xbf16>
    %173 = vector.shape_cast %172 : vector<1x128x128xbf16> to vector<128x128xbf16>
    %cst_79 = arith.constant dense<0.000000e+00> : vector<256x128xf32>
    %174 = tpu.matmul %171, %173, %cst_79 {dimension_numbers = #tpu.dot_dimension_numbers<[1], [0], [0], [1], [0, 0, 1, 1], [], []>} : vector<256x128xbf16>, vector<128x128xbf16>, vector<256x128xf32> -> vector<256x128xf32>
    %175 = arith.addf %148, %174 : vector<256x128xf32>
    %c241_i32 = arith.constant 241 : i32
    %176 = tpu.dynamic_rotate %9 by %c241_i32 dim 0 : vector<256x128xf32>, i32 -> vector<256x128xf32>
    %c1_i32_80 = arith.constant 1 : i32
    %177 = vector.broadcast %c1_i32_80 : i32 to vector<256x128xi32>
    %178 = arith.addi %11, %177 : vector<256x128xi32>
    %c0_i32_81 = arith.constant 0 : i32
    %179 = vector.broadcast %c0_i32_81 : i32 to vector<256x128xi32>
    %180 = arith.cmpi sge, %178, %179 : vector<256x128xi32>
    %c1_i32_82 = arith.constant 1 : i32
    %181 = vector.broadcast %c1_i32_82 : i32 to vector<256x128xi32>
    %182 = arith.addi %11, %181 : vector<256x128xi32>
    %c16_i32_83 = arith.constant 16 : i32
    %183 = vector.broadcast %c16_i32_83 : i32 to vector<256x128xi32>
    %184 = arith.cmpi slt, %182, %183 : vector<256x128xi32>
    %185 = arith.andi %180, %184 : vector<256x128xi1>
    %c-1_i32_84 = arith.constant -1 : i32
    %186 = vector.broadcast %c-1_i32_84 : i32 to vector<256x128xi32>
    %187 = arith.addi %13, %186 : vector<256x128xi32>
    %c0_i32_85 = arith.constant 0 : i32
    %188 = vector.broadcast %c0_i32_85 : i32 to vector<256x128xi32>
    %189 = arith.cmpi sge, %187, %188 : vector<256x128xi32>
    %190 = arith.andi %185, %189 : vector<256x128xi1>
    %c-1_i32_86 = arith.constant -1 : i32
    %191 = vector.broadcast %c-1_i32_86 : i32 to vector<256x128xi32>
    %192 = arith.addi %13, %191 : vector<256x128xi32>
    %c16_i32_87 = arith.constant 16 : i32
    %193 = vector.broadcast %c16_i32_87 : i32 to vector<256x128xi32>
    %194 = arith.cmpi slt, %192, %193 : vector<256x128xi32>
    %195 = arith.andi %190, %194 : vector<256x128xi1>
    %cst_88 = arith.constant 0.000000e+00 : f32
    %196 = vector.broadcast %cst_88 : f32 to vector<256x128xf32>
    %197 = arith.select %195, %176, %196 : vector<256x128xi1>, vector<256x128xf32>
    %198 = arith.truncf %197 : vector<256x128xf32> to vector<256x128xbf16>
    %c6 = arith.constant 6 : index
    %c0_89 = arith.constant 0 : index
    %c0_90 = arith.constant 0 : index
    %199 = vector.load %arg4[%c6, %c0_89, %c0_90] : memref<9x128x128xbf16, #tpu.memory_space<vmem>>, vector<1x128x128xbf16>
    %200 = vector.shape_cast %199 : vector<1x128x128xbf16> to vector<128x128xbf16>
    %cst_91 = arith.constant dense<0.000000e+00> : vector<256x128xf32>
    %201 = tpu.matmul %198, %200, %cst_91 {dimension_numbers = #tpu.dot_dimension_numbers<[1], [0], [0], [1], [0, 0, 1, 1], [], []>} : vector<256x128xbf16>, vector<128x128xbf16>, vector<256x128xf32> -> vector<256x128xf32>
    %202 = arith.addf %175, %201 : vector<256x128xf32>
    %c240_i32 = arith.constant 240 : i32
    %203 = tpu.dynamic_rotate %9 by %c240_i32 dim 0 : vector<256x128xf32>, i32 -> vector<256x128xf32>
    %c1_i32_92 = arith.constant 1 : i32
    %204 = vector.broadcast %c1_i32_92 : i32 to vector<256x128xi32>
    %205 = arith.addi %11, %204 : vector<256x128xi32>
    %c0_i32_93 = arith.constant 0 : i32
    %206 = vector.broadcast %c0_i32_93 : i32 to vector<256x128xi32>
    %207 = arith.cmpi sge, %205, %206 : vector<256x128xi32>
    %c1_i32_94 = arith.constant 1 : i32
    %208 = vector.broadcast %c1_i32_94 : i32 to vector<256x128xi32>
    %209 = arith.addi %11, %208 : vector<256x128xi32>
    %c16_i32_95 = arith.constant 16 : i32
    %210 = vector.broadcast %c16_i32_95 : i32 to vector<256x128xi32>
    %211 = arith.cmpi slt, %209, %210 : vector<256x128xi32>
    %212 = arith.andi %207, %211 : vector<256x128xi1>
    %c0_i32_96 = arith.constant 0 : i32
    %213 = vector.broadcast %c0_i32_96 : i32 to vector<256x128xi32>
    %214 = arith.addi %13, %213 : vector<256x128xi32>
    %c0_i32_97 = arith.constant 0 : i32
    %215 = vector.broadcast %c0_i32_97 : i32 to vector<256x128xi32>
    %216 = arith.cmpi sge, %214, %215 : vector<256x128xi32>
    %217 = arith.andi %212, %216 : vector<256x128xi1>
    %c0_i32_98 = arith.constant 0 : i32
    %218 = vector.broadcast %c0_i32_98 : i32 to vector<256x128xi32>
    %219 = arith.addi %13, %218 : vector<256x128xi32>
    %c16_i32_99 = arith.constant 16 : i32
    %220 = vector.broadcast %c16_i32_99 : i32 to vector<256x128xi32>
    %221 = arith.cmpi slt, %219, %220 : vector<256x128xi32>
    %222 = arith.andi %217, %221 : vector<256x128xi1>
    %cst_100 = arith.constant 0.000000e+00 : f32
    %223 = vector.broadcast %cst_100 : f32 to vector<256x128xf32>
    %224 = arith.select %222, %203, %223 : vector<256x128xi1>, vector<256x128xf32>
    %225 = arith.truncf %224 : vector<256x128xf32> to vector<256x128xbf16>
    %c7 = arith.constant 7 : index
    %c0_101 = arith.constant 0 : index
    %c0_102 = arith.constant 0 : index
    %226 = vector.load %arg4[%c7, %c0_101, %c0_102] : memref<9x128x128xbf16, #tpu.memory_space<vmem>>, vector<1x128x128xbf16>
    %227 = vector.shape_cast %226 : vector<1x128x128xbf16> to vector<128x128xbf16>
    %cst_103 = arith.constant dense<0.000000e+00> : vector<256x128xf32>
    %228 = tpu.matmul %225, %227, %cst_103 {dimension_numbers = #tpu.dot_dimension_numbers<[1], [0], [0], [1], [0, 0, 1, 1], [], []>} : vector<256x128xbf16>, vector<128x128xbf16>, vector<256x128xf32> -> vector<256x128xf32>
    %229 = arith.addf %202, %228 : vector<256x128xf32>
    %c239_i32 = arith.constant 239 : i32
    %230 = tpu.dynamic_rotate %9 by %c239_i32 dim 0 : vector<256x128xf32>, i32 -> vector<256x128xf32>
    %c1_i32_104 = arith.constant 1 : i32
    %231 = vector.broadcast %c1_i32_104 : i32 to vector<256x128xi32>
    %232 = arith.addi %11, %231 : vector<256x128xi32>
    %c0_i32_105 = arith.constant 0 : i32
    %233 = vector.broadcast %c0_i32_105 : i32 to vector<256x128xi32>
    %234 = arith.cmpi sge, %232, %233 : vector<256x128xi32>
    %c1_i32_106 = arith.constant 1 : i32
    %235 = vector.broadcast %c1_i32_106 : i32 to vector<256x128xi32>
    %236 = arith.addi %11, %235 : vector<256x128xi32>
    %c16_i32_107 = arith.constant 16 : i32
    %237 = vector.broadcast %c16_i32_107 : i32 to vector<256x128xi32>
    %238 = arith.cmpi slt, %236, %237 : vector<256x128xi32>
    %239 = arith.andi %234, %238 : vector<256x128xi1>
    %c1_i32_108 = arith.constant 1 : i32
    %240 = vector.broadcast %c1_i32_108 : i32 to vector<256x128xi32>
    %241 = arith.addi %13, %240 : vector<256x128xi32>
    %c0_i32_109 = arith.constant 0 : i32
    %242 = vector.broadcast %c0_i32_109 : i32 to vector<256x128xi32>
    %243 = arith.cmpi sge, %241, %242 : vector<256x128xi32>
    %244 = arith.andi %239, %243 : vector<256x128xi1>
    %c1_i32_110 = arith.constant 1 : i32
    %245 = vector.broadcast %c1_i32_110 : i32 to vector<256x128xi32>
    %246 = arith.addi %13, %245 : vector<256x128xi32>
    %c16_i32_111 = arith.constant 16 : i32
    %247 = vector.broadcast %c16_i32_111 : i32 to vector<256x128xi32>
    %248 = arith.cmpi slt, %246, %247 : vector<256x128xi32>
    %249 = arith.andi %244, %248 : vector<256x128xi1>
    %cst_112 = arith.constant 0.000000e+00 : f32
    %250 = vector.broadcast %cst_112 : f32 to vector<256x128xf32>
    %251 = arith.select %249, %230, %250 : vector<256x128xi1>, vector<256x128xf32>
    %252 = arith.truncf %251 : vector<256x128xf32> to vector<256x128xbf16>
    %c8 = arith.constant 8 : index
    %c0_113 = arith.constant 0 : index
    %c0_114 = arith.constant 0 : index
    %253 = vector.load %arg4[%c8, %c0_113, %c0_114] : memref<9x128x128xbf16, #tpu.memory_space<vmem>>, vector<1x128x128xbf16>
    %254 = vector.shape_cast %253 : vector<1x128x128xbf16> to vector<128x128xbf16>
    %cst_115 = arith.constant dense<0.000000e+00> : vector<256x128xf32>
    %255 = tpu.matmul %252, %254, %cst_115 {dimension_numbers = #tpu.dot_dimension_numbers<[1], [0], [0], [1], [0, 0, 1, 1], [], []>} : vector<256x128xbf16>, vector<128x128xbf16>, vector<256x128xf32> -> vector<256x128xf32>
    %256 = arith.addf %229, %255 : vector<256x128xf32>
    %c0_116 = arith.constant 0 : index
    %c0_117 = arith.constant 0 : index
    %257 = vector.load %arg5[%c0_116, %c0_117] : memref<1x128xf32, #tpu.memory_space<vmem>>, vector<1x128xf32>
    %258 = vector.broadcast %257 : vector<1x128xf32> to vector<256x128xf32>
    %259 = arith.addf %256, %258 : vector<256x128xf32>
    %cst_118 = arith.constant 0.000000e+00 : f32
    %260 = vector.broadcast %cst_118 : f32 to vector<256x128xf32>
    %261 = arith.maximumf %259, %260 : vector<256x128xf32>
    %262 = arith.truncf %261 : vector<256x128xf32> to vector<256x128xbf16>
    %c0_119 = arith.constant 0 : index
    %c0_120 = arith.constant 0 : index
    %263 = vector.load %arg6[%c0_119, %c0_120] : memref<128x256xbf16, #tpu.memory_space<vmem>>, vector<128x256xbf16>
    %cst_121 = arith.constant dense<0.000000e+00> : vector<256x256xf32>
    %264 = tpu.matmul %262, %263, %cst_121 {dimension_numbers = #tpu.dot_dimension_numbers<[1], [0], [0], [1], [0, 0, 1, 1], [], []>} : vector<256x128xbf16>, vector<128x256xbf16>, vector<256x256xf32> -> vector<256x256xf32>
    %c0_122 = arith.constant 0 : index
    %c0_123 = arith.constant 0 : index
    %265 = vector.load %arg7[%c0_122, %c0_123] : memref<1x256xf32, #tpu.memory_space<vmem>>, vector<1x256xf32>
    %266 = vector.broadcast %265 : vector<1x256xf32> to vector<256x256xf32>
    %267 = arith.addf %264, %266 : vector<256x256xf32>
    %268 = arith.addf %267, %1 : vector<256x256xf32>
    %cst_124 = arith.constant 0.000000e+00 : f32
    %269 = vector.broadcast %cst_124 : f32 to vector<256x256xf32>
    %270 = arith.maximumf %268, %269 : vector<256x256xf32>
    %271 = vector.shape_cast %270 : vector<256x256xf32> to vector<1x16x16x256xf32>
    %c0_125 = arith.constant 0 : index
    %c0_126 = arith.constant 0 : index
    %c0_127 = arith.constant 0 : index
    %c0_128 = arith.constant 0 : index
    %272 = vector.load %arg8[%c0_125, %c0_126, %c0_127, %c0_128] : memref<1x16x16x256xf32, #tpu.memory_space<vmem>>, vector<1x16x16x256xf32>
    tpu.vector_store %arg8[%c0_125, %c0_126, %c0_127, %c0_128], %271 {strides = array<i32>} : memref<1x16x16x256xf32, #tpu.memory_space<vmem>>, vector<1x16x16x256xf32>,
    return
  }
  func.func @transform_0(%arg0: i32) -> (i32, i32, i32, i32) {
    %c0_i32 = arith.constant 0 : i32
    %c0_i32_0 = arith.constant 0 : i32
    %c0_i32_1 = arith.constant 0 : i32
    %c0_i32_2 = arith.constant 0 : i32
    return %arg0, %c0_i32, %c0_i32_0, %c0_i32_1 : i32, i32, i32, i32
  }
  func.func @transform_1(%arg0: i32) -> (i32, i32) {
    %c0_i32 = arith.constant 0 : i32
    %c0_i32_0 = arith.constant 0 : i32
    %c0_i32_1 = arith.constant 0 : i32
    return %c0_i32, %c0_i32_0 : i32, i32
  }
  func.func @transform_2(%arg0: i32) -> (i32, i32) {
    %c0_i32 = arith.constant 0 : i32
    %c0_i32_0 = arith.constant 0 : i32
    %c0_i32_1 = arith.constant 0 : i32
    return %c0_i32, %c0_i32_0 : i32, i32
  }
  func.func @transform_3(%arg0: i32) -> (i32, i32, i32) {
    %c0_i32 = arith.constant 0 : i32
    %c0_i32_0 = arith.constant 0 : i32
    %c0_i32_1 = arith.constant 0 : i32
    %c0_i32_2 = arith.constant 0 : i32
    return %c0_i32, %c0_i32_0, %c0_i32_1 : i32, i32, i32
  }
  func.func @transform_4(%arg0: i32) -> (i32, i32) {
    %c0_i32 = arith.constant 0 : i32
    %c0_i32_0 = arith.constant 0 : i32
    %c0_i32_1 = arith.constant 0 : i32
    return %c0_i32, %c0_i32_0 : i32, i32
  }
  func.func @transform_5(%arg0: i32) -> (i32, i32) {
    %c0_i32 = arith.constant 0 : i32
    %c0_i32_0 = arith.constant 0 : i32
    %c0_i32_1 = arith.constant 0 : i32
    return %c0_i32, %c0_i32_0 : i32, i32
  }
  func.func @transform_6(%arg0: i32) -> (i32, i32) {
    %c0_i32 = arith.constant 0 : i32
    %c0_i32_0 = arith.constant 0 : i32
    %c0_i32_1 = arith.constant 0 : i32
    return %c0_i32, %c0_i32_0 : i32, i32
  }
  func.func @transform_7(%arg0: i32) -> (i32, i32, i32, i32) {
    %c0_i32 = arith.constant 0 : i32
    %c0_i32_0 = arith.constant 0 : i32
    %c0_i32_1 = arith.constant 0 : i32
    %c0_i32_2 = arith.constant 0 : i32
    return %arg0, %c0_i32, %c0_i32_0, %c0_i32_1 : i32, i32, i32, i32
  }
}

</mosaic_0001>

<bundles_post_ra>
// kernel: tpu_custom_call.1
= control target key start
LH: loop header
LB: loop body
LE: loop exit
PB: predicated region body
PF: predicated region fallthrough
CT: control target
= control target key end

     0   :  { %s6296_s0 = inlined_call_operand.hbm [shape: f32[2,16,16,256], index: 0, kind: input, shape index: {}]   ;;  %s6297_s1 = inlined_call_operand.hbm [shape: bf16[256,128], index: 1, kind: input, shape index: {}]   ;;  %s6298_s2 = inlined_call_operand.vmem [shape: f32[1,128], index: 2, kind: input, shape index: {}]   ;;  %s6299_s3 = inlined_call_operand.hbm [shape: bf16[9,128,128], index: 3, kind: input, shape index: {}]   ;;  %s6300_s4 = inlined_call_operand.hbm [shape: f32[1,128], index: 4, kind: input, shape index: {}]   ;;  %s6301_s5 = inlined_call_operand.hbm [shape: bf16[128,256], index: 5, kind: input, shape index: {}]   ;;  %s6302_s6 = inlined_call_operand.vmem [shape: f32[1,256], index: 6, kind: input, shape index: {}]   ;;  %s6303_s7 = inlined_call_operand.hbm [shape: f32[2,16,16,256], index: 7, kind: output, shape index: {}]  }
   0x1   :  { %6350 = sst [smem:[#allocation65_spill]] %s6297_s1 }
   0x2   :  { %12 = vsyncpa [#allocation3], 0 }
   0x3   :  { %14 = vsyncpa [#allocation3 + $0x1], 0 }
   0x4   :  { %15 = vsyncpa [#allocation6], 0 }
   0x5   :  { %16 = vsyncpa [#allocation9], 0 }
   0x6   :  { %17 = vsyncpa [#allocation4], 0 }
   0x7   :  { %19 = vsyncpa [#allocation4 + $0x1], 0  ;;  %s4680_s24 = smov 0   ;;  %s4682_s25 = smov 0  }
   0x8   :  { %s4684_s26 = smov 0   ;;  %s4686_s27 = smov 0  }
   0x9 LB: > { %s4701_s28 = sadd.s32 4294967295, %s4624_s27   ;;  %s3393_s29 = sadd.s32 4294967294, %s4624_s27   ;;  %s4624_s27 = sphi %s4686_s27, %s6486_s27   ;;  %s4620_s26 = sphi %s4684_s26, %s6485_s26   ;;  %s4616_s25 = sphi %s4682_s25, %s6484_s25   ;;  %s4612_s24 = sphi %s4680_s24, %s6483_s24  }
   0xa   : > { %p45_p0 = scmp.ne.s32.totalorder %s4616_s25, %s4612_s24  ;;  %p46_p1 = scmp.eq.s32.totalorder %s4701_s28, 0 }
   0xb   : > { %p195_p2 = scmp.eq.s32.totalorder %s4701_s28, 1  ;;  %p201_p3 = scmp.eq.s32.totalorder %s3393_s29, 1 }
   0xc   : > { %p4710_p4 = por %p46_p1, %p45_p0  ;;  %p3394_p5 = scmp.ge.s32.totalorder %s4624_s27, 1 }
   0xd   : > { %p4715_p6 = por %p201_p3, %p45_p0  ;;  %p208_p7 = scmp.lt.s32.totalorder %s4624_s27, 3 }
   0xe   : > { %s6353_s1 = sld [smem:[#allocation65_spill]]  ;;  %s4626_s13 = smov [#allocation5]  }
   0xf   : > { %p4723_p8 = pnand %p3394_p5, %p208_p7  ;;  %s221_s14 = sshll.u32 %s4626_s13, 4  ;;  %s222_s14 = int_to_ptr.vmem [resolvable:$true] %s221_s14 }
  0x10   : > { %s251_s18 = sshll.u32 %s6300_s4, 4  ;;  %s4627_s19 = smov 64   ;;  %s252_s18 = int_to_ptr.hbm [resolvable:$true] %s251_s18 }
  0x11   : > { %p4257_p9 = pneg %p4723_p8  ;;  %s4628_s20 = smov 4  }
  0x12   : > { %s4629_s21 = smov [#allocation8]   ;;  %s236_s9 = sshll.u32 %s6299_s3, 4  ;;  %s237_s9 = int_to_ptr.hbm [resolvable:$true] %s236_s9 }
  0x13   : > { %p4731_p10 = pnand %p4257_p9, %p46_p1  ;;  %s253_s22 = sshll.u32 %s4629_s21, 4  ;;  %s254_s22 = int_to_ptr.vmem [resolvable:$true] %s253_s22 }
  0x14   : > { %s219_s11 = sshll.u32 %s6353_s1, 4  ;;  %s262_s16 = sshll.u32 %s6301_s5, 4  ;;  %s220_s11 = int_to_ptr.hbm [resolvable:$true] %s219_s11  ;;  %s263_s16 = int_to_ptr.hbm [resolvable:$true] %s262_s16 }
  0x15   : > { %4260 = dma.hbm_to_vmem [thread:$0]  (!%p4731_p10), %s220_s11, 2048, %s222_s14, [#allocation6], %s4627_s19, %s4627_s19, %s4628_s20  }
  0x16   : > { %4266 = dma.hbm_to_vmem [thread:$0]  (!%p4731_p10), %s252_s18, 16, %s254_s22, [#allocation9]  }
  0x17   : > { %s4630_s11 = smov [#allocation7]   ;;  %s4631_s17 = smov [#allocation10]  }
  0x18   : > { %s238_s14 = sshll.u32 %s4630_s11, 4  ;;  %s264_s18 = sshll.u32 %s4631_s17, 4  ;;  %s239_s14 = int_to_ptr.vmem [resolvable:$true] %s238_s14  ;;  %s265_s18 = int_to_ptr.vmem [resolvable:$true] %s264_s18 }
  0x19   : > { %4263 = dma.hbm_to_vmem [thread:$0]  (!%p4731_p10), %s237_s9, 9216, %s239_s14, [#allocation6], %s4627_s19, %s4627_s19, %s4628_s20  }
  0x1a   : > { %s4632_s21 = smov 128   ;;  %s4633_s22 = smov 8  }
  0x1b   : > { %4269 = dma.hbm_to_vmem [thread:$0]  (!%p4731_p10), %s263_s16, 2048, %s265_s18, [#allocation9], %s4632_s21, %s4632_s21, %s4633_s22  }
  0x1c   : > { %s4754_s23 = sadd.s32 1, %s4624_s27   ;;  %s32_s10 = sadd.s32 1, %s4620_s26 }
  0x1d   : > { %s29_s29 = ssub.s32 %s4624_s27, %s4754_s23  ;;  %p39_p13 = scmp.ne.s32.totalorder %s4620_s26, %s4616_s25 }
  0x1e   : > { %p30_p12 = scmp.eq.s32.totalorder %s29_s29, 0  ;;  %p40_p0 = scmp.eq.s32.totalorder %s4624_s27, 0 }
  0x1f   : > { %p4767_p5 = por %p195_p2, %p39_p13  ;;  %p4282_p7 = scmp.lt.s32.totalorder %s4624_s27, 2 }
  0x20   : > { %s4763_s13 = scalar_select %p30_p12, %s4620_s26, %s32_s10  }
  0x21   : > { %p41_p3 = por %p40_p0, %p39_p13  ;;  %s281_s20 = sand.u32 1, %s4620_s26  }
  0x22   : > { %s3400_s15 = sshll.u32 %s281_s20, 9  ;;  %s4107_s9 = sshll.u32 %s4624_s27, 9 }
  0x23   : > { %s290_s14 = scalar_lea.hbm %s6296_s0, %s4107_s9  ;;  %s285_s17 = scalar_lea.vmem [#allocation2], %s3400_s15 }
  0x24   : > { %s293_s18 = sshll.u32 %s285_s17, 4  ;;  %s291_s21 = sshll.u32 %s290_s14, 4  ;;  %s294_s18 = int_to_ptr.vmem [resolvable:$true] %s293_s18  ;;  %s292_s21 = int_to_ptr.hbm [resolvable:$true] %s291_s21 }
  0x25   : > { %p4777_p9 = pnand %p4282_p7, %p41_p3  ;;  %s282_s29 = scalar_lea.sflag [#allocation3], %s281_s20 }
  0x26   : > { %s4520_s10 = sshra.s32 %s292_s21, 4  ;;  %s4527_s16 = scalar_lea.hbm %s6296_s0, 1024  ;;  %s4521_s10 = int_to_ptr.hbm [resolvable:$true] %s4520_s10 }
  0x27   : > { %s4522_s1 = scalar_lea.hbm %s4521_s10, 512  ;;  %p4524_p10 = pneg %p4777_p9 }
  0x28   : > { %p4523_p2 = scmp.ne.s32.totalorder %s4521_s10, %s4522_s1  ;;  %p4528_p0 = scmp.lt.s32.totalorder %s4521_s10, %s6296_s0 }
  0x29   : > { %p4529_p3 = scmp.lt.s32.totalorder %s4527_s16, %s4522_s1 }
  0x2a   : > { %p4525_p12 = pnand %p4524_p10, %p4523_p2 }
  0x2b   : > { %p4530_p7 = por %p4529_p3, %p4528_p0 }
  0x2c   : > { %p4526_p13 = pneg %p4525_p12 }
  0x2e   : > { %p4531_p11 = pnand %p4530_p7, %p4526_p13 }
  0x30   : > { %4534 = shalt.err (!%p4531_p11)
}
  0x31   : > { %s4634_s20 = smov 256   ;;  %s4635_s17 = smov 16  }
  0x32   : > { %4273 = dma.hbm_to_vmem [thread:$0]  (!%p4777_p9), %s292_s21, 8192, %s294_s18, %s282_s29, %s4634_s20, %s4634_s20, %s4635_s17  }
  0x33   : > { %305 = sbr.rel (%p4723_p8) target bundleno = 1429 (0x595), region = 48 }
  0x38   : > { %s4794_s9 = sand.u32 1, %s4616_s25  }
  0x39   : > { %s3404_s10 = sshll.u32 %s4794_s9, 9  ;;  %s308_s1 = scalar_lea.sflag [#allocation3], %s4794_s9 }
  0x3a   : > { %s4800_s15 = scalar_lea.vmem [#allocation2], %s3404_s10 }
  0x3b   : > { %4595 = dma.done.wait (%p4710_p4), %s308_s1, 8192  }
  0x3c   : > { %4597 = vsyncadd (%p4710_p4), %s308_s1, 4294959104 }
  0x3d   : > { %4599 = dma.done.wait (%p46_p1), [#allocation6], 11264  }
  0x3e   : > { %4601 = vsyncadd (%p46_p1), [#allocation6], 4294956032 }
  0x3f   : > { %4603 = dma.done.wait (%p46_p1), [#allocation9], 2064  }
  0x40   : > { %4605 = vsyncadd (%p46_p1), [#allocation9], 4294965232  ;;  %v4115_v0 = vld [vmem:[#allocation5 + $0x38] sm:$0xff]  ;;  %v4114_v1 = vld [vmem:[#allocation5 + $0x30] sm:$0xff]  ;;  %vm4637_vm1 = vmmov 1   ;;  %s5995_s22 = scalar_lea.vmem [#allocation11], %s3404_s10 }
  0x41   : > { %4213 = vmatpush.bf16.msra.mxu1 %v4115_v0  ;;  %591 = vmatpush.bf16.msra.mxu0 %v4115_v0  ;;  %v4113_v2 = vld [vmem:[#allocation5 + $0x28] sm:$0xff]  ;;  %v4112_v3 = vld [vmem:[#allocation5 + $0x20] sm:$0xff]  ;;  %v4111_v4 = vld [vmem:[#allocation5 + $0x18] sm:$0xff]  ;;  %s4212_s29 = sshll.u32 %s4701_s28, 9  ;;  %s3279_s20 = sshll.u32 %s5995_s22, 4  ;;  %s3280_s20 = int_to_ptr.vmem [resolvable:$true] %s3279_s20 }
  0x42   : > { %4214 = vmatpush.bf16.msra.mxu2 %v4115_v0  ;;  %4215 = vmatpush.bf16.msra.mxu3 %v4115_v0  ;;  %v4110_v5 = vld [vmem:[#allocation5 + $0x10] sm:$0xff]  ;;  %v4109_v6 = vld [vmem:[#allocation5 + $0x8] sm:$0xff]  ;;  %v4108_v7 = vld [vmem:[#allocation5] sm:$0xff]  ;;  %s3278_s14 = scalar_lea.hbm %s6303_s7, %s4212_s29  ;;  %s3267_s10 = scalar_lea.sflag [#allocation4], %s4794_s9 }
  0x43   : > { %v379_v8 = vld [vmem:[%s4800_s15 + $0x80] sm:$0xff]  ;;  %v381_v9 = vld [vmem:[%s4800_s15 + $0x90] sm:$0xff]  ;;  %v4123_v10 = vld [vmem:[#allocation5 + $0x78] sm:$0xff]  ;;  %s3281_s17 = sshll.u32 %s3278_s14, 4  ;;  %s4570_s18 = scalar_lea.hbm %s6303_s7, 1024  ;;  %s3282_s17 = int_to_ptr.hbm [resolvable:$true] %s3281_s17 }
  0x44   : > { %v435_v11 = vpack.c.bf16 %v381_v9, %v379_v8  ;;  %v4122_v12 = vld [vmem:[#allocation5 + $0x70] sm:$0xff]  ;;  %v4121_v13 = vld [vmem:[#allocation5 + $0x68] sm:$0xff]  ;;  %v4120_v14 = vld [vmem:[#allocation5 + $0x60] sm:$0xff]  ;;  %s4564_s28 = sshra.s32 %s3282_s17, 4  ;;  %s4565_s28 = int_to_ptr.hbm [resolvable:$true] %s4564_s28 }
  0x45   : > { %4216 = vmatpush.bf16.msra.mxu1 %v4114_v1  ;;  %592 = vmatpush.bf16.msra.mxu0 %v4114_v1  ;;  %v383_v15 = vld [vmem:[%s4800_s15 + $0xa0] sm:$0xff]  ;;  %v385_v16 = vld [vmem:[%s4800_s15 + $0xb0] sm:$0xff]  ;;  %v4119_v17 = vld [vmem:[#allocation5 + $0x58] sm:$0xff]  ;;  %s4566_s1 = scalar_lea.hbm %s4565_s28, 512  ;;  %p4571_p11 = scmp.lt.s32.totalorder %s4565_s28, %s6303_s7 }
  0x46   : > { %4217 = vmatpush.bf16.msra.mxu2 %v4114_v1  ;;  %4218 = vmatpush.bf16.msra.mxu3 %v4114_v1  ;;  %v437_v18 = vpack.c.bf16 %v385_v16, %v383_v15  ;;  %v4118_v19 = vld [vmem:[#allocation5 + $0x50] sm:$0xff]  ;;  %v363_v20 = vld [vmem:[%s4800_s15] sm:$0xff]  ;;  %v4117_v22 = vld [vmem:[#allocation5 + $0x48] sm:$0xff]  ;;  %p4567_p1 = scmp.ne.s32.totalorder %s4565_s28, %s4566_s1  ;;  %p4572_p9 = scmp.lt.s32.totalorder %s4570_s18, %s4566_s1 }
  0x47   : > { %v365_v21 = vld [vmem:[%s4800_s15 + $0x10] sm:$0xff]  ;;  %v4116_v24 = vld [vmem:[#allocation5 + $0x40] sm:$0xff]  ;;  %v364_v37 = vld [vmem:[%s4800_s15 + $0x8] sm:$0xff] }
  0x48   : > { %v427_v23 = vpack.c.bf16 %v365_v21, %v363_v20  ;;  %v387_v25 = vld [vmem:[%s4800_s15 + $0xc0] sm:$0xff]  ;;  %v389_v26 = vld [vmem:[%s4800_s15 + $0xd0] sm:$0xff]  ;;  %v366_v38 = vld [vmem:[%s4800_s15 + $0x18] sm:$0xff]  ;;  %p4568_p4 = pnand %p4567_p1, %p4767_p5  ;;  %p4573_p2 = por %p4572_p9, %p4571_p11 }
  0x49   : > { %4219 = vmatpush.bf16.msra.mxu1 %v4113_v2  ;;  %593 = vmatpush.bf16.msra.mxu0 %v4113_v2  ;;  %v439_v27 = vpack.c.bf16 %v389_v26, %v387_v25  ;;  %v367_v28 = vld [vmem:[%s4800_s15 + $0x20] sm:$0xff]  ;;  %v369_v29 = vld [vmem:[%s4800_s15 + $0x30] sm:$0xff]  ;;  %v428_v39 = vpack.c.bf16 %v366_v38, %v364_v37  ;;  %v368_v43 = vld [vmem:[%s4800_s15 + $0x28] sm:$0xff] }
  0x4a   : > { %4220 = vmatpush.bf16.msra.mxu2 %v4113_v2  ;;  %4221 = vmatpush.bf16.msra.mxu3 %v4113_v2  ;;  %v429_v30 = vpack.c.bf16 %v369_v29, %v367_v28  ;;  %v391_v31 = vld [vmem:[%s4800_s15 + $0xe0] sm:$0xff]  ;;  %v393_v32 = vld [vmem:[%s4800_s15 + $0xf0] sm:$0xff]  ;;  %v370_v44 = vld [vmem:[%s4800_s15 + $0x38] sm:$0xff]  ;;  %p4569_p8 = pneg %p4568_p4 }
  0x4b   : > { %v441_v33 = vpack.c.bf16 %v393_v32, %v391_v31  ;;  %v371_v34 = vld [vmem:[%s4800_s15 + $0x40] sm:$0xff]  ;;  %v373_v35 = vld [vmem:[%s4800_s15 + $0x50] sm:$0xff]  ;;  %v430_v45 = vpack.c.bf16 %v370_v44, %v368_v43  ;;  %v372_v49 = vld [vmem:[%s4800_s15 + $0x48] sm:$0xff] }
  0x4c   : > { %v431_v36 = vpack.c.bf16 %v373_v35, %v371_v34  ;;  %v375_v40 = vld [vmem:[%s4800_s15 + $0x60] sm:$0xff]  ;;  %v377_v41 = vld [vmem:[%s4800_s15 + $0x70] sm:$0xff]  ;;  %v374_v50 = vld [vmem:[%s4800_s15 + $0x58] sm:$0xff]  ;;  %p4574_p10 = pnand %p4573_p2, %p4569_p8 }
  0x4d   : > { %4222 = vmatpush.bf16.msra.mxu1 %v4112_v3  ;;  %594 = vmatpush.bf16.msra.mxu0 %v4112_v3  ;;  %v433_v42 = vpack.c.bf16 %v377_v41, %v375_v40  ;;  %v395_v46 = vld [vmem:[%s4800_s15 + $0x100] sm:$0xff]  ;;  %v397_v47 = vld [vmem:[%s4800_s15 + $0x110] sm:$0xff]  ;;  %v432_v51 = vpack.c.bf16 %v374_v50, %v372_v49  ;;  %v376_v55 = vld [vmem:[%s4800_s15 + $0x68] sm:$0xff] }
  0x4e   : > { %4223 = vmatpush.bf16.msra.mxu2 %v4112_v3  ;;  %4224 = vmatpush.bf16.msra.mxu3 %v4112_v3  ;;  %v443_v48 = vpack.c.bf16 %v397_v47, %v395_v46  ;;  %v399_v52 = vld [vmem:[%s4800_s15 + $0x120] sm:$0xff]  ;;  %v401_v53 = vld [vmem:[%s4800_s15 + $0x130] sm:$0xff]  ;;  %v378_v56 = vld [vmem:[%s4800_s15 + $0x78] sm:$0xff] }
  0x4f   : > { %v445_v54 = vpack.c.bf16 %v401_v53, %v399_v52  ;;  %v434_v57 = vpack.c.bf16 %v378_v56, %v376_v55  ;;  %v403_v58 = vld [vmem:[%s4800_s15 + $0x140] sm:$0xff]  ;;  %v405_v59 = vld [vmem:[%s4800_s15 + $0x150] sm:$0xff]  ;;  %v380_v61 = vld [vmem:[%s4800_s15 + $0x88] sm:$0xff] }
  0x50   : > { %v447_v60 = vpack.c.bf16 %v405_v59, %v403_v58  ;;  %v382_v62 = vld [vmem:[%s4800_s15 + $0x98] sm:$0xff]  ;;  %v4138_v2 = vld [vmem:[#allocation7 + $0x70] sm:$0xff]  ;;  %v4137_v3 = vld [vmem:[#allocation7 + $0x68] sm:$0xff] }
  0x51   : > { %4225 = vmatpush.bf16.msra.mxu1 %v4111_v4  ;;  %595 = vmatpush.bf16.msra.mxu0 %v4111_v4  ;;  %v4139_v63 = vld [vmem:[#allocation7 + $0x78] sm:$0xff]  ;;  %v436_v0 = vpack.c.bf16 %v382_v62, %v380_v61  ;;  %v409_v8 = vld [vmem:[%s4800_s15 + $0x170] sm:$0xff]  ;;  %v4145_v16 = vld [vmem:[#allocation7 + $0xa8] sm:$0xff] }
  0x52   : > { %4226 = vmatpush.bf16.msra.mxu2 %v4111_v4  ;;  %4227 = vmatpush.bf16.msra.mxu3 %v4111_v4  ;;  %v4143_v21 = vld [vmem:[#allocation7 + $0x98] sm:$0xff]  ;;  %v4141_v29 = vld [vmem:[#allocation7 + $0x88] sm:$0xff]  ;;  %v411_v37 = vld [vmem:[%s4800_s15 + $0x180] sm:$0xff] }
  0x53   : > { %v390_v25 = vld [vmem:[%s4800_s15 + $0xd8] sm:$0xff]  ;;  %v392_v32 = vld [vmem:[%s4800_s15 + $0xe8] sm:$0xff]  ;;  %v413_v38 = vld [vmem:[%s4800_s15 + $0x190] sm:$0xff] }
  0x54   : > { %v396_v43 = vld [vmem:[%s4800_s15 + $0x108] sm:$0xff]  ;;  %v398_v44 = vld [vmem:[%s4800_s15 + $0x118] sm:$0xff]  ;;  %v4881_v46 = vld [vmem:[%s6298_s2] ss:$0 sm:$0xff] }
  0x55   : > { %4228 = vmatpush.bf16.msra.mxu1 %v4110_v5  ;;  %596 = vmatpush.bf16.msra.mxu0 %v4110_v5  ;;  %v444_v47 = vpack.c.bf16 %v398_v44, %v396_v43  ;;  %v415_v53 = vld [vmem:[%s4800_s15 + $0x1a0] sm:$0xff] }
  0x56   : > { %4229 = vmatpush.bf16.msra.mxu2 %v4110_v5  ;;  %4230 = vmatpush.bf16.msra.mxu3 %v4110_v5  ;;  %v4147_v5 = vld [vmem:[#allocation7 + $0xb8] sm:$0xff] }
  0x59   : > { %4231 = vmatpush.bf16.msra.mxu1 %v4109_v6  ;;  %597 = vmatpush.bf16.msra.mxu0 %v4109_v6 }
  0x5a   : > { %4232 = vmatpush.bf16.msra.mxu2 %v4109_v6  ;;  %4233 = vmatpush.bf16.msra.mxu3 %v4109_v6  ;;  %v4136_v6 = vld [vmem:[#allocation7 + $0x60] sm:$0xff] }
  0x5d   : > { %4234 = vmatpush.bf16.msra.mxu1 %v4108_v7  ;;  %598 = vmatpush.bf16.msra.mxu0 %v4108_v7 }
  0x5e   : > { %4235 = vmatpush.bf16.msra.mxu2 %v4108_v7  ;;  %4236 = vmatpush.bf16.msra.mxu3 %v4108_v7  ;;  %v407_v7 = vld [vmem:[%s4800_s15 + $0x160] sm:$0xff] }
  0x5f   : > { %v449_v9 = vpack.c.bf16 %v409_v8, %v407_v7 }
  0x60   : > { %619 = vmatmul.bf16.vlgmr.msra.gmra.mxu1 %v435_v11  ;;  %599 = vmatmul.bf16.vlgmr.msra.gmra.mxu0 %v427_v23  ;;  %v384_v11 = vld [vmem:[%s4800_s15 + $0xa8] sm:$0xff]  ;;  %v4142_v23 = vld [vmem:[#allocation7 + $0x90] sm:$0xff] }
  0x61   : > { %680 = vmatpush.bf16.msrb.mxu1 %v4123_v10  ;;  %639 = vmatmul.bf16.vlgmr.msra.gmra.mxu2 %v443_v48  ;;  %v4146_v10 = vld [vmem:[#allocation7 + $0xb0] sm:$0xff] }
  0x62   : > { %1052 = vmatpush.bf16.msrb.mxu2 %v4139_v63  ;;  %1458 = vmatpush.bf16.msrb.mxu0 %v4147_v5  ;;  %v400_v63 = vld [vmem:[%s4800_s15 + $0x128] sm:$0xff] }
  0x65   : > { %681 = vmatpush.bf16.msrb.mxu1 %v4122_v12  ;;  %v386_v12 = vld [vmem:[%s4800_s15 + $0xb8] sm:$0xff] }
  0x66   : > { %1053 = vmatpush.bf16.msrb.mxu2 %v4138_v2  ;;  %1459 = vmatpush.bf16.msrb.mxu0 %v4146_v10 }
  0x69   : > { %682 = vmatpush.bf16.msrb.mxu1 %v4121_v13  ;;  %v4135_v13 = vld [vmem:[#allocation7 + $0x58] sm:$0xff] }
  0x6a   : > { %1054 = vmatpush.bf16.msrb.mxu2 %v4137_v3  ;;  %1460 = vmatpush.bf16.msrb.mxu0 %v4145_v16  ;;  %v419_v16 = vld [vmem:[%s4800_s15 + $0x1c0] sm:$0xff] }
  0x6d   : > { %683 = vmatpush.bf16.msrb.mxu1 %v4120_v14  ;;  %v438_v14 = vpack.c.bf16 %v386_v12, %v384_v11 }
  0x6e   : > { %1055 = vmatpush.bf16.msrb.mxu2 %v4136_v6 }
  0x70   : > { %624 = vmatmul.bf16.gmra.mxu1 %v437_v18  ;;  %604 = vmatmul.bf16.gmra.mxu0 %v429_v30  ;;  %v4144_v18 = vld [vmem:[#allocation7 + $0xa0] sm:$0xff] }
  0x71   : > { %684 = vmatpush.bf16.msrb.mxu1 %v4119_v17  ;;  %644 = vmatmul.bf16.gmra.mxu2 %v445_v54  ;;  %v4134_v17 = vld [vmem:[#allocation7 + $0x50] sm:$0xff]  ;;  %v4140_v30 = vld [vmem:[#allocation7 + $0x80] sm:$0xff] }
  0x72   : > { %1056 = vmatpush.bf16.msrb.mxu2 %v4135_v13  ;;  %1461 = vmatpush.bf16.msrb.mxu0 %v4144_v18  ;;  %v417_v54 = vld [vmem:[%s4800_s15 + $0x1b0] sm:$0xff] }
  0x73   : > { %v453_v55 = vpack.c.bf16 %v417_v54, %v415_v53 }
  0x75   : > { %685 = vmatpush.bf16.msrb.mxu1 %v4118_v19  ;;  %v4133_v19 = vld [vmem:[#allocation7 + $0x48] sm:$0xff] }
  0x76   : > { %1057 = vmatpush.bf16.msrb.mxu2 %v4134_v17  ;;  %1462 = vmatpush.bf16.msrb.mxu0 %v4143_v21  ;;  %v421_v17 = vld [vmem:[%s4800_s15 + $0x1d0] sm:$0xff] }
  0x79   : > { %686 = vmatpush.bf16.msrb.mxu1 %v4117_v22  ;;  %v4132_v22 = vld [vmem:[#allocation7 + $0x40] sm:$0xff] }
  0x7a   : > { %1058 = vmatpush.bf16.msrb.mxu2 %v4133_v19  ;;  %1463 = vmatpush.bf16.msrb.mxu0 %v4142_v23  ;;  %v455_v19 = vpack.c.bf16 %v421_v17, %v419_v16  ;;  %v408_v17 = vld [vmem:[%s4800_s15 + $0x168] sm:$0xff] }
  0x7d   : > { %687 = vmatpush.bf16.msrb.mxu1 %v4116_v24  ;;  %v388_v24 = vld [vmem:[%s4800_s15 + $0xc8] sm:$0xff] }
  0x7e   : > { %1059 = vmatpush.bf16.msrb.mxu2 %v4132_v22  ;;  %v440_v26 = vpack.c.bf16 %v390_v25, %v388_v24  ;;  %1464 = vmatpush.bf16.msrb.mxu0 %v4141_v29  ;;  %v4131_v25 = vld [vmem:[#allocation7 + $0x38] sm:$0xff] }
  0x7f   : > { %1189 = vmatpush.bf16.msrb.mxu3 %v4131_v25 }
  0x80   : > { %629 = vmatmul.bf16.gmra.mxu1 %v439_v27  ;;  %609 = vmatmul.bf16.gmra.mxu0 %v431_v36  ;;  %v6304_v27 = vmov 0.0|0.0  }
  0x81   : > { %649 = vmatmul.bf16.gmra.mxu2 %v447_v60 }
  0x82   : > { %1465 = vmatpush.bf16.msrb.mxu0 %v4140_v30 }
  0x90   : > { %634 = vmatmul.bf16.gmra.mxu1 %v441_v33  ;;  %614 = vmatmul.bf16.gmra.mxu0 %v433_v42  ;;  %v394_v33 = vld [vmem:[%s4800_s15 + $0xf8] sm:$0xff]  ;;  %v801_v42 = vlaneseq }
  0x91   : > { %654 = vmatmul.bf16.gmra.mxu2 %v449_v9  ;;  %v442_v35 = vpack.c.bf16 %v394_v33, %v392_v32 }
  0xa0   : > { %688 = vmatmul.bf16.vlgmr.msrb.gmra.mxu1 %v428_v39  ;;  %1466 = vmatmul.bf16.vlgmr.msrb.gmra.mxu0 %v6304_v27  ;;  %v451_v39 = vpack.c.bf16 %v413_v38, %v411_v37  ;;  %v4130_v37 = vld [vmem:[#allocation7 + $0x30] sm:$0xff] }
  0xa1   : > { %1060 = vmatmul.bf16.vlgmr.msrb.gmra.mxu2 %v6304_v27  ;;  %1190 = vmatpush.bf16.msrb.mxu3 %v4130_v37  ;;  %v4124_v37 = vld [vmem:[#allocation7] sm:$0xff] }
  0xa2   : > { %659 = vmatmul.bf16.vlgmr.msra.gmra.mxu3 %v451_v39  ;;  %v404_v39 = vld [vmem:[%s4800_s15 + $0x148] sm:$0xff] }
  0xb0   : > { %693 = vmatmul.bf16.gmra.mxu1 %v430_v45  ;;  %v4876_v45 = vshrl.u32 %v801_v42, 7 }
  0xb2   : > { %v866_v50 = vadd.s32 4294967295, %v4876_v45  ;;  %664 = vmatmul.bf16.gmra.mxu3 %v453_v55  ;;  %vm835_vm3 = vcmp.lt.s32.totalorder %v4876_v45, 1  ;;  %v803_v2 = vadd.s32 8, %v4876_v45  ;;  %vm1309_vm4 = vcmp.lt.s32.totalorder %v4876_v45, 7  ;;  %v4128_v55 = vld [vmem:[#allocation7 + $0x20] sm:$0xff] }
  0xb4   : > { %vm868_vm0 = vcmp.ge.s32.totalorder %v866_v50, 0  ;;  %v1341_v11 = vadd.s32 1, %v803_v2  ;;  %v4127_v2 = vld [vmem:[#allocation7 + $0x18] sm:$0xff] }
  0xb5   : > { %vm4886_vm2 = vmpackc.low %vm4637_vm1, %vm868_vm0 }
  0xb6   : > { %vm1345_vm5 = vcmp.lt.s32.totalorder %v1341_v11, 16 }
  0xb7   : > { %vm4925_vm6 = vmpackc.low %vm1345_vm5, %vm4637_vm1 }
  0xc0   : > { %698 = vmatmul.bf16.gmra.mxu1 %v432_v51 }
  0xc2   : > { %669 = vmatmul.bf16.gmra.mxu3 %v455_v19 }
  0xd0   : > { %703 = vmatmul.bf16.gmra.mxu1 %v434_v57 }
  0xdd   : > { %v4846_v1 = vpop.f32.mrf.mxu1  ;;  %v600_v34 = vpop.f32.mrf.mxu0 }
  0xde   : > { %v601_v51 = vadd.f32 %v4881_v46, %v600_v34 }
  0xe0   : > { %708 = vmatmul.bf16.gmra.mxu1 %v436_v0  ;;  %v402_v0 = vld [vmem:[%s4800_s15 + $0x138] sm:$0xff] }
  0xe1   : > { %v446_v8 = vpack.c.bf16 %v402_v0, %v400_v63 }
  0xe4   : > { %v4963_v25 = vpop.f32.mrf.mxu2 }
  0xe5   : > { %v4848_v4 = vpop.f32.mrf.mxu1  ;;  %v602_v40 = vpop.f32.mrf.mxu0 }
  0xe6   : > { %v603_v57 = vadd.f32 %v4881_v46, %v602_v40  ;;  %v406_v40 = vld [vmem:[%s4800_s15 + $0x158] sm:$0xff] }
  0xe7   : > { %v448_v50 = vpack.c.bf16 %v406_v40, %v404_v39 }
  0xed   : > { %v4854_v15 = vpop.f32.mrf.mxu1  ;;  %v605_v49 = vpop.f32.mrf.mxu0 }
  0xee   : > { %v606_v6 = vadd.f32 %v4881_v46, %v605_v49 }
  0xf0   : > { %713 = vmatmul.bf16.gmra.mxu1 %v438_v14 }
  0xf5   : > { %v4856_v20 = vpop.f32.mrf.mxu1  ;;  %v607_v61 = vpop.f32.mrf.mxu0 }
  0xf6   : > { %v608_v24 = vadd.f32 %v4881_v46, %v607_v61 }
  0xfd   : > { %v4861_v28 = vpop.f32.mrf.mxu1  ;;  %v610_v18 = vpop.f32.mrf.mxu0 }
  0xfe   : > { %v611_v43 = vadd.f32 %v4881_v46, %v610_v18  ;;  %v410_v18 = vld [vmem:[%s4800_s15 + $0x178] sm:$0xff] }
 0x100   : > { %718 = vmatmul.bf16.gmra.mxu1 %v440_v26 }
 0x105   : > { %v4863_v31 = vpop.f32.mrf.mxu1 }
 0x10d   : > { %v4868_v36 = vpop.f32.mrf.mxu1 }
 0x110   : > { %723 = vmatmul.bf16.gmra.mxu1 %v442_v35 }
 0x115   : > { %v4872_v41 = vpop.f32.mrf.mxu1 }
 0x11d   : > { %v689_v48 = vpop.f32.mrf.mxu1 }
 0x11e   : > { %v690_v56 = vadd.f32 %v689_v48, %v601_v51  ;;  %v612_v48 = vpop.f32.mrf.mxu0 }
 0x11f   : > { %v613_v0 = vadd.f32 %v4881_v46, %v612_v48 }
 0x120   : > { %728 = vmatmul.bf16.gmra.mxu1 %v444_v47  ;;  %v4893_v59 = vmax.f32 %v690_v56, 0.0  ;;  %v4129_v47 = vld [vmem:[#allocation7 + $0x28] sm:$0xff] }
 0x121   : > { %1191 = vmatpush.bf16.msrb.mxu3 %v4129_v47 }
 0x122   : > { %v6307_v3 = vrot.slane %v4893_v59, 7  ;;  %v6306_v21 = vrot.slane %v4893_v59, 1 }
 0x125   : > { %v691_v58 = vpop.f32.mrf.mxu1  ;;  %1192 = vmatpush.bf16.msrb.mxu3 %v4128_v55  ;;  %v4980_v55 = vpop.f32.mrf.mxu2 }
 0x126   : > { %v692_v60 = vadd.f32 %v691_v58, %v603_v57  ;;  %v423_v58 = vld [vmem:[%s4800_s15 + $0x1e0] sm:$0xff] }
 0x128   : > { %v770_v62 = vmax.f32 %v692_v60, 0.0  ;;  %v425_v60 = vld [vmem:[%s4800_s15 + $0x1f0] sm:$0xff] }
 0x129   : > { %v457_v61 = vpack.c.bf16 %v425_v60, %v423_v58  ;;  %1193 = vmatpush.bf16.msrb.mxu3 %v4127_v2  ;;  %v412_v58 = vld [vmem:[%s4800_s15 + $0x188] sm:$0xff]  ;;  %v414_v60 = vld [vmem:[%s4800_s15 + $0x198] sm:$0xff] }
 0x12a   : > { %v805_v5 = vrot.slane %v770_v62, 7  ;;  %v4902_v7 = vpack.c.bf16 %v770_v62, %v4893_v59  ;;  %v1279_v13 = vrot.slane %v770_v62, 1  ;;  %v452_v2 = vpack.c.bf16 %v414_v60, %v412_v58 }
 0x12b   : > { %674 = vmatmul.bf16.gmra.mxu3 %v457_v61 }
 0x12c   : > { %1065 = vmatmul.bf16.gmra.mxu2 %v4902_v7  ;;  %v4909_v9 = vsel %vm835_vm3, %v6307_v3, %v805_v5  ;;  %v1339_v30 = vsel %vm1309_vm4, %v6306_v21, %v1279_v13 }
 0x12d   : > { %v694_v10 = vpop.f32.mrf.mxu1 }
 0x12e   : > { %v695_v12 = vadd.f32 %v694_v10, %v606_v6 }
 0x130   : > { %v771_v14 = vmax.f32 %v695_v12, 0.0  ;;  %733 = vmatmul.bf16.gmra.mxu1 %v446_v8  ;;  %v615_v12 = vpop.f32.mrf.mxu0 }
 0x132   : > { %v806_v22 = vrot.slane %v771_v14, 7  ;;  %v1280_v23 = vrot.slane %v771_v14, 1 }
 0x134   : > { %v863_v26 = vsel %vm835_vm3, %v805_v5, %v806_v22  ;;  %v1338_v29 = vsel %vm1309_vm4, %v1279_v13, %v1280_v23 }
 0x135   : > { %v696_v33 = vpop.f32.mrf.mxu1  ;;  %v4929_v34 = vpack.c.bf16 %v1338_v29, %v1339_v30 }
 0x136   : > { %v697_v35 = vadd.f32 %v696_v33, %v608_v24  ;;  %v4125_v24 = vld [vmem:[#allocation7 + $0x8] sm:$0xff] }
 0x137   : > { %6362 = vst [vmem:[#allocation16_spill] sm:$0xff] %v4929_v34  ;;  %3617 = vmatmul.msk.bf16.gmra.mxu0 %vm4925_vm6, %v4929_v34 }
 0x138   : > { %v772_v38 = vmax.f32 %v697_v35, 0.0 }
 0x13a   : > { %v807_v42 = vrot.slane %v772_v38, 7  ;;  %v4937_v44 = vpack.c.bf16 %v772_v38, %v771_v14  ;;  %v1281_v56 = vrot.slane %v772_v38, 1  ;;  %v4126_v14 = vld [vmem:[#allocation7 + $0x10] sm:$0xff]  ;;  %v617_v38 = vpop.f32.mrf.mxu0 }
 0x13b   : > { %1194 = vmatpush.bf16.msrb.mxu3 %v4126_v14  ;;  %v618_v47 = vadd.f32 %v4881_v46, %v617_v38 }
 0x13c   : > { %v862_v49 = vsel %vm835_vm3, %v806_v22, %v807_v42  ;;  %1070 = vmatmul.bf16.gmra.mxu2 %v4937_v44  ;;  %v1337_v6 = vsel %vm1309_vm4, %v1280_v23, %v1281_v56  ;;  %v616_v22 = vadd.f32 %v4881_v46, %v615_v12  ;;  %v4996_v12 = vpop.f32.mrf.mxu2 }
 0x13d   : > { %v4942_v51 = vpack.c.bf16 %v862_v49, %v863_v26  ;;  %v699_v53 = vpop.f32.mrf.mxu1  ;;  %v450_v26 = vpack.c.bf16 %v410_v18, %v408_v17  ;;  %v4155_v17 = vld [vmem:[#allocation7 + $0xf8] sm:$0xff]  ;;  %v623_v18 = vadd.f32 %v4881_v46, %v4848_v4  ;;  %v416_v4 = vld [vmem:[%s4800_s15 + $0x1a8] sm:$0xff] }
 0x13e   : > { %v700_v54 = vadd.f32 %v699_v53, %v611_v43  ;;  %1650 = vmatpush.bf16.msra.mxu1 %v4155_v17  ;;  %v4162_v17 = vld [vmem:[#allocation7 + $0x130] sm:$0xff] }
 0x13f   : > { %1195 = vmatpush.bf16.msrb.mxu3 %v4125_v24 }
 0x140   : > { %v773_v57 = vmax.f32 %v700_v54, 0.0  ;;  %738 = vmatmul.bf16.gmra.mxu1 %v448_v50 }
 0x142   : > { %v808_v62 = vrot.slane %v773_v57, 7  ;;  %v1282_v63 = vrot.slane %v773_v57, 1 }
 0x143   : > { %1196 = vmatpush.bf16.msrb.mxu3 %v4124_v37  ;;  %v418_v37 = vld [vmem:[%s4800_s15 + $0x1b8] sm:$0xff] }
 0x144   : > { %v1336_v5 = vsel %vm1309_vm4, %v1281_v56, %v1282_v63  ;;  %v861_v8 = vsel %vm835_vm3, %v807_v42, %v808_v62  ;;  %v5013_v38 = vpop.f32.mrf.mxu2 }
 0x145   : > { %v701_v10 = vpop.f32.mrf.mxu1  ;;  %v4953_v11 = vpack.c.bf16 %v1336_v5, %v1337_v6 }
 0x146   : > { %v702_v13 = vadd.f32 %v701_v10, %v613_v0  ;;  %1197 = vmatmul.bf16.vlgmr.msrb.gmra.mxu3 %v6304_v27  ;;  %v621_v0 = vadd.f32 %v4881_v46, %v4846_v1 }
 0x147   : > { %6363 = vst [vmem:[#allocation17_spill] sm:$0xff] %v4953_v11  ;;  %3620 = vmatmul.msk.bf16.gmra.mxu0 %vm4925_vm6, %v4953_v11 }
 0x148   : > { %v774_v16 = vmax.f32 %v702_v13, 0.0 }
 0x14a   : > { %v809_v19 = vrot.slane %v774_v16, 7  ;;  %v4961_v23 = vpack.c.bf16 %v774_v16, %v773_v57  ;;  %v1283_v39 = vrot.slane %v774_v16, 1 }
 0x14c   : > { %1075 = vmatmul.bf16.gmra.mxu2 %v4961_v23  ;;  %v860_v29 = vsel %vm835_vm3, %v808_v62, %v809_v19  ;;  %v1335_v49 = vsel %vm1309_vm4, %v1282_v63, %v1283_v39  ;;  %v4163_v63 = vld [vmem:[#allocation7 + $0x138] sm:$0xff] }
 0x14d   : > { %v704_v30 = vpop.f32.mrf.mxu1  ;;  %v4968_v33 = vpack.c.bf16 %v860_v29, %v861_v8  ;;  %1839 = vmatpush.bf16.msra.mxu2 %v4163_v63 }
 0x14e   : > { %v705_v35 = vadd.f32 %v704_v30, %v616_v22 }
 0x150   : > { %v775_v40 = vmax.f32 %v705_v35, 0.0  ;;  %743 = vmatmul.bf16.gmra.mxu1 %v450_v26 }
 0x151   : > { %1840 = vmatpush.bf16.msra.mxu2 %v4162_v17 }
 0x152   : > { %v810_v42 = vrot.slane %v775_v40, 7  ;;  %v1284_v43 = vrot.slane %v775_v40, 1 }
 0x154   : > { %v1334_v48 = vsel %vm1309_vm4, %v1283_v39, %v1284_v43  ;;  %v859_v50 = vsel %vm835_vm3, %v809_v19, %v810_v42 }
 0x155   : > { %v706_v53 = vpop.f32.mrf.mxu1  ;;  %v4978_v54 = vpack.c.bf16 %v1334_v48, %v1335_v49 }
 0x156   : > { %v707_v56 = vadd.f32 %v706_v53, %v618_v47  ;;  %v454_v47 = vpack.c.bf16 %v418_v37, %v416_v4 }
 0x157   : > { %6364 = vst [vmem:[#allocation18_spill] sm:$0xff] %v4978_v54  ;;  %3623 = vmatmul.msk.bf16.gmra.mxu0 %vm4925_vm6, %v4978_v54 }
 0x158   : > { %v776_v57 = vmax.f32 %v707_v56, 0.0 }
 0x15a   : > { %v811_v61 = vrot.slane %v776_v57, 7  ;;  %v4987_v62 = vpack.c.bf16 %v776_v57, %v775_v40  ;;  %v1285_v13 = vrot.slane %v776_v57, 1 }
 0x15c   : > { %1080 = vmatmul.bf16.gmra.mxu2 %v4987_v62  ;;  %v858_v5 = vsel %vm835_vm3, %v810_v42, %v811_v61  ;;  %v1333_v22 = vsel %vm1309_vm4, %v1284_v43, %v1285_v13  ;;  %v626_v43 = vadd.f32 %v4881_v46, %v4854_v15  ;;  %v5026_v15 = vpop.f32.mrf.mxu2 }
 0x15d   : > { %v709_v6 = vpop.f32.mrf.mxu1  ;;  %v4994_v8 = vpack.c.bf16 %v858_v5, %v859_v50  ;;  %v651_v27 = vadd.f32 %v4881_v46, %v5026_v15 }
 0x15e   : > { %v710_v10 = vadd.f32 %v709_v6, %v621_v0 }
 0x160   : > { %v777_v14 = vmax.f32 %v710_v10, 0.0  ;;  %748 = vmatmul.bf16.gmra.mxu1 %v452_v2 }
 0x162   : > { %v812_v16 = vrot.slane %v777_v14, 7  ;;  %v1286_v1 = vrot.slane %v777_v14, 1 }
 0x164   : > { %v1332_v19 = vsel %vm1309_vm4, %v1285_v13, %v1286_v1  ;;  %v857_v24 = vsel %vm835_vm3, %v811_v61, %v812_v16  ;;  %v628_v61 = vadd.f32 %v4881_v46, %v4856_v20  ;;  %v420_v13 = vld [vmem:[%s4800_s15 + $0x1c8] sm:$0xff] }
 0x165   : > { %v711_v26 = vpop.f32.mrf.mxu1  ;;  %v5006_v29 = vpack.c.bf16 %v1332_v19, %v1333_v22 }
 0x166   : > { %v712_v30 = vadd.f32 %v711_v26, %v623_v18  ;;  %v631_v18 = vadd.f32 %v4881_v46, %v4861_v28 }
 0x167   : > { %6365 = vst [vmem:[#allocation19_spill] sm:$0xff] %v5006_v29  ;;  %3626 = vmatmul.msk.bf16.gmra.mxu0 %vm4925_vm6, %v5006_v29 }
 0x168   : > { %v778_v35 = vmax.f32 %v712_v30, 0.0  ;;  %v5050_v30 = vpop.f32.mrf.mxu2 }
 0x16a   : > { %v813_v39 = vrot.slane %v778_v35, 7  ;;  %v1287_v40 = vrot.slane %v778_v35, 1  ;;  %v5015_v42 = vpack.c.bf16 %v778_v35, %v777_v14  ;;  %v422_v14 = vld [vmem:[%s4800_s15 + $0x1d8] sm:$0xff] }
 0x16b   : > { %v456_v19 = vpack.c.bf16 %v422_v14, %v420_v13 }
 0x16c   : > { %1085 = vmatmul.bf16.gmra.mxu2 %v5015_v42  ;;  %v1331_v48 = vsel %vm1309_vm4, %v1286_v1, %v1287_v40  ;;  %v856_v49 = vsel %vm835_vm3, %v812_v16, %v813_v39 }
 0x16d   : > { %v714_v50 = vpop.f32.mrf.mxu1  ;;  %v5024_v53 = vpack.c.bf16 %v856_v49, %v857_v24 }
 0x16e   : > { %v715_v56 = vadd.f32 %v714_v50, %v626_v43  ;;  %v633_v43 = vadd.f32 %v4881_v46, %v4863_v31  ;;  %v426_v31 = vld [vmem:[%s4800_s15 + $0x1f8] sm:$0xff] }
 0x170   : > { %v779_v57 = vmax.f32 %v715_v56, 0.0  ;;  %753 = vmatmul.bf16.gmra.mxu1 %v454_v47 }
 0x172   : > { %v814_v58 = vrot.slane %v779_v57, 7  ;;  %v1288_v60 = vrot.slane %v779_v57, 1 }
 0x174   : > { %v1330_v63 = vsel %vm1309_vm4, %v1287_v40, %v1288_v60  ;;  %v855_v0 = vsel %vm835_vm3, %v813_v39, %v814_v58  ;;  %v4154_v40 = vld [vmem:[#allocation7 + $0xf0] sm:$0xff] }
 0x175   : > { %v716_v2 = vpop.f32.mrf.mxu1  ;;  %v5034_v5 = vpack.c.bf16 %v1330_v63, %v1331_v48  ;;  %1651 = vmatpush.bf16.msra.mxu1 %v4154_v40 }
 0x176   : > { %v717_v6 = vadd.f32 %v716_v2, %v628_v61  ;;  %v636_v2 = vadd.f32 %v4881_v46, %v4868_v36  ;;  %v638_v36 = vadd.f32 %v4881_v46, %v4872_v41  ;;  %v641_v41 = vadd.f32 %v4881_v46, %v4963_v25 }
 0x177   : > { %6366 = vst [vmem:[#allocation20_spill] sm:$0xff] %v5034_v5  ;;  %3629 = vmatmul.msk.bf16.gmra.mxu0 %vm4925_vm6, %v5034_v5 }
 0x178   : > { %v780_v10 = vmax.f32 %v717_v6, 0.0 }
 0x17a   : > { %v815_v16 = vrot.slane %v780_v10, 7  ;;  %v1289_v1 = vrot.slane %v780_v10, 1  ;;  %v5041_v20 = vpack.c.bf16 %v780_v10, %v779_v57  ;;  %v5065_v57 = vpop.f32.mrf.mxu2 }
 0x17c   : > { %6367 = vst [vmem:[#allocation21_spill] sm:$0xff] %v5041_v20  ;;  %1090 = vmatmul.bf16.gmra.mxu2 %v5041_v20  ;;  %v1329_v22 = vsel %vm1309_vm4, %v1288_v60, %v1289_v1  ;;  %v854_v24 = vsel %vm835_vm3, %v814_v58, %v815_v16  ;;  %v424_v60 = vld [vmem:[%s4800_s15 + $0x1e8] sm:$0xff] }
 0x17d   : > { %v719_v26 = vpop.f32.mrf.mxu1  ;;  %v5052_v35 = vpack.c.bf16 %v854_v24, %v855_v0  ;;  %v458_v6 = vpack.c.bf16 %v426_v31, %v424_v60 }
 0x17e   : > { %v720_v4 = vadd.f32 %v719_v26, %v631_v18 }
 0x180   : > { %v781_v37 = vmax.f32 %v720_v4, 0.0  ;;  %758 = vmatmul.bf16.gmra.mxu1 %v456_v19 }
 0x182   : > { %v816_v28 = vrot.slane %v781_v37, 7  ;;  %v1290_v39 = vrot.slane %v781_v37, 1  ;;  %v5080_v18 = vpop.f32.mrf.mxu2 }
 0x184   : > { %v1328_v47 = vsel %vm1309_vm4, %v1289_v1, %v1290_v39  ;;  %v853_v48 = vsel %vm835_vm3, %v815_v16, %v816_v28 }
 0x185   : > { %v721_v49 = vpop.f32.mrf.mxu1  ;;  %v5060_v50 = vpack.c.bf16 %v1328_v47, %v1329_v22 }
 0x186   : > { %v722_v56 = vadd.f32 %v721_v49, %v633_v43  ;;  %v4161_v49 = vld [vmem:[#allocation7 + $0x128] sm:$0xff] }
 0x187   : > { %6368 = vst [vmem:[#allocation22_spill] sm:$0xff] %v5060_v50  ;;  %3632 = vmatmul.msk.bf16.gmra.mxu0 %vm4925_vm6, %v5060_v50  ;;  %1841 = vmatpush.bf16.msra.mxu2 %v4161_v49  ;;  %v4152_v50 = vld [vmem:[#allocation7 + $0xe0] sm:$0xff] }
 0x188   : > { %v782_v58 = vmax.f32 %v722_v56, 0.0 }
 0x18a   : > { %v817_v61 = vrot.slane %v782_v58, 7  ;;  %v1291_v63 = vrot.slane %v782_v58, 1  ;;  %v5069_v0 = vpack.c.bf16 %v782_v58, %v781_v37  ;;  %v5099_v56 = vpop.f32.mrf.mxu2 }
 0x18c   : > { %6369 = vst [vmem:[#allocation23_spill] sm:$0xff] %v5069_v0  ;;  %1095 = vmatmul.bf16.gmra.mxu2 %v5069_v0  ;;  %v1327_v10 = vsel %vm1309_vm4, %v1290_v39, %v1291_v63  ;;  %v852_v13 = vsel %vm835_vm3, %v816_v28, %v817_v61  ;;  %v5090_v39 = vpop.f32.mrf.mxu3 }
 0x18d   : > { %v724_v14 = vpop.f32.mrf.mxu1  ;;  %v5078_v16 = vpack.c.bf16 %v852_v13, %v853_v48 }
 0x18e   : > { %v725_v1 = vadd.f32 %v724_v14, %v636_v2 }
 0x190   : > { %v783_v17 = vmax.f32 %v725_v1, 0.0  ;;  %763 = vmatmul.bf16.gmra.mxu1 %v458_v6  ;;  %v5110_v6 = vpop.f32.mrf.mxu0  ;;  %v4153_v1 = vld [vmem:[#allocation7 + $0xe8] sm:$0xff] }
 0x191   : > { %1652 = vmatpush.bf16.msra.mxu1 %v4153_v1 }
 0x192   : > { %v818_v19 = vrot.slane %v783_v17, 7  ;;  %v1292_v22 = vrot.slane %v783_v17, 1 }
 0x194   : > { %v1326_v24 = vsel %vm1309_vm4, %v1291_v63, %v1292_v22  ;;  %v851_v26 = vsel %vm835_vm3, %v817_v61, %v818_v19  ;;  %v5108_v63 = vpop.f32.mrf.mxu3 }
 0x195   : > { %v726_v4 = vpop.f32.mrf.mxu1  ;;  %v5088_v37 = vpack.c.bf16 %v1326_v24, %v1327_v10  ;;  %v643_v10 = vadd.f32 %v4881_v46, %v4980_v55  ;;  %1653 = vmatpush.bf16.msra.mxu1 %v4152_v50 }
 0x196   : > { %v727_v28 = vadd.f32 %v726_v4, %v638_v36  ;;  %v5118_v36 = vpop.f32.mrf.mxu2 }
 0x197   : > { %6370 = vst [vmem:[#allocation24_spill] sm:$0xff] %v5088_v37  ;;  %3635 = vmatmul.msk.bf16.gmra.mxu0 %vm4925_vm6, %v5088_v37 }
 0x198   : > { %v784_v40 = vmax.f32 %v727_v28, 0.0  ;;  %v646_v28 = vadd.f32 %v4881_v46, %v4996_v12 }
 0x19a   : > { %v819_v43 = vrot.slane %v784_v40, 7  ;;  %v1293_v47 = vrot.slane %v784_v40, 1  ;;  %v5097_v48 = vpack.c.bf16 %v784_v40, %v783_v17 }
 0x19c   : > { %6371 = vst [vmem:[#allocation25_spill] sm:$0xff] %v5097_v48  ;;  %1100 = vmatmul.bf16.gmra.mxu2 %v5097_v48  ;;  %v1325_v58 = vsel %vm1309_vm4, %v1292_v22, %v1293_v47  ;;  %v850_v60 = vsel %vm835_vm3, %v818_v19, %v819_v43  ;;  %v5122_v4 = vpop.f32.mrf.mxu3 }
 0x19d   : > { %v729_v31 = vpop.f32.mrf.mxu1  ;;  %v5106_v61 = vpack.c.bf16 %v850_v60, %v851_v26 }
 0x19e   : > { %v730_v25 = vadd.f32 %v729_v31, %v641_v41 }
 0x1a0   : > { %v785_v2 = vmax.f32 %v730_v25, 0.0 }
 0x1a2   : > { %v820_v13 = vrot.slane %v785_v2, 7  ;;  %v1294_v14 = vrot.slane %v785_v2, 1 }
 0x1a4   : > { %v1324_v17 = vsel %vm1309_vm4, %v1293_v47, %v1294_v14  ;;  %v849_v19 = vsel %vm835_vm3, %v819_v43, %v820_v13  ;;  %v5131_v43 = vpop.f32.mrf.mxu0  ;;  %v5138_v31 = vpop.f32.mrf.mxu3 }
 0x1a5   : > { %v731_v22 = vpop.f32.mrf.mxu1  ;;  %v5120_v24 = vpack.c.bf16 %v1324_v17, %v1325_v58 }
 0x1a6   : > { %v732_v26 = vadd.f32 %v731_v22, %v643_v10 }
 0x1a7   : > { %6372 = vst [vmem:[#allocation26_spill] sm:$0xff] %v5120_v24  ;;  %3638 = vmatmul.msk.bf16.gmra.mxu0 %vm4925_vm6, %v5120_v24 }
 0x1a8   : > { %v786_v55 = vmax.f32 %v732_v26, 0.0 }
 0x1aa   : > { %v821_v40 = vrot.slane %v786_v55, 7  ;;  %v5129_v41 = vpack.c.bf16 %v786_v55, %v785_v2  ;;  %v1295_v10 = vrot.slane %v786_v55, 1  ;;  %v648_v2 = vadd.f32 %v4881_v46, %v5013_v38 }
 0x1ac   : > { %6373 = vst [vmem:[#allocation27_spill] sm:$0xff] %v5129_v41  ;;  %1105 = vmatmul.bf16.gmra.mxu2 %v5129_v41  ;;  %v848_v47 = vsel %vm835_vm3, %v820_v13, %v821_v40 }
 0x1ad   : > { %v734_v49 = vpop.f32.mrf.mxu1  ;;  %v5136_v58 = vpack.c.bf16 %v848_v47, %v849_v19  ;;  %v1323_v19 = vsel %vm1309_vm4, %v1294_v14, %v1295_v10 }
 0x1ae   : > { %v735_v60 = vadd.f32 %v734_v49, %v646_v28  ;;  %v5154_v49 = vpop.f32.mrf.mxu3 }
 0x1af   : > { %v5140_v25 = vpop.f32.mrf.mxu2 }
 0x1b0   : > { %v787_v12 = vmax.f32 %v735_v60, 0.0 }
 0x1b2   : > { %v822_v1 = vrot.slane %v787_v12, 7  ;;  %v1296_v17 = vrot.slane %v787_v12, 1 }
 0x1b4   : > { %v5144_v22 = vpop.f32.mrf.mxu0  ;;  %v1322_v13 = vsel %vm1309_vm4, %v1295_v10, %v1296_v17  ;;  %v847_v26 = vsel %vm835_vm3, %v821_v40, %v822_v1  ;;  %v4160_v40 = vld [vmem:[#allocation7 + $0x120] sm:$0xff] }
 0x1b5   : > { %v736_v28 = vpop.f32.mrf.mxu1  ;;  %v5152_v47 = vpack.c.bf16 %v1322_v13, %v1323_v19  ;;  %1842 = vmatpush.bf16.msra.mxu2 %v4160_v40 }
 0x1b6   : > { %v737_v55 = vadd.f32 %v736_v28, %v648_v2 }
 0x1b7   : > { %6374 = vst [vmem:[#allocation28_spill] sm:$0xff] %v5152_v47  ;;  %v5156_v38 = vpop.f32.mrf.mxu2  ;;  %3641 = vmatmul.msk.bf16.gmra.mxu0 %vm4925_vm6, %v5152_v47  ;;  %v653_v47 = vadd.f32 %v4881_v46, %v5050_v30 }
 0x1b8   : > { %v788_v60 = vmax.f32 %v737_v55, 0.0  ;;  %v5172_v55 = vpop.f32.mrf.mxu3 }
 0x1ba   : > { %v823_v14 = vrot.slane %v788_v60, 7  ;;  %v5163_v10 = vpack.c.bf16 %v788_v60, %v787_v12  ;;  %v1297_v15 = vrot.slane %v788_v60, 1 }
 0x1bc   : > { %6375 = vst [vmem:[#allocation29_spill] sm:$0xff] %v5163_v10  ;;  %1110 = vmatmul.bf16.gmra.mxu2 %v5163_v10  ;;  %v5166_v13 = vpop.f32.mrf.mxu0  ;;  %v846_v2 = vsel %vm835_vm3, %v822_v1, %v823_v14 }
 0x1bd   : > { %v739_v19 = vpop.f32.mrf.mxu1  ;;  %v5170_v28 = vpack.c.bf16 %v846_v2, %v847_v26 }
 0x1be   : > { %v740_v21 = vadd.f32 %v739_v19, %v651_v27  ;;  %v1321_v27 = vsel %vm1309_vm4, %v1296_v17, %v1297_v15  ;;  %v656_v17 = vadd.f32 %v4881_v46, %v5065_v57 }
 0x1bf   : > { %v5174_v3 = vpop.f32.mrf.mxu2 }
 0x1c0   : > { %v789_v12 = vmax.f32 %v740_v21, 0.0  ;;  %v5188_v30 = vpop.f32.mrf.mxu3 }
 0x1c2   : > { %v824_v24 = vrot.slane %v789_v12, 7  ;;  %v1298_v37 = vrot.slane %v789_v12, 1 }
 0x1c4   : > { %v5178_v5 = vpop.f32.mrf.mxu0  ;;  %v1320_v1 = vsel %vm1309_vm4, %v1297_v15, %v1298_v37  ;;  %v845_v26 = vsel %vm835_vm3, %v823_v14, %v824_v24 }
 0x1c5   : > { %v741_v60 = vpop.f32.mrf.mxu1  ;;  %v5186_v21 = vpack.c.bf16 %v1320_v1, %v1321_v27 }
 0x1c6   : > { %v742_v40 = vadd.f32 %v741_v60, %v653_v47 }
 0x1c7   : > { %6376 = vst [vmem:[#allocation30_spill] sm:$0xff] %v5186_v21  ;;  %v5190_v2 = vpop.f32.mrf.mxu2  ;;  %3644 = vmatmul.msk.bf16.gmra.mxu0 %vm4925_vm6, %v5186_v21 }
 0x1c8   : > { %6377 = vst [vmem:[#allocation31_spill] sm:$0xff] %v5190_v2  ;;  %v790_v19 = vmax.f32 %v742_v40, 0.0  ;;  %v5206_v29 = vpop.f32.mrf.mxu3 }
 0x1ca   : > { %v825_v50 = vrot.slane %v790_v19, 7  ;;  %v5197_v15 = vpack.c.bf16 %v790_v19, %v789_v12  ;;  %v1299_v21 = vrot.slane %v790_v19, 1  ;;  %v658_v12 = vadd.f32 %v4881_v46, %v5080_v18 }
 0x1cc   : > { %6378 = vst [vmem:[#allocation32_spill] sm:$0xff] %v5197_v15  ;;  %1115 = vmatmul.bf16.gmra.mxu2 %v5197_v15  ;;  %v5200_v14 = vpop.f32.mrf.mxu0  ;;  %v844_v47 = vsel %vm835_vm3, %v824_v24, %v825_v50  ;;  %v4151_v15 = vld [vmem:[#allocation7 + $0xd8] sm:$0xff] }
 0x1cd   : > { %6379 = vst [vmem:[#allocation33_spill] sm:$0xff] %v5200_v14  ;;  %v744_v1 = vpop.f32.mrf.mxu1  ;;  %v5204_v27 = vpack.c.bf16 %v844_v47, %v845_v26  ;;  %v1319_v26 = vsel %vm1309_vm4, %v1298_v37, %v1299_v21  ;;  %1654 = vmatpush.bf16.msra.mxu1 %v4151_v15 }
 0x1ce   : > { %v745_v60 = vadd.f32 %v744_v1, %v656_v17 }
 0x1cf   : > { %v5208_v40 = vpop.f32.mrf.mxu2 }
 0x1d0   : > { %6380 = vst [vmem:[#allocation34_spill] sm:$0xff] %v5208_v40  ;;  %v791_v57 = vmax.f32 %v745_v60, 0.0  ;;  %v5222_v60 = vpop.f32.mrf.mxu3  ;;  %v661_v40 = vadd.f32 %v4881_v46, %v5090_v39 }
 0x1d2   : > { %v826_v54 = vrot.slane %v791_v57, 7  ;;  %v1300_v11 = vrot.slane %v791_v57, 1 }
 0x1d4   : > { %v5212_v34 = vpop.f32.mrf.mxu0  ;;  %v1318_v24 = vsel %vm1309_vm4, %v1299_v21, %v1300_v11  ;;  %v843_v17 = vsel %vm835_vm3, %v825_v50, %v826_v54  ;;  %v4159_v50 = vld [vmem:[#allocation7 + $0x118] sm:$0xff] }
 0x1d5   : > { %6381 = vst [vmem:[#allocation35_spill] sm:$0xff] %v5212_v34  ;;  %v746_v47 = vpop.f32.mrf.mxu1  ;;  %v5220_v1 = vpack.c.bf16 %v1318_v24, %v1319_v26  ;;  %1843 = vmatpush.bf16.msra.mxu2 %v4159_v50 }
 0x1d6   : > { %v747_v19 = vadd.f32 %v746_v47, %v658_v12 }
 0x1d7   : > { %6382 = vst [vmem:[#allocation36_spill] sm:$0xff] %v5220_v1  ;;  %v5224_v18 = vpop.f32.mrf.mxu2  ;;  %3647 = vmatmul.msk.bf16.gmra.mxu0 %vm4925_vm6, %v5220_v1 }
 0x1d8   : > { %6383 = vst [vmem:[#allocation37_spill] sm:$0xff] %v5224_v18  ;;  %v792_v34 = vmax.f32 %v747_v19, 0.0  ;;  %v1200_v19 = vpop.f32.mrf.mxu3 }
 0x1d9   : > { %v1201_v39 = vadd.f32 %v1200_v19, %v5118_v36 }
 0x1da   : > { %v827_v37 = vrot.slane %v792_v34, 7  ;;  %v5231_v21 = vpack.c.bf16 %v792_v34, %v791_v57  ;;  %v1301_v57 = vrot.slane %v792_v34, 1 }
 0x1db   : > { %v5244_v2 = vadd.f32 %v5131_v43, %v1201_v39 }
 0x1dc   : > { %6384 = vst [vmem:[#allocation38_spill] sm:$0xff] %v5231_v21  ;;  %1120 = vmatmul.bf16.gmra.mxu2 %v5231_v21  ;;  %v5234_v24 = vpop.f32.mrf.mxu0  ;;  %v842_v12 = vsel %vm835_vm3, %v826_v54, %v827_v37  ;;  %v663_v54 = vadd.f32 %v4881_v46, %v5108_v63 }
 0x1dd   : > { %6385 = vst [vmem:[#allocation39_spill] sm:$0xff] %v5234_v24  ;;  %v749_v26 = vpop.f32.mrf.mxu1  ;;  %v5238_v47 = vpack.c.bf16 %v842_v12, %v843_v17  ;;  %v1317_v17 = vsel %vm1309_vm4, %v1300_v11, %v1301_v57  ;;  %v4179_v12 = vld [vmem:[#allocation7 + $0x1b8] sm:$0xff]  ;;  %v666_v11 = vadd.f32 %v4881_v46, %v5122_v4  ;;  %v4158_v4 = vld [vmem:[#allocation7 + $0x110] sm:$0xff] }
 0x1de   : > { %v750_v1 = vadd.f32 %v749_v26, %v661_v40  ;;  %2217 = vmatpush.bf16.msra.mxu0 %v4179_v12  ;;  %1844 = vmatpush.bf16.msra.mxu2 %v4158_v4  ;;  %v4175_v4 = vld [vmem:[#allocation7 + $0x198] sm:$0xff] }
 0x1df   : > { %v5240_v18 = vpop.f32.mrf.mxu2 }
 0x1e0   : > { %v793_v14 = vmax.f32 %v750_v1, 0.0 }
 0x1e2   : > { %v828_v21 = vrot.slane %v793_v14, 7  ;;  %v1302_v24 = vrot.slane %v793_v14, 1 }
 0x1e4   : > { %v5248_v50 = vpop.f32.mrf.mxu0  ;;  %v1316_v40 = vsel %vm1309_vm4, %v1301_v57, %v1302_v24  ;;  %v841_v34 = vsel %vm835_vm3, %v827_v37, %v828_v21  ;;  %v4178_v37 = vld [vmem:[#allocation7 + $0x1b0] sm:$0xff] }
 0x1e5   : > { %6386 = vst [vmem:[#allocation40_spill] sm:$0xff] %v5248_v50  ;;  %v751_v36 = vpop.f32.mrf.mxu1  ;;  %v5256_v43 = vpack.c.bf16 %v1316_v40, %v1317_v17  ;;  %2218 = vmatpush.bf16.msra.mxu0 %v4178_v37  ;;  %v4176_v37 = vld [vmem:[#allocation7 + $0x1a0] sm:$0xff]  ;;  %v4157_v50 = vld [vmem:[#allocation7 + $0x108] sm:$0xff] }
 0x1e6   : > { %v752_v1 = vadd.f32 %v751_v36, %v663_v54  ;;  %v4177_v36 = vld [vmem:[#allocation7 + $0x1a8] sm:$0xff]  ;;  %1845 = vmatpush.bf16.msra.mxu2 %v4157_v50  ;;  %v4148_v50 = vld [vmem:[#allocation7 + $0xc0] sm:$0xff] }
 0x1e7   : > { %6387 = vst [vmem:[#allocation41_spill] sm:$0xff] %v5256_v43  ;;  %v5258_v26 = vpop.f32.mrf.mxu2  ;;  %3650 = vmatmul.msk.bf16.gmra.mxu0 %vm4925_vm6, %v5256_v43 }
 0x1e8   : > { %6388 = vst [vmem:[#allocation42_spill] sm:$0xff] %v5258_v26  ;;  %v794_v63 = vmax.f32 %v752_v1, 0.0 }
 0x1e9   : > { %2219 = vmatpush.bf16.msra.mxu0 %v4177_v36  ;;  %v4149_v36 = vld [vmem:[#allocation7 + $0xc8] sm:$0xff] }
 0x1ea   : > { %v829_v15 = vrot.slane %v794_v63, 7  ;;  %v5265_v19 = vpack.c.bf16 %v794_v63, %v793_v14  ;;  %v1303_v12 = vrot.slane %v794_v63, 1 }
 0x1ec   : > { %6389 = vst [vmem:[#allocation43_spill] sm:$0xff] %v5265_v19  ;;  %1125 = vmatmul.bf16.gmra.mxu2 %v5265_v19  ;;  %v5268_v39 = vpop.f32.mrf.mxu0  ;;  %v840_v57 = vsel %vm835_vm3, %v828_v21, %v829_v15  ;;  %v4171_v19 = vld [vmem:[#allocation7 + $0x178] sm:$0xff]  ;;  %v668_v21 = vadd.f32 %v4881_v46, %v5138_v31 }
 0x1ed   : > { %6390 = vst [vmem:[#allocation44_spill] sm:$0xff] %v5268_v39  ;;  %v754_v54 = vpop.f32.mrf.mxu1  ;;  %v5272_v40 = vpack.c.bf16 %v840_v57, %v841_v34  ;;  %v4150_v39 = vld [vmem:[#allocation7 + $0xd0] sm:$0xff]  ;;  %2031 = vmatpush.bf16.msra.mxu3 %v4171_v19  ;;  %2220 = vmatpush.bf16.msra.mxu0 %v4176_v37 }
 0x1ee   : > { %v755_v17 = vadd.f32 %v754_v54, %v666_v11  ;;  %v1315_v11 = vsel %vm1309_vm4, %v1302_v24, %v1303_v12  ;;  %1655 = vmatpush.bf16.msra.mxu1 %v4150_v39  ;;  %v4156_v24 = vld [vmem:[#allocation7 + $0x100] sm:$0xff]  ;;  %v4174_v37 = vld [vmem:[#allocation7 + $0x190] sm:$0xff] }
 0x1ef   : > { %v5274_v1 = vpop.f32.mrf.mxu2  ;;  %1846 = vmatpush.bf16.msra.mxu2 %v4156_v24 }
 0x1f0   : > { %6391 = vst [vmem:[#allocation45_spill] sm:$0xff] %v5274_v1  ;;  %v795_v14 = vmax.f32 %v755_v17, 0.0 }
 0x1f1   : > { %2221 = vmatpush.bf16.msra.mxu0 %v4175_v4 }
 0x1f2   : > { %v830_v43 = vrot.slane %v795_v14, 7  ;;  %v1304_v26 = vrot.slane %v795_v14, 1  ;;  %1656 = vmatpush.bf16.msra.mxu1 %v4149_v36 }
 0x1f4   : > { %v1314_v34 = vsel %vm1309_vm4, %v1303_v12, %v1304_v26  ;;  %v839_v63 = vsel %vm835_vm3, %v829_v15, %v830_v43  ;;  %v5284_v57 = vpop.f32.mrf.mxu0  ;;  %v671_v15 = vadd.f32 %v4881_v46, %v5154_v49 }
 0x1f5   : > { %v756_v54 = vpop.f32.mrf.mxu1  ;;  %v5286_v17 = vpack.c.bf16 %v1314_v34, %v1315_v11  ;;  %2222 = vmatpush.bf16.msra.mxu0 %v4174_v37 }
 0x1f6   : > { %v757_v31 = vadd.f32 %v756_v54, %v668_v21  ;;  %1657 = vmatpush.bf16.msra.mxu1 %v4148_v50  ;;  %v673_v50 = vadd.f32 %v4881_v46, %v5172_v55 }
 0x1f7   : > { %6392 = vst [vmem:[#allocation46_spill] sm:$0xff] %v5286_v17  ;;  %v5288_v1 = vpop.f32.mrf.mxu2  ;;  %3653 = vmatmul.msk.bf16.gmra.mxu0 %vm4925_vm6, %v5286_v17 }
 0x1f8   : > { %6393 = vst [vmem:[#allocation47_spill] sm:$0xff] %v5288_v1  ;;  %v796_v19 = vmax.f32 %v757_v31, 0.0  ;;  %v4173_v31 = vld [vmem:[#allocation7 + $0x188] sm:$0xff]  ;;  %v4172_v1 = vld [vmem:[#allocation7 + $0x180] sm:$0xff] }
 0x1f9   : > { %2223 = vmatpush.bf16.msra.mxu0 %v4173_v31 }
 0x1fa   : > { %v831_v39 = vrot.slane %v796_v19, 7  ;;  %v5295_v12 = vpack.c.bf16 %v796_v19, %v795_v14  ;;  %v1305_v14 = vrot.slane %v796_v19, 1 }
 0x1fc   : > { %6394 = vst [vmem:[#allocation48_spill] sm:$0xff] %v5295_v12  ;;  %1130 = vmatmul.bf16.gmra.mxu2 %v5295_v12  ;;  %v838_v21 = vsel %vm835_vm3, %v830_v43, %v831_v39  ;;  %v5302_v36 = vpop.f32.mrf.mxu0 }
 0x1fd   : > { %v759_v34 = vpop.f32.mrf.mxu1  ;;  %v5300_v11 = vpack.c.bf16 %v838_v21, %v839_v63  ;;  %v1313_v63 = vsel %vm1309_vm4, %v1304_v26, %v1305_v14  ;;  %2224 = vmatpush.bf16.msra.mxu0 %v4172_v1  ;;  %v676_v26 = vadd.f32 %v4881_v46, %v5188_v30 }
 0x1fe   : > { %v760_v54 = vadd.f32 %v759_v34, %v671_v15 }
 0x1ff   : > { %v5304_v49 = vpop.f32.mrf.mxu2 }
 0x200   : > { %v797_v4 = vmax.f32 %v760_v54, 0.0 }
 0x202   : > { %v832_v24 = vrot.slane %v797_v4, 7  ;;  %v1306_v17 = vrot.slane %v797_v4, 1 }
 0x204   : > { %v1312_v43 = vsel %vm1309_vm4, %v1305_v14, %v1306_v17  ;;  %v837_v15 = vsel %vm835_vm3, %v831_v39, %v832_v24  ;;  %v5321_v54 = vpop.f32.mrf.mxu0 }
 0x205   : > { %v761_v37 = vpop.f32.mrf.mxu1  ;;  %v5314_v21 = vpack.c.bf16 %v1312_v43, %v1313_v63  ;;  %6397 = vst [vmem:[#allocation51_spill] sm:$0xff] %v5321_v54 }
 0x206   : > { %v762_v19 = vadd.f32 %v761_v37, %v673_v50  ;;  %v4170_v37 = vld [vmem:[#allocation7 + $0x170] sm:$0xff] }
 0x207   : > { %6395 = vst [vmem:[#allocation49_spill] sm:$0xff] %v5314_v21  ;;  %v5316_v34 = vpop.f32.mrf.mxu2  ;;  %3656 = vmatmul.msk.bf16.gmra.mxu0 %vm4925_vm6, %v5314_v21  ;;  %2032 = vmatpush.bf16.msra.mxu3 %v4170_v37 }
 0x208   : > { %6396 = vst [vmem:[#allocation50_spill] sm:$0xff] %v5316_v34  ;;  %v798_v55 = vmax.f32 %v762_v19, 0.0 }
 0x20a   : > { %v833_v31 = vrot.slane %v798_v55, 7  ;;  %v5325_v14 = vpack.c.bf16 %v798_v55, %v797_v4  ;;  %v1307_v19 = vrot.slane %v798_v55, 1  ;;  %v678_v4 = vadd.f32 %v4881_v46, %v5206_v29 }
 0x20c   : > { %1135 = vmatmul.bf16.gmra.mxu2 %v5325_v14  ;;  %v836_v1 = vsel %vm835_vm3, %v832_v24, %v833_v31  ;;  %v5334_v54 = vpop.f32.mrf.mxu0 }
 0x20d   : > { %v764_v39 = vpop.f32.mrf.mxu1  ;;  %v5330_v50 = vpack.c.bf16 %v836_v1, %v837_v15  ;;  %v1311_v15 = vsel %vm1309_vm4, %v1306_v17, %v1307_v19  ;;  %v6400_v17 = vrot.slane %v4893_v59, 7 }
 0x20e   : > { %v765_v43 = vadd.f32 %v764_v39, %v676_v26 }
 0x20f   : > { %v5332_v63 = vpop.f32.mrf.mxu2 }
 0x210   : > { %6398 = vst [vmem:[#allocation52_spill] sm:$0xff] %v5332_v63  ;;  %v799_v21 = vmax.f32 %v765_v43, 0.0 }
 0x212   : > { %v1308_v34 = vrot.slane %v799_v21, 1  ;;  %v1579_v30 = vrot.slane %v799_v21, 7 }
 0x214   : > { %v1310_v24 = vsel %vm1309_vm4, %v1307_v19, %v1308_v34  ;;  %v1581_v26 = vsel %vm835_vm3, %v833_v31, %v1579_v30 }
 0x215   : > { %v766_v1 = vpop.f32.mrf.mxu1  ;;  %v5344_v55 = vpack.c.bf16 %v1310_v24, %v1311_v15  ;;  %v6401_v24 = vrot.slane %v4893_v59, 1 }
 0x216   : > { %v767_v39 = vadd.f32 %v766_v1, %v678_v4 }
 0x217   : > { %6399 = vst [vmem:[#allocation53_spill] sm:$0xff] %v5344_v55  ;;  %v5346_v43 = vpop.f32.mrf.mxu2  ;;  %3659 = vmatmul.msk.bf16.gmra.mxu0 %vm4925_vm6, %v5344_v55 }
 0x218   : > { %v800_v46 = vmax.f32 %v767_v39, 0.0 }
 0x21a   : > { %v834_v29 = vrot.slane %v800_v46, 7  ;;  %v1960_v37 = vrot.slane %v800_v46, 1  ;;  %v5351_v63 = vpack.c.bf16 %v800_v46, %v799_v21  ;;  %v5366_v21 = vpop.f32.mrf.mxu0 }
 0x21c   : > { %1847 = vmatmul.bf16.vlgmr.msra.gmra.mxu2 %v4902_v7  ;;  %v865_v31 = vsel %vm835_vm3, %v834_v29, %v6400_v17  ;;  %v1580_v19 = vsel %vm835_vm3, %v1579_v30, %v834_v29  ;;  %v1961_v4 = vsel %vm1309_vm4, %v1308_v34, %v1960_v37  ;;  %v1962_v15 = vsel %vm1309_vm4, %v1960_v37, %v6401_v24  ;;  %v4169_v34 = vld [vmem:[#allocation7 + $0x168] sm:$0xff]  ;;  %v4195_v24 = vld [vmem:[#allocation7 + $0x238] sm:$0xff] }
 0x21d   : > { %v3539_v7 = vpack.c.bf16 %v4909_v9, %v865_v31  ;;  %v5369_v1 = vpack.c.bf16 %v1580_v19, %v1581_v26  ;;  %v5371_v39 = vpack.c.bf16 %v1962_v15, %v1961_v4  ;;  %2033 = vmatpush.bf16.msra.mxu3 %v4169_v34  ;;  %2589 = vmatpush.bf16.msrb.mxu2 %v4195_v24 }
 0x21f   : > { %6402 = vst [vmem:[#allocation54_spill] sm:$0xff] %v5371_v39  ;;  %v5373_v46 = vpop.f32.mrf.mxu2  ;;  %3540 = vmatmul.msk.bf16.gmra.mxu3 %vm4886_vm2, %v3539_v7  ;;  %3694 = vmatmul.msk.bf16.vlgmr.msra.gmra.mxu1 %vm4886_vm2, %v3539_v7 }
 0x222   : > { %v5379_v59 = vpop.f32.mrf.mxu0 }
 0x227   : > { %v5381_v45 = vpop.f32.mrf.mxu2  ;;  %3886 = vmatmul.msk.bf16.vlgmr.msra.gmra.mxu0 %vm4886_vm2, %v4942_v51 }
 0x22a   : > { %v5395_v30 = vpop.f32.mrf.mxu0 }
 0x22c   : > { %1852 = vmatmul.bf16.gmra.mxu2 %v4937_v44 }
 0x22f   : > { %v5387_v9 = vpop.f32.mrf.mxu2  ;;  %3543 = vmatmul.msk.bf16.gmra.mxu3 %vm4886_vm2, %v4942_v51  ;;  %3697 = vmatmul.msk.bf16.gmra.mxu1 %vm4886_vm2, %v4942_v51 }
 0x232   : > { %v5402_v29 = vpop.f32.mrf.mxu0 }
 0x237   : > { %v5397_v26 = vpop.f32.mrf.mxu2  ;;  %3889 = vmatmul.msk.bf16.gmra.mxu0 %vm4886_vm2, %v4968_v33 }
 0x23a   : > { %v5413_v51 = vpop.f32.mrf.mxu0 }
 0x23c   : > { %1857 = vmatmul.bf16.gmra.mxu2 %v4961_v23 }
 0x23f   : > { %v5405_v37 = vpop.f32.mrf.mxu2  ;;  %3546 = vmatmul.msk.bf16.gmra.mxu3 %vm4886_vm2, %v4968_v33  ;;  %3700 = vmatmul.msk.bf16.gmra.mxu1 %vm4886_vm2, %v4968_v33  ;;  %v4168_v33 = vld [vmem:[#allocation7 + $0x160] sm:$0xff] }
 0x240   : > { %2034 = vmatpush.bf16.msra.mxu3 %v4168_v33 }
 0x242   : > { %v5421_v31 = vpop.f32.mrf.mxu0 }
 0x247   : > { %v5415_v17 = vpop.f32.mrf.mxu2  ;;  %3892 = vmatmul.msk.bf16.gmra.mxu0 %vm4886_vm2, %v4994_v8 }
 0x24a   : > { %v5436_v15 = vpop.f32.mrf.mxu0 }
 0x24c   : > { %1862 = vmatmul.bf16.gmra.mxu2 %v4987_v62 }
 0x24f   : > { %v5423_v19 = vpop.f32.mrf.mxu2  ;;  %3549 = vmatmul.msk.bf16.gmra.mxu3 %vm4886_vm2, %v4994_v8  ;;  %3703 = vmatmul.msk.bf16.gmra.mxu1 %vm4886_vm2, %v4994_v8  ;;  %v4187_v8 = vld [vmem:[#allocation7 + $0x1f8] sm:$0xff] }
 0x250   : > { %2403 = vmatpush.bf16.msrb.mxu1 %v4187_v8 }
 0x252   : > { %v5447_v34 = vpop.f32.mrf.mxu0 }
 0x257   : > { %v5431_v4 = vpop.f32.mrf.mxu2  ;;  %3895 = vmatmul.msk.bf16.gmra.mxu0 %vm4886_vm2, %v5024_v53 }
 0x25a   : > { %v5455_v24 = vpop.f32.mrf.mxu0 }
 0x25c   : > { %1867 = vmatmul.bf16.gmra.mxu2 %v5015_v42 }
 0x25f   : > { %v5439_v7 = vpop.f32.mrf.mxu2  ;;  %3552 = vmatmul.msk.bf16.gmra.mxu3 %vm4886_vm2, %v5024_v53  ;;  %3706 = vmatmul.msk.bf16.gmra.mxu1 %vm4886_vm2, %v5024_v53  ;;  %v4167_v53 = vld [vmem:[#allocation7 + $0x158] sm:$0xff] }
 0x260   : > { %2035 = vmatpush.bf16.msra.mxu3 %v4167_v53 }
 0x262   : > { %v5465_v8 = vpop.f32.mrf.mxu0 }
 0x267   : > { %v5449_v33 = vpop.f32.mrf.mxu2  ;;  %3898 = vmatmul.msk.bf16.gmra.mxu0 %vm4886_vm2, %v5052_v35 }
 0x26a   : > { %v5481_v53 = vpop.f32.mrf.mxu0 }
 0x26c   : > { %1872 = vmatmul.bf16.gmra.mxu2 %v5041_v20  ;;  %v4194_v20 = vld [vmem:[#allocation7 + $0x230] sm:$0xff] }
 0x26d   : > { %2590 = vmatpush.bf16.msrb.mxu2 %v4194_v20 }
 0x26f   : > { %v5457_v39 = vpop.f32.mrf.mxu2  ;;  %3555 = vmatmul.msk.bf16.gmra.mxu3 %vm4886_vm2, %v5052_v35  ;;  %3709 = vmatmul.msk.bf16.gmra.mxu1 %vm4886_vm2, %v5052_v35  ;;  %v4186_v35 = vld [vmem:[#allocation7 + $0x1f0] sm:$0xff] }
 0x270   : > { %6403 = vst [vmem:[#allocation55_spill] sm:$0xff] %v5457_v39  ;;  %2404 = vmatpush.bf16.msrb.mxu1 %v4186_v35 }
 0x272   : > { %v5488_v20 = vpop.f32.mrf.mxu0 }
 0x273   : > { %6407 = vst [vmem:[#allocation59_spill] sm:$0xff] %v5488_v20 }
 0x277   : > { %v5467_v55 = vpop.f32.mrf.mxu2  ;;  %3901 = vmatmul.msk.bf16.gmra.mxu0 %vm4886_vm2, %v5078_v16 }
 0x278   : > { %6404 = vst [vmem:[#allocation56_spill] sm:$0xff] %v5467_v55 }
 0x27a   : > { %v5499_v35 = vpop.f32.mrf.mxu0 }
 0x27c   : > { %1877 = vmatmul.bf16.gmra.mxu2 %v5069_v0 }
 0x27f   : > { %v5473_v39 = vpop.f32.mrf.mxu2  ;;  %3558 = vmatmul.msk.bf16.gmra.mxu3 %vm4886_vm2, %v5078_v16  ;;  %3712 = vmatmul.msk.bf16.gmra.mxu1 %vm4886_vm2, %v5078_v16  ;;  %v4166_v16 = vld [vmem:[#allocation7 + $0x150] sm:$0xff] }
 0x280   : > { %6405 = vst [vmem:[#allocation57_spill] sm:$0xff] %v5473_v39  ;;  %2036 = vmatpush.bf16.msra.mxu3 %v4166_v16 }
 0x282   : > { %v5510_v16 = vpop.f32.mrf.mxu0 }
 0x283   : > { %6410 = vst [vmem:[#allocation62_spill] sm:$0xff] %v5510_v16 }
 0x287   : > { %v5483_v55 = vpop.f32.mrf.mxu2  ;;  %3904 = vmatmul.msk.bf16.gmra.mxu0 %vm4886_vm2, %v5106_v61 }
 0x288   : > { %6406 = vst [vmem:[#allocation58_spill] sm:$0xff] %v5483_v55  ;;  %v1199_v55 = vadd.f32 %v5222_v60, %v5099_v56 }
 0x28a   : > { %v5527_v16 = vpop.f32.mrf.mxu0 }
 0x28c   : > { %1882 = vmatmul.bf16.gmra.mxu2 %v5097_v48  ;;  %v4193_v48 = vld [vmem:[#allocation7 + $0x228] sm:$0xff] }
 0x28d   : > { %2591 = vmatpush.bf16.msrb.mxu2 %v4193_v48 }
 0x28f   : > { %v5491_v39 = vpop.f32.mrf.mxu2  ;;  %3561 = vmatmul.msk.bf16.gmra.mxu3 %vm4886_vm2, %v5106_v61  ;;  %3715 = vmatmul.msk.bf16.gmra.mxu1 %vm4886_vm2, %v5106_v61 }
 0x290   : > { %6408 = vst [vmem:[#allocation60_spill] sm:$0xff] %v5491_v39  ;;  %v1547_v39 = vadd.f32 %v5110_v6, %v1199_v55  ;;  %v4185_v6 = vld [vmem:[#allocation7 + $0x1e8] sm:$0xff] }
 0x291   : > { %2405 = vmatpush.bf16.msrb.mxu1 %v4185_v6 }
 0x297   : > { %v5503_v0 = vpop.f32.mrf.mxu2  ;;  %3907 = vmatmul.msk.bf16.gmra.mxu0 %vm4886_vm2, %v5136_v58 }
 0x298   : > { %6409 = vst [vmem:[#allocation61_spill] sm:$0xff] %v5503_v0 }
 0x29c   : > { %v1659_v20 = vpop.f32.mrf.mxu1  ;;  %1887 = vmatmul.bf16.gmra.mxu2 %v5129_v41 }
 0x29d   : > { %v1739_v61 = vadd.f32 %v1659_v20, %v1547_v39 }
 0x29f   : > { %3564 = vmatmul.msk.bf16.gmra.mxu3 %vm4886_vm2, %v5136_v58  ;;  %3718 = vmatmul.msk.bf16.gmra.mxu1 %vm4886_vm2, %v5136_v58  ;;  %v1848_v56 = vpop.f32.mrf.mxu2 }
 0x2a0   : > { %v5518_v60 = vadd.f32 %v1848_v56, %v1739_v61 }
 0x2a2   : > { %v1203_v55 = vpop.f32.mrf.mxu3 }
 0x2a3   : > { %v1204_v48 = vadd.f32 %v1203_v55, %v5140_v25  ;;  %v4165_v55 = vld [vmem:[#allocation7 + $0x148] sm:$0xff] }
 0x2a4   : > { %v1661_v0 = vpop.f32.mrf.mxu1  ;;  %2037 = vmatpush.bf16.msra.mxu3 %v4165_v55 }
 0x2a5   : > { %v1740_v39 = vadd.f32 %v1661_v0, %v5244_v2  ;;  %v1549_v61 = vadd.f32 %v5144_v22, %v1204_v48  ;;  %v5540_v22 = vpop.f32.mrf.mxu0 }
 0x2a7   : > { %v1850_v20 = vpop.f32.mrf.mxu2  ;;  %3910 = vmatmul.msk.bf16.gmra.mxu0 %vm4886_vm2, %v5170_v28 }
 0x2a8   : > { %v5525_v41 = vadd.f32 %v1850_v20, %v1740_v39 }
 0x2aa   : > { %v1205_v58 = vpop.f32.mrf.mxu3 }
 0x2ab   : > { %v1206_v0 = vadd.f32 %v1205_v58, %v5156_v38 }
 0x2ac   : > { %v1664_v56 = vpop.f32.mrf.mxu1  ;;  %1892 = vmatmul.bf16.gmra.mxu2 %v5163_v10 }
 0x2ad   : > { %v1741_v6 = vadd.f32 %v1664_v56, %v1549_v61  ;;  %v1550_v48 = vadd.f32 %v5166_v13, %v1206_v0  ;;  %v5551_v10 = vpop.f32.mrf.mxu0  ;;  %v6414_v0 = vld [vmem:[#allocation31_spill] sm:$0xff] }
 0x2af   : > { %3567 = vmatmul.msk.bf16.gmra.mxu3 %vm4886_vm2, %v5170_v28  ;;  %3721 = vmatmul.msk.bf16.gmra.mxu1 %vm4886_vm2, %v5170_v28  ;;  %v1853_v25 = vpop.f32.mrf.mxu2 }
 0x2b0   : > { %v5538_v2 = vadd.f32 %v1853_v25, %v1741_v6  ;;  %v4192_v25 = vld [vmem:[#allocation7 + $0x220] sm:$0xff] }
 0x2b1   : > { %2592 = vmatpush.bf16.msrb.mxu2 %v4192_v25 }
 0x2b2   : > { %6411 = vst [vmem:[#allocation63_spill] sm:$0xff] %v5538_v2  ;;  %v1208_v39 = vpop.f32.mrf.mxu3  ;;  %v6413_v2 = vld [vmem:[#allocation32_spill] sm:$0xff] }
 0x2b3   : > { %v1209_v58 = vadd.f32 %v1208_v39, %v5174_v3 }
 0x2b4   : > { %v1666_v20 = vpop.f32.mrf.mxu1 }
 0x2b5   : > { %v1742_v38 = vadd.f32 %v1666_v20, %v1550_v48  ;;  %v1551_v6 = vadd.f32 %v5178_v5, %v1209_v58  ;;  %v4184_v48 = vld [vmem:[#allocation7 + $0x1e0] sm:$0xff]  ;;  %v5563_v25 = vpop.f32.mrf.mxu0 }
 0x2b6   : > { %2406 = vmatpush.bf16.msrb.mxu1 %v4184_v48  ;;  %v6420_v48 = vld [vmem:[#allocation38_spill] sm:$0xff] }
 0x2b7   : > { %v1855_v61 = vpop.f32.mrf.mxu2  ;;  %3913 = vmatmul.msk.bf16.gmra.mxu0 %vm4886_vm2, %v5204_v27 }
 0x2b8   : > { %v5547_v28 = vadd.f32 %v1855_v61, %v1742_v38  ;;  %v6416_v38 = vld [vmem:[#allocation33_spill] sm:$0xff] }
 0x2ba   : > { %6412 = vst [vmem:[#allocation64_spill] sm:$0xff] %v5547_v28  ;;  %v1210_v56 = vpop.f32.mrf.mxu3  ;;  %v6426_v28 = vld [vmem:[#allocation43_spill] sm:$0xff] }
 0x2bb   : > { %v1211_v3 = vadd.f32 %v1210_v56, %v6414_v0  ;;  %v6417_v56 = vld [vmem:[#allocation34_spill] sm:$0xff] }
 0x2bc   : > { %v1669_v55 = vpop.f32.mrf.mxu1  ;;  %1897 = vmatmul.bf16.gmra.mxu2 %v6413_v2 }
 0x2bd   : > { %v1743_v13 = vadd.f32 %v1669_v55, %v1551_v6  ;;  %v1552_v58 = vadd.f32 %v6416_v38, %v1211_v3  ;;  %v6421_v38 = vld [vmem:[#allocation37_spill] sm:$0xff] }
 0x2bf   : > { %3570 = vmatmul.msk.bf16.gmra.mxu3 %vm4886_vm2, %v5204_v27  ;;  %3724 = vmatmul.msk.bf16.gmra.mxu1 %vm4886_vm2, %v5204_v27  ;;  %v1858_v39 = vpop.f32.mrf.mxu2 }
 0x2c0   : > { %v5560_v5 = vadd.f32 %v1858_v39, %v1743_v13  ;;  %v6419_v39 = vld [vmem:[#allocation35_spill] sm:$0xff] }
 0x2c2   : > { %6415 = vst [vmem:[#allocation31_spill] sm:$0xff] %v5560_v5  ;;  %v1213_v20 = vpop.f32.mrf.mxu3 }
 0x2c3   : > { %v1214_v55 = vadd.f32 %v1213_v20, %v6417_v56  ;;  %v5582_v56 = vpop.f32.mrf.mxu0 }
 0x2c4   : > { %v1671_v61 = vpop.f32.mrf.mxu1 }
 0x2c5   : > { %v1744_v6 = vadd.f32 %v1671_v61, %v1552_v58  ;;  %v1553_v5 = vadd.f32 %v6419_v39, %v1214_v55 }
 0x2c7   : > { %v1860_v0 = vpop.f32.mrf.mxu2  ;;  %3916 = vmatmul.msk.bf16.gmra.mxu0 %vm4886_vm2, %v5238_v47 }
 0x2c8   : > { %v5569_v27 = vadd.f32 %v1860_v0, %v1744_v6  ;;  %v4164_v6 = vld [vmem:[#allocation7 + $0x140] sm:$0xff] }
 0x2c9   : > { %2038 = vmatpush.bf16.msra.mxu3 %v4164_v6  ;;  %v6423_v0 = vld [vmem:[#allocation39_spill] sm:$0xff] }
 0x2ca   : > { %6418 = vst [vmem:[#allocation33_spill] sm:$0xff] %v5569_v27  ;;  %v1215_v13 = vpop.f32.mrf.mxu3  ;;  %v4191_v27 = vld [vmem:[#allocation7 + $0x218] sm:$0xff] }
 0x2cb   : > { %v1216_v58 = vadd.f32 %v1215_v13, %v6421_v38  ;;  %2593 = vmatpush.bf16.msrb.mxu2 %v4191_v27 }
 0x2cc   : > { %v1674_v2 = vpop.f32.mrf.mxu1  ;;  %1902 = vmatmul.bf16.gmra.mxu2 %v6420_v48 }
 0x2cd   : > { %v1745_v3 = vadd.f32 %v1674_v2, %v1553_v5  ;;  %v1554_v2 = vadd.f32 %v6423_v0, %v1216_v58  ;;  %v6427_v0 = vld [vmem:[#allocation42_spill] sm:$0xff] }
 0x2cf   : > { %3573 = vmatmul.msk.bf16.gmra.mxu3 %vm4886_vm2, %v5238_v47  ;;  %3727 = vmatmul.msk.bf16.gmra.mxu1 %vm4886_vm2, %v5238_v47  ;;  %v1863_v20 = vpop.f32.mrf.mxu2 }
 0x2d0   : > { %v5580_v61 = vadd.f32 %v1863_v20, %v1745_v3  ;;  %v5591_v20 = vpop.f32.mrf.mxu0 }
 0x2d2   : > { %6422 = vst [vmem:[#allocation34_spill] sm:$0xff] %v5580_v61  ;;  %v1218_v55 = vpop.f32.mrf.mxu3  ;;  %v6425_v61 = vld [vmem:[#allocation40_spill] sm:$0xff] }
 0x2d3   : > { %v1219_v39 = vadd.f32 %v1218_v55, %v5240_v18 }
 0x2d4   : > { %v1676_v5 = vpop.f32.mrf.mxu1 }
 0x2d5   : > { %v1746_v13 = vadd.f32 %v1676_v5, %v1554_v2  ;;  %v1555_v48 = vadd.f32 %v6425_v61, %v1219_v39  ;;  %v4183_v61 = vld [vmem:[#allocation7 + $0x1d8] sm:$0xff] }
 0x2d6   : > { %2407 = vmatpush.bf16.msrb.mxu1 %v4183_v61 }
 0x2d7   : > { %v1865_v38 = vpop.f32.mrf.mxu2  ;;  %3919 = vmatmul.msk.bf16.gmra.mxu0 %vm4886_vm2, %v5272_v40 }
 0x2d8   : > { %v5589_v47 = vadd.f32 %v1865_v38, %v1746_v13  ;;  %v6429_v13 = vld [vmem:[#allocation44_spill] sm:$0xff]  ;;  %v5605_v27 = vpop.f32.mrf.mxu0 }
 0x2da   : > { %6424 = vst [vmem:[#allocation35_spill] sm:$0xff] %v5589_v47  ;;  %v1220_v3 = vpop.f32.mrf.mxu3  ;;  %v4181_v47 = vld [vmem:[#allocation7 + $0x1c8] sm:$0xff] }
 0x2db   : > { %v1221_v18 = vadd.f32 %v1220_v3, %v6427_v0  ;;  %v6430_v3 = vld [vmem:[#allocation45_spill] sm:$0xff] }
 0x2dc   : > { %v1679_v6 = vpop.f32.mrf.mxu1  ;;  %1907 = vmatmul.bf16.gmra.mxu2 %v6426_v28 }
 0x2dd   : > { %v1747_v58 = vadd.f32 %v1679_v6, %v1555_v48  ;;  %v1556_v39 = vadd.f32 %v6429_v13, %v1221_v18  ;;  %v6432_v13 = vld [vmem:[#allocation47_spill] sm:$0xff] }
 0x2df   : > { %3576 = vmatmul.msk.bf16.gmra.mxu3 %vm4886_vm2, %v5272_v40  ;;  %3730 = vmatmul.msk.bf16.gmra.mxu1 %vm4886_vm2, %v5272_v40  ;;  %v1868_v55 = vpop.f32.mrf.mxu2 }
 0x2e0   : > { %v5602_v2 = vadd.f32 %v1868_v55, %v1747_v58  ;;  %v5615_v61 = vpop.f32.mrf.mxu0 }
 0x2e2   : > { %6428 = vst [vmem:[#allocation37_spill] sm:$0xff] %v5602_v2  ;;  %v1223_v5 = vpop.f32.mrf.mxu3 }
 0x2e3   : > { %v1224_v6 = vadd.f32 %v1223_v5, %v6430_v3  ;;  %v4211_v3 = vld [vmem:[#allocation10 + $0x74] sm:$0xf0] }
 0x2e4   : > { %v1681_v48 = vpop.f32.mrf.mxu1 }
 0x2e5   : > { %v1748_v38 = vadd.f32 %v1681_v48, %v1556_v39  ;;  %v1557_v55 = vadd.f32 %v5284_v57, %v1224_v6  ;;  %v4190_v48 = vld [vmem:[#allocation7 + $0x210] sm:$0xff] }
 0x2e6   : > { %v4096_v57 = vld [vmem:[#allocation10 + $0x70] sm:$0xf]  ;;  %2594 = vmatpush.bf16.msrb.mxu2 %v4190_v48  ;;  %v4188_v48 = vld [vmem:[#allocation7 + $0x200] sm:$0xff] }
 0x2e7   : > { %v1870_v0 = vpop.f32.mrf.mxu2  ;;  %3922 = vmatmul.msk.bf16.gmra.mxu0 %vm4886_vm2, %v5300_v11  ;;  %v4097_v6 = vor.u32 %v4211_v3, %v4096_v57  ;;  %v4180_v3 = vld [vmem:[#allocation7 + $0x1c0] sm:$0xff] }
 0x2e8   : > { %v5611_v40 = vadd.f32 %v1870_v0, %v1748_v38  ;;  %v4182_v0 = vld [vmem:[#allocation7 + $0x1d0] sm:$0xff] }
 0x2e9   : > { %2896 = vmatpush.bf16.msrb.mxu3 %v4097_v6  ;;  %2408 = vmatpush.bf16.msrb.mxu1 %v4182_v0  ;;  %v6433_v6 = vld [vmem:[#allocation51_spill] sm:$0xff] }
 0x2ea   : > { %6431 = vst [vmem:[#allocation39_spill] sm:$0xff] %v5611_v40  ;;  %v1225_v58 = vpop.f32.mrf.mxu3  ;;  %v4210_v40 = vld [vmem:[#allocation10 + $0x74] sm:$0xf] }
 0x2eb   : > { %v1226_v39 = vadd.f32 %v1225_v58, %v6432_v13 }
 0x2ec   : > { %v1684_v2 = vpop.f32.mrf.mxu1  ;;  %1912 = vmatmul.bf16.gmra.mxu2 %v5295_v12 }
 0x2ed   : > { %v1749_v18 = vadd.f32 %v1684_v2, %v1557_v55  ;;  %v1558_v58 = vadd.f32 %v5302_v36, %v1226_v39  ;;  %v4189_v55 = vld [vmem:[#allocation7 + $0x208] sm:$0xff]  ;;  %2409 = vmatpush.bf16.msrb.mxu1 %v4181_v47  ;;  %v5633_v36 = vpop.f32.mrf.mxu0 }
 0x2ee   : > { %2595 = vmatpush.bf16.msrb.mxu2 %v4189_v55 }
 0x2ef   : > { %3579 = vmatmul.msk.bf16.gmra.mxu3 %vm4886_vm2, %v5300_v11  ;;  %3733 = vmatmul.msk.bf16.gmra.mxu1 %vm4886_vm2, %v5300_v11  ;;  %v1873_v5 = vpop.f32.mrf.mxu2  ;;  %v4098_v11 = vld [vmem:[#allocation10 + $0x78] sm:$0xf0] }
 0x2f0   : > { %v5624_v38 = vadd.f32 %v1873_v5, %v1749_v18  ;;  %v4101_v28 = vor.u32 %v4210_v40, %v4098_v11 }
 0x2f1   : > { %2410 = vmatpush.bf16.msrb.mxu1 %v4180_v3 }
 0x2f2   : > { %v1228_v2 = vpop.f32.mrf.mxu3  ;;  %2985 = vmatpush.bf16.msrb.mxu0 %v4101_v28  ;;  %2596 = vmatpush.bf16.msrb.mxu2 %v4188_v48 }
 0x2f3   : > { %v1229_v18 = vadd.f32 %v1228_v2, %v5304_v49  ;;  %v6434_v2 = vld [vmem:[#allocation50_spill] sm:$0xff] }
 0x2f4   : > { %v1686_v13 = vpop.f32.mrf.mxu1 }
 0x2f5   : > { %v1750_v12 = vadd.f32 %v1686_v13, %v1558_v58  ;;  %v1559_v40 = vadd.f32 %v6433_v6, %v1229_v18  ;;  %v5646_v55 = vpop.f32.mrf.mxu0 }
 0x2f7   : > { %v1875_v5 = vpop.f32.mrf.mxu2  ;;  %3925 = vmatmul.msk.bf16.gmra.mxu0 %vm4886_vm2, %v5330_v50 }
 0x2f8   : > { %v5631_v57 = vadd.f32 %v1875_v5, %v1750_v12  ;;  %v6435_v5 = vld [vmem:[#allocation52_spill] sm:$0xff] }
 0x2fa   : > { %v1230_v39 = vpop.f32.mrf.mxu3 }
 0x2fb   : > { %v1231_v58 = vadd.f32 %v1230_v39, %v6434_v2 }
 0x2fc   : > { %v1689_v0 = vpop.f32.mrf.mxu1  ;;  %1917 = vmatmul.bf16.gmra.mxu2 %v5325_v14 }
 0x2fd   : > { %v1751_v49 = vadd.f32 %v1689_v0, %v1559_v40  ;;  %v1560_v13 = vadd.f32 %v5334_v54, %v1231_v58  ;;  %v5657_v0 = vpop.f32.mrf.mxu0  ;;  %v6436_v58 = vld [vmem:[#allocation16_spill] sm:$0xff] }
 0x2ff   : > { %3582 = vmatmul.msk.bf16.gmra.mxu3 %vm4886_vm2, %v5330_v50  ;;  %3736 = vmatmul.msk.bf16.gmra.mxu1 %vm4886_vm2, %v5330_v50  ;;  %v1878_v12 = vpop.f32.mrf.mxu2 }
 0x300   : > { %v5644_v28 = vadd.f32 %v1878_v12, %v1751_v49 }
 0x302   : > { %v1233_v47 = vpop.f32.mrf.mxu3 }
 0x303   : > { %v1234_v48 = vadd.f32 %v1233_v47, %v6435_v5  ;;  %v4209_v47 = vld [vmem:[#allocation10 + $0x64] sm:$0xf0] }
 0x304   : > { %v1691_v11 = vpop.f32.mrf.mxu1 }
 0x305   : > { %v1752_v18 = vadd.f32 %v1691_v11, %v1560_v13  ;;  %v1561_v6 = vadd.f32 %v5366_v21, %v1234_v48  ;;  %v4088_v21 = vld [vmem:[#allocation10 + $0x60] sm:$0xf]  ;;  %v4208_v48 = vld [vmem:[#allocation10 + $0x64] sm:$0xf] }
 0x306   : > { %v4089_v13 = vor.u32 %v4209_v47, %v4088_v21 }
 0x307   : > { %v1880_v39 = vpop.f32.mrf.mxu2  ;;  %3928 = vmatmul.msk.bf16.gmra.mxu0 %vm4886_vm2, %v5369_v1 }
 0x308   : > { %v5653_v3 = vadd.f32 %v1880_v39, %v1752_v18  ;;  %2897 = vmatpush.bf16.msrb.mxu3 %v4089_v13  ;;  %v4090_v39 = vld [vmem:[#allocation10 + $0x68] sm:$0xf0] }
 0x309   : > { %v4093_v52 = vor.u32 %v4208_v48, %v4090_v39 }
 0x30a   : > { %v1235_v50 = vpop.f32.mrf.mxu3 }
 0x30b   : > { %v1236_v49 = vadd.f32 %v1235_v50, %v5346_v43  ;;  %2986 = vmatpush.bf16.msrb.mxu0 %v4093_v52 }
 0x30c   : > { %v1694_v40 = vpop.f32.mrf.mxu1  ;;  %1922 = vmatmul.bf16.gmra.mxu2 %v5351_v63 }
 0x30d   : > { %v1753_v54 = vadd.f32 %v1694_v40, %v1561_v6  ;;  %v1562_v18 = vadd.f32 %v5379_v59, %v1236_v49  ;;  %v6437_v40 = vmov 0.0|0.0   ;;  %v6438_v49 = vld [vmem:[#allocation17_spill] sm:$0xff] }
 0x30f   : > { %3739 = vmatmul.msk.bf16.gmra.mxu1 %vm4886_vm2, %v5369_v1  ;;  %v1883_v2 = vpop.f32.mrf.mxu2  ;;  %3806 = vmatmul.msk.bf16.vlgmr.msra.gmra.mxu3 %vm4925_vm6, %v6436_v58  ;;  %v5669_v1 = vpop.f32.mrf.mxu0 }
 0x310   : > { %v5666_v12 = vadd.f32 %v1883_v2, %v1753_v54 }
 0x312   : > { %v1238_v11 = vpop.f32.mrf.mxu3 }
 0x313   : > { %v1239_v50 = vadd.f32 %v1238_v11, %v5373_v46 }
 0x314   : > { %v1696_v5 = vpop.f32.mrf.mxu1 }
 0x315   : > { %v1754_v43 = vadd.f32 %v1696_v5, %v1562_v18  ;;  %v1563_v58 = vadd.f32 %v5395_v30, %v1239_v50 }
 0x317   : > { %v1885_v6 = vpop.f32.mrf.mxu2  ;;  %2300 = vmatmul.bf16.gmra.mxu0 %v6437_v40 }
 0x318   : > { %v5673_v54 = vadd.f32 %v1885_v6, %v1754_v43  ;;  %v6439_v6 = vld [vmem:[#allocation18_spill] sm:$0xff] }
 0x31a   : > { %v1240_v2 = vpop.f32.mrf.mxu3 }
 0x31b   : > { %v1241_v47 = vadd.f32 %v1240_v2, %v5381_v45 }
 0x31c   : > { %v1699_v59 = vpop.f32.mrf.mxu1  ;;  %3995 = vmatmul.msk.bf16.vlgmr.msrb.gmra.mxu2 %vm4925_vm6, %v6438_v49 }
 0x31d   : > { %v1755_v21 = vadd.f32 %v1699_v59, %v1563_v58  ;;  %v1564_v30 = vadd.f32 %v5402_v29, %v1241_v47  ;;  %v4080_v29 = vld [vmem:[#allocation10 + $0x50] sm:$0xf]  ;;  %v4207_v59 = vld [vmem:[#allocation10 + $0x54] sm:$0xf0] }
 0x31f   : > { %v1888_v13 = vpop.f32.mrf.mxu2  ;;  %3809 = vmatmul.msk.bf16.gmra.mxu3 %vm4925_vm6, %v6438_v49  ;;  %2411 = vmatmul.bf16.vlgmr.msrb.gmra.mxu1 %v4937_v44 }
 0x320   : > { %v5684_v46 = vadd.f32 %v1888_v13, %v1755_v21 }
 0x322   : > { %v1243_v11 = vpop.f32.mrf.mxu3 }
 0x323   : > { %v1244_v43 = vadd.f32 %v1243_v11, %v5387_v9  ;;  %v4206_v11 = vld [vmem:[#allocation10 + $0x54] sm:$0xf] }
 0x324   : > { %v1701_v18 = vpop.f32.mrf.mxu1 }
 0x325   : > { %v1756_v5 = vadd.f32 %v1701_v18, %v1564_v30  ;;  %v1565_v52 = vadd.f32 %v5413_v51, %v1244_v43  ;;  %v4081_v51 = vor.u32 %v4207_v59, %v4080_v29 }
 0x327   : > { %v1890_v48 = vpop.f32.mrf.mxu2  ;;  %2898 = vmatpush.bf16.msrb.mxu3 %v4081_v51 }
 0x328   : > { %v5688_v39 = vadd.f32 %v1890_v48, %v1756_v5 }
 0x32a   : > { %v1245_v45 = vpop.f32.mrf.mxu3 }
 0x32b   : > { %v1246_v2 = vadd.f32 %v1245_v45, %v5397_v26  ;;  %v4082_v26 = vld [vmem:[#allocation10 + $0x58] sm:$0xf0] }
 0x32c   : > { %v1704_v50 = vpop.f32.mrf.mxu1  ;;  %3998 = vmatmul.msk.bf16.gmra.mxu2 %vm4925_vm6, %v6439_v6  ;;  %v4085_v30 = vor.u32 %v4206_v11, %v4082_v26  ;;  %v6441_v11 = vld [vmem:[#allocation20_spill] sm:$0xff] }
 0x32d   : > { %v1757_v44 = vadd.f32 %v1704_v50, %v1565_v52  ;;  %v1566_v21 = vadd.f32 %v5421_v31, %v1246_v2  ;;  %v6440_v52 = vld [vmem:[#allocation19_spill] sm:$0xff]  ;;  %v5709_v50 = vpop.f32.mrf.mxu0 }
 0x32e   : > { %2987 = vmatpush.bf16.msrb.mxu0 %v4085_v30  ;;  %v4072_v30 = vld [vmem:[#allocation10 + $0x40] sm:$0xf] }
 0x32f   : > { %v1893_v58 = vpop.f32.mrf.mxu2  ;;  %3812 = vmatmul.msk.bf16.gmra.mxu3 %vm4925_vm6, %v6439_v6  ;;  %2416 = vmatmul.bf16.gmra.mxu1 %v4961_v23 }
 0x330   : > { %v5699_v9 = vadd.f32 %v1893_v58, %v1757_v44 }
 0x332   : > { %v1248_v49 = vpop.f32.mrf.mxu3 }
 0x333   : > { %v1249_v18 = vadd.f32 %v1248_v49, %v5405_v37 }
 0x334   : > { %v1706_v47 = vpop.f32.mrf.mxu1 }
 0x335   : > { %v1758_v13 = vadd.f32 %v1706_v47, %v1566_v21  ;;  %v1567_v48 = vadd.f32 %v5436_v15, %v1249_v18  ;;  %v4205_v18 = vld [vmem:[#allocation10 + $0x44] sm:$0xf0] }
 0x337   : > { %v1895_v5 = vpop.f32.mrf.mxu2 }
 0x338   : > { %v5703_v43 = vadd.f32 %v1895_v5, %v1758_v13 }
 0x33a   : > { %v1250_v23 = vpop.f32.mrf.mxu3 }
 0x33b   : > { %v1251_v6 = vadd.f32 %v1250_v23, %v5415_v17  ;;  %v5722_v17 = vpop.f32.mrf.mxu0 }
 0x33c   : > { %v1709_v45 = vpop.f32.mrf.mxu1  ;;  %4001 = vmatmul.msk.bf16.gmra.mxu2 %vm4925_vm6, %v6440_v52 }
 0x33d   : > { %v1759_v31 = vadd.f32 %v1709_v45, %v1567_v48  ;;  %v1568_v2 = vadd.f32 %v5447_v34, %v1251_v6 }
 0x33f   : > { %v1898_v44 = vpop.f32.mrf.mxu2  ;;  %3815 = vmatmul.msk.bf16.gmra.mxu3 %vm4925_vm6, %v6440_v52  ;;  %2421 = vmatmul.bf16.gmra.mxu1 %v4987_v62  ;;  %v4204_v52 = vld [vmem:[#allocation10 + $0x44] sm:$0xf] }
 0x340   : > { %v5716_v37 = vadd.f32 %v1898_v44, %v1759_v31  ;;  %v4074_v31 = vld [vmem:[#allocation10 + $0x48] sm:$0xf0] }
 0x341   : > { %v4077_v6 = vor.u32 %v4204_v52, %v4074_v31  ;;  %v6446_v52 = vld [vmem:[#allocation24_spill] sm:$0xff] }
 0x342   : > { %v1253_v15 = vpop.f32.mrf.mxu3 }
 0x343   : > { %v1254_v59 = vadd.f32 %v1253_v15, %v5423_v19  ;;  %v5735_v23 = vpop.f32.mrf.mxu0  ;;  %2988 = vmatpush.bf16.msrb.mxu0 %v4077_v6  ;;  %v6447_v6 = vld [vmem:[#allocation56_spill] sm:$0xff] }
 0x344   : > { %v1711_v58 = vpop.f32.mrf.mxu1 }
 0x345   : > { %v1760_v29 = vadd.f32 %v1711_v58, %v1568_v2  ;;  %v1569_v47 = vadd.f32 %v5455_v24, %v1254_v59  ;;  %v4073_v24 = vor.u32 %v4205_v18, %v4072_v30  ;;  %v6442_v59 = vld [vmem:[#allocation22_spill] sm:$0xff]  ;;  %v6445_v18 = vld [vmem:[#allocation55_spill] sm:$0xff] }
 0x347   : > { %v1900_v51 = vpop.f32.mrf.mxu2  ;;  %2899 = vmatpush.bf16.msrb.mxu3 %v4073_v24 }
 0x348   : > { %v5720_v49 = vadd.f32 %v1900_v51, %v1760_v29 }
 0x34a   : > { %v1255_v21 = vpop.f32.mrf.mxu3 }
 0x34b   : > { %v1256_v34 = vadd.f32 %v1255_v21, %v5431_v4 }
 0x34c   : > { %v1714_v13 = vpop.f32.mrf.mxu1  ;;  %4004 = vmatmul.msk.bf16.gmra.mxu2 %vm4925_vm6, %v6441_v11 }
 0x34d   : > { %v1761_v62 = vadd.f32 %v1714_v13, %v1569_v47  ;;  %v1570_v48 = vadd.f32 %v5465_v8, %v1256_v34  ;;  %v5745_v8 = vpop.f32.mrf.mxu0 }
 0x34f   : > { %v1903_v26 = vpop.f32.mrf.mxu2  ;;  %3818 = vmatmul.msk.bf16.gmra.mxu3 %vm4925_vm6, %v6441_v11  ;;  %2426 = vmatmul.bf16.gmra.mxu1 %v5015_v42  ;;  %v6444_v11 = vld [vmem:[#allocation59_spill] sm:$0xff] }
 0x350   : > { %v5733_v19 = vadd.f32 %v1903_v26, %v1761_v62 }
 0x352   : > { %v1258_v5 = vpop.f32.mrf.mxu3 }
 0x353   : > { %v1259_v44 = vadd.f32 %v1258_v5, %v5439_v7  ;;  %v6443_v7 = vld [vmem:[#allocation21_spill] sm:$0xff] }
 0x354   : > { %v1716_v45 = vpop.f32.mrf.mxu1 }
 0x355   : > { %v1762_v4 = vadd.f32 %v1716_v45, %v1570_v48  ;;  %v1571_v58 = vadd.f32 %v5481_v53, %v1259_v44  ;;  %v5755_v30 = vpop.f32.mrf.mxu0 }
 0x357   : > { %v1905_v15 = vpop.f32.mrf.mxu2 }
 0x358   : > { %v5739_v42 = vadd.f32 %v1905_v15, %v1762_v4 }
 0x35a   : > { %v1260_v2 = vpop.f32.mrf.mxu3 }
 0x35b   : > { %v1261_v21 = vadd.f32 %v1260_v2, %v5449_v33  ;;  %v6448_v2 = vld [vmem:[#allocation23_spill] sm:$0xff] }
 0x35c   : > { %v1719_v29 = vpop.f32.mrf.mxu1  ;;  %4007 = vmatmul.msk.bf16.gmra.mxu2 %vm4925_vm6, %v6442_v59 }
 0x35d   : > { %v1763_v51 = vadd.f32 %v1719_v29, %v1571_v58  ;;  %v1572_v62 = vadd.f32 %v6444_v11, %v1261_v21  ;;  %v4064_v29 = vld [vmem:[#allocation10 + $0x30] sm:$0xf] }
 0x35f   : > { %v1908_v47 = vpop.f32.mrf.mxu2  ;;  %3821 = vmatmul.msk.bf16.gmra.mxu3 %vm4925_vm6, %v6442_v59  ;;  %2431 = vmatmul.bf16.gmra.mxu1 %v6443_v7  ;;  %v4203_v59 = vld [vmem:[#allocation10 + $0x34] sm:$0xf0] }
 0x360   : > { %v5752_v13 = vadd.f32 %v1908_v47, %v1763_v51  ;;  %v4065_v51 = vor.u32 %v4203_v59, %v4064_v29  ;;  %v6449_v47 = vld [vmem:[#allocation62_spill] sm:$0xff]  ;;  %v6453_v59 = vld [vmem:[#allocation25_spill] sm:$0xff] }
 0x362   : > { %v1263_v53 = vpop.f32.mrf.mxu3  ;;  %2900 = vmatpush.bf16.msrb.mxu3 %v4065_v51 }
 0x363   : > { %v1264_v24 = vadd.f32 %v1263_v53, %v6445_v18  ;;  %v6450_v18 = vld [vmem:[#allocation57_spill] sm:$0xff] }
 0x364   : > { %v1721_v34 = vpop.f32.mrf.mxu1 }
 0x365   : > { %v1764_v26 = vadd.f32 %v1721_v34, %v1572_v62  ;;  %v1573_v45 = vadd.f32 %v5499_v35, %v1264_v24  ;;  %v5771_v35 = vpop.f32.mrf.mxu0  ;;  %v4202_v62 = vld [vmem:[#allocation10 + $0x34] sm:$0xf]  ;;  %v4066_v34 = vld [vmem:[#allocation10 + $0x38] sm:$0xf0] }
 0x367   : > { %v1910_v5 = vpop.f32.mrf.mxu2 }
 0x368   : > { %v5758_v33 = vadd.f32 %v1910_v5, %v1764_v26  ;;  %v4069_v26 = vor.u32 %v4202_v62, %v4066_v34 }
 0x36a   : > { %v1265_v48 = vpop.f32.mrf.mxu3  ;;  %2989 = vmatpush.bf16.msrb.mxu0 %v4069_v26  ;;  %v4198_v26 = vld [vmem:[#allocation10 + $0x14] sm:$0xf] }
 0x36b   : > { %v1266_v44 = vadd.f32 %v1265_v48, %v6447_v6  ;;  %v6451_v6 = vld [vmem:[#allocation26_spill] sm:$0xff] }
 0x36c   : > { %v1724_v4 = vpop.f32.mrf.mxu1  ;;  %4010 = vmatmul.msk.bf16.gmra.mxu2 %vm4925_vm6, %v6446_v52 }
 0x36d   : > { %v1765_v31 = vadd.f32 %v1724_v4, %v1573_v45  ;;  %v1574_v7 = vadd.f32 %v6449_v47, %v1266_v44  ;;  %v5777_v4 = vpop.f32.mrf.mxu0  ;;  %v4200_v47 = vld [vmem:[#allocation10 + $0x24] sm:$0xf] }
 0x36f   : > { %v1913_v15 = vpop.f32.mrf.mxu2  ;;  %3824 = vmatmul.msk.bf16.gmra.mxu3 %vm4925_vm6, %v6446_v52  ;;  %2436 = vmatmul.bf16.gmra.mxu1 %v6448_v2 }
 0x370   : > { %v5769_v58 = vadd.f32 %v1913_v15, %v1765_v31  ;;  %v6452_v15 = vld [vmem:[#allocation58_spill] sm:$0xff] }
 0x372   : > { %v1268_v21 = vpop.f32.mrf.mxu3 }
 0x373   : > { %v1269_v24 = vadd.f32 %v1268_v21, %v6450_v18  ;;  %v4050_v18 = vld [vmem:[#allocation10 + $0x18] sm:$0xf0] }
 0x374   : > { %v1726_v53 = vpop.f32.mrf.mxu1 }
 0x375   : > { %v1766_v11 = vadd.f32 %v1726_v53, %v1574_v7  ;;  %v1575_v52 = vadd.f32 %v5527_v16, %v1269_v24  ;;  %v4058_v16 = vld [vmem:[#allocation10 + $0x28] sm:$0xf0]  ;;  %v5791_v62 = vpop.f32.mrf.mxu0  ;;  %v6454_v24 = vld [vmem:[#allocation60_spill] sm:$0xff] }
 0x376   : > { %v4061_v53 = vor.u32 %v4200_v47, %v4058_v16 }
 0x377   : > { %v1915_v5 = vpop.f32.mrf.mxu2 }
 0x378   : > { %v5775_v48 = vadd.f32 %v1915_v5, %v1766_v11  ;;  %2990 = vmatpush.bf16.msrb.mxu0 %v4061_v53 }
 0x37a   : > { %v1270_v45 = vpop.f32.mrf.mxu3 }
 0x37b   : > { %v1271_v2 = vadd.f32 %v1270_v45, %v6452_v15  ;;  %v4042_v15 = vld [vmem:[#allocation10 + $0x8] sm:$0xf0] }
 0x37c   : > { %v1729_v31 = vpop.f32.mrf.mxu1  ;;  %4013 = vmatmul.msk.bf16.gmra.mxu2 %vm4925_vm6, %v6451_v6 }
 0x37d   : > { %v1767_v44 = vadd.f32 %v1729_v31, %v1575_v52  ;;  %v1576_v7 = vadd.f32 %v5540_v22, %v1271_v2  ;;  %v4053_v52 = vor.u32 %v4198_v26, %v4050_v18  ;;  %v5800_v16 = vpop.f32.mrf.mxu0 }
 0x37f   : > { %v1918_v29 = vpop.f32.mrf.mxu2  ;;  %3827 = vmatmul.msk.bf16.gmra.mxu3 %vm4925_vm6, %v6451_v6  ;;  %2441 = vmatmul.bf16.gmra.mxu1 %v6453_v59  ;;  %v6455_v59 = vld [vmem:[#allocation28_spill] sm:$0xff] }
 0x380   : > { %v5788_v51 = vadd.f32 %v1918_v29, %v1767_v44  ;;  %2991 = vmatpush.bf16.msrb.mxu0 %v4053_v52  ;;  %v4196_v44 = vld [vmem:[#allocation10 + $0x4] sm:$0xf] }
 0x381   : > { %v4045_v2 = vor.u32 %v4196_v44, %v4042_v15 }
 0x382   : > { %v1273_v21 = vpop.f32.mrf.mxu3 }
 0x383   : > { %v1274_v5 = vadd.f32 %v1273_v21, %v6454_v24  ;;  %v6456_v21 = vld [vmem:[#allocation61_spill] sm:$0xff]  ;;  %v4056_v24 = vld [vmem:[#allocation10 + $0x20] sm:$0xf] }
 0x384   : > { %v1731_v11 = vpop.f32.mrf.mxu1  ;;  %2992 = vmatpush.bf16.msrb.mxu0 %v4045_v2 }
 0x385   : > { %v1768_v34 = vadd.f32 %v1731_v11, %v1576_v7  ;;  %v1577_v22 = vadd.f32 %v5551_v10, %v1274_v5  ;;  %v6457_v11 = vld [vmem:[#allocation27_spill] sm:$0xff]  ;;  %v4201_v5 = vld [vmem:[#allocation10 + $0x24] sm:$0xf0]  ;;  %v5812_v15 = vpop.f32.mrf.mxu0 }
 0x386   : > { %v4057_v52 = vor.u32 %v4201_v5, %v4056_v24 }
 0x387   : > { %v1920_v45 = vpop.f32.mrf.mxu2 }
 0x388   : > { %v5794_v31 = vadd.f32 %v1920_v45, %v1768_v34  ;;  %2901 = vmatpush.bf16.msrb.mxu3 %v4057_v52  ;;  %v6462_v52 = vld [vmem:[#allocation63_spill] sm:$0xff] }
 0x38a   : > { %v1275_v6 = vpop.f32.mrf.mxu3 }
 0x38b   : > { %v1276_v7 = vadd.f32 %v1275_v6, %v6456_v21  ;;  %v6461_v21 = vld [vmem:[#allocation29_spill] sm:$0xff] }
 0x38c   : > { %v1734_v29 = vpop.f32.mrf.mxu1  ;;  %4016 = vmatmul.msk.bf16.gmra.mxu2 %vm4925_vm6, %v6455_v59 }
 0x38d   : > { %v1769_v47 = vadd.f32 %v1734_v29, %v1577_v22  ;;  %v1578_v26 = vadd.f32 %v5563_v25, %v1276_v7 }
 0x38f   : > { %v1923_v53 = vpop.f32.mrf.mxu2  ;;  %3830 = vmatmul.msk.bf16.gmra.mxu3 %vm4925_vm6, %v6455_v59  ;;  %2446 = vmatmul.bf16.gmra.mxu1 %v6457_v11  ;;  %v6460_v59 = vld [vmem:[#allocation30_spill] sm:$0xff] }
 0x390   : > { %v5807_v10 = vadd.f32 %v1923_v53, %v1769_v47 }
 0x392   : > { %6458 = vst [vmem:[#allocation40_spill] sm:$0xff] %v5807_v10  ;;  %v2040_v34 = vpop.f32.mrf.mxu3  ;;  %v6471_v10 = vld [vmem:[#allocation46_spill] sm:$0xff] }
 0x393   : > { %v2120_v22 = vadd.f32 %v2040_v34, %v5518_v60  ;;  %v5824_v60 = vpop.f32.mrf.mxu0 }
 0x394   : > { %v1736_v18 = vpop.f32.mrf.mxu1 }
 0x395   : > { %v1770_v45 = vadd.f32 %v1736_v18, %v1578_v26  ;;  %v2306_v25 = vadd.f32 %v5582_v56, %v2120_v22  ;;  %v5827_v18 = vld [vmem:[#allocation8] ss:$0 sm:$0xff] }
 0x397   : > { %v1925_v44 = vpop.f32.mrf.mxu2 }
 0x398   : > { %v5810_v6 = vadd.f32 %v1925_v44, %v1770_v45 }
 0x39a   : > { %6459 = vst [vmem:[#allocation42_spill] sm:$0xff] %v5810_v6  ;;  %v2042_v2 = vpop.f32.mrf.mxu3 }
 0x39b   : > { %v2121_v47 = vadd.f32 %v2042_v2, %v5525_v41 }
 0x39c   : > { %v2412_v29 = vpop.f32.mrf.mxu1  ;;  %4019 = vmatmul.msk.bf16.gmra.mxu2 %vm4925_vm6, %v6460_v59 }
 0x39d   : > { %v2492_v53 = vadd.f32 %v2412_v29, %v2306_v25  ;;  %v2307_v34 = vadd.f32 %v5591_v20, %v2121_v47  ;;  %v5835_v20 = vpop.f32.mrf.mxu0 }
 0x39f   : > { %3833 = vmatmul.msk.bf16.gmra.mxu3 %vm4925_vm6, %v6460_v59  ;;  %2451 = vmatmul.bf16.gmra.mxu1 %v6461_v21  ;;  %v2598_v7 = vpop.f32.mrf.mxu2  ;;  %v6463_v21 = vld [vmem:[#allocation36_spill] sm:$0xff] }
 0x3a0   : > { %v2678_v26 = vadd.f32 %v2598_v7, %v2492_v53  ;;  %v6464_v53 = vld [vmem:[#allocation64_spill] sm:$0xff] }
 0x3a2   : > { %v2045_v11 = vpop.f32.mrf.mxu3  ;;  %v2714_v41 = vadd.f32 %v5827_v18, %v2678_v26 }
 0x3a3   : > { %v2122_v44 = vadd.f32 %v2045_v11, %v6462_v52  ;;  %v6465_v11 = vld [vmem:[#allocation32_spill] sm:$0xff]  ;;  %v4048_v52 = vld [vmem:[#allocation10 + $0x10] sm:$0xf] }
 0x3a4   : > { %v2414_v24 = vpop.f32.mrf.mxu1  ;;  %v2746_v29 = vmax.f32 %v2714_v41, 0.0 }
 0x3a5   : > { %v2493_v56 = vadd.f32 %v2414_v24, %v2307_v34  ;;  %v2308_v7 = vadd.f32 %v5605_v27, %v2122_v44 }
 0x3a7   : > { %v2600_v5 = vpop.f32.mrf.mxu2 }
 0x3a8   : > { %v2679_v45 = vadd.f32 %v2600_v5, %v2493_v56 }
 0x3aa   : > { %v2715_v22 = vadd.f32 %v5827_v18, %v2679_v45  ;;  %v2047_v2 = vpop.f32.mrf.mxu3 }
 0x3ab   : > { %v2123_v34 = vadd.f32 %v2047_v2, %v6464_v53  ;;  %v5847_v2 = vpop.f32.mrf.mxu0  ;;  %v6466_v53 = vld [vmem:[#allocation31_spill] sm:$0xff] }
 0x3ac   : > { %v2747_v59 = vmax.f32 %v2715_v22, 0.0  ;;  %v2417_v25 = vpop.f32.mrf.mxu1  ;;  %4022 = vmatmul.msk.bf16.gmra.mxu2 %vm4925_vm6, %v6463_v21  ;;  %v4199_v22 = vld [vmem:[#allocation10 + $0x14] sm:$0xf0] }
 0x3ad   : > { %v2494_v24 = vadd.f32 %v2417_v25, %v2308_v7  ;;  %v2309_v5 = vadd.f32 %v5615_v61, %v2123_v34  ;;  %v4049_v44 = vor.u32 %v4199_v22, %v4048_v52 }
 0x3ae   : > { %v5837_v47 = vpack.c.bf16 %v2747_v59, %v2746_v29 }
 0x3af   : > { %3836 = vmatmul.msk.bf16.gmra.mxu3 %vm4925_vm6, %v6463_v21  ;;  %2456 = vmatmul.bf16.gmra.mxu1 %v6465_v11  ;;  %v2603_v26 = vpop.f32.mrf.mxu2 }
 0x3b0   : > { %2993 = vmatmul.bf16.vlgmr.msrb.gmra.mxu0 %v5837_v47  ;;  %v2680_v41 = vadd.f32 %v2603_v26, %v2494_v24  ;;  %2902 = vmatpush.bf16.msrb.mxu3 %v4049_v44  ;;  %v6467_v26 = vld [vmem:[#allocation41_spill] sm:$0xff] }
 0x3b2   : > { %v2050_v56 = vpop.f32.mrf.mxu3  ;;  %v2716_v59 = vadd.f32 %v5827_v18, %v2680_v41 }
 0x3b3   : > { %v2124_v25 = vadd.f32 %v2050_v56, %v6466_v53  ;;  %v6469_v56 = vld [vmem:[#allocation38_spill] sm:$0xff] }
 0x3b4   : > { %v2419_v45 = vpop.f32.mrf.mxu1  ;;  %v2748_v6 = vmax.f32 %v2716_v59, 0.0 }
 0x3b5   : > { %v2495_v27 = vadd.f32 %v2419_v45, %v2309_v5  ;;  %v2310_v24 = vadd.f32 %v5633_v36, %v2124_v25  ;;  %v6468_v45 = vld [vmem:[#allocation33_spill] sm:$0xff] }
 0x3b7   : > { %v2605_v29 = vpop.f32.mrf.mxu2 }
 0x3b8   : > { %v2681_v21 = vadd.f32 %v2605_v29, %v2495_v27  ;;  %v5864_v27 = vpop.f32.mrf.mxu0 }
 0x3ba   : > { %v2717_v7 = vadd.f32 %v5827_v18, %v2681_v21  ;;  %v2052_v11 = vpop.f32.mrf.mxu3 }
 0x3bb   : > { %v2125_v52 = vadd.f32 %v2052_v11, %v6468_v45 }
 0x3bc   : > { %v2749_v61 = vmax.f32 %v2717_v7, 0.0  ;;  %v2422_v34 = vpop.f32.mrf.mxu1  ;;  %4025 = vmatmul.msk.bf16.gmra.mxu2 %vm4925_vm6, %v6467_v26  ;;  %v6470_v7 = vld [vmem:[#allocation34_spill] sm:$0xff] }
 0x3bd   : > { %v2496_v22 = vadd.f32 %v2422_v34, %v2310_v24  ;;  %v2311_v29 = vadd.f32 %v5646_v55, %v2125_v52 }
 0x3be   : > { %v5856_v5 = vpack.c.bf16 %v2749_v61, %v2748_v6 }
 0x3bf   : > { %3839 = vmatmul.msk.bf16.gmra.mxu3 %vm4925_vm6, %v6467_v26  ;;  %2461 = vmatmul.bf16.gmra.mxu1 %v6469_v56  ;;  %v2608_v41 = vpop.f32.mrf.mxu2 }
 0x3c0   : > { %2998 = vmatmul.bf16.gmra.mxu0 %v5856_v5  ;;  %v2682_v36 = vadd.f32 %v2608_v41, %v2496_v22  ;;  %v5870_v34 = vpop.f32.mrf.mxu0  ;;  %v6472_v41 = vld [vmem:[#allocation35_spill] sm:$0xff] }
 0x3c2   : > { %v2055_v44 = vpop.f32.mrf.mxu3  ;;  %v2718_v53 = vadd.f32 %v5827_v18, %v2682_v36 }
 0x3c3   : > { %v2126_v11 = vadd.f32 %v2055_v44, %v6470_v7  ;;  %v6473_v44 = vld [vmem:[#allocation43_spill] sm:$0xff] }
 0x3c4   : > { %v2424_v6 = vpop.f32.mrf.mxu1  ;;  %v2750_v24 = vmax.f32 %v2718_v53, 0.0 }
 0x3c5   : > { %v2497_v59 = vadd.f32 %v2424_v6, %v2311_v29  ;;  %v2312_v55 = vadd.f32 %v5657_v0, %v2126_v11  ;;  %v4040_v0 = vld [vmem:[#allocation10] sm:$0xf] }
 0x3c7   : > { %v2610_v21 = vpop.f32.mrf.mxu2 }
 0x3c8   : > { %v2683_v25 = vadd.f32 %v2610_v21, %v2497_v59  ;;  %v5885_v7 = vpop.f32.mrf.mxu0 }
 0x3ca   : > { %v2719_v61 = vadd.f32 %v5827_v18, %v2683_v25  ;;  %v2057_v26 = vpop.f32.mrf.mxu3  ;;  %v4197_v25 = vld [vmem:[#allocation10 + $0x4] sm:$0xf0] }
 0x3cb   : > { %v2127_v22 = vadd.f32 %v2057_v26, %v6472_v41 }
 0x3cc   : > { %v2751_v45 = vmax.f32 %v2719_v61, 0.0  ;;  %v2427_v56 = vpop.f32.mrf.mxu1  ;;  %4028 = vmatmul.msk.bf16.gmra.mxu2 %vm4925_vm6, %v6471_v10  ;;  %v4041_v61 = vor.u32 %v4197_v25, %v4040_v0 }
 0x3cd   : > { %v2498_v36 = vadd.f32 %v2427_v56, %v2312_v55  ;;  %v2313_v59 = vadd.f32 %v5669_v1, %v2127_v22 }
 0x3ce   : > { %v5876_v52 = vpack.c.bf16 %v2751_v45, %v2750_v24  ;;  %2903 = vmatpush.bf16.msrb.mxu3 %v4041_v61  ;;  %v6474_v45 = vld [vmem:[#allocation37_spill] sm:$0xff] }
 0x3cf   : > { %3842 = vmatmul.msk.bf16.gmra.mxu3 %vm4925_vm6, %v6471_v10  ;;  %2466 = vmatmul.bf16.gmra.mxu1 %v6473_v44  ;;  %v2613_v29 = vpop.f32.mrf.mxu2 }
 0x3d0   : > { %3003 = vmatmul.bf16.gmra.mxu0 %v5876_v52  ;;  %v2684_v21 = vadd.f32 %v2613_v29, %v2498_v36  ;;  %v6475_v29 = vld [vmem:[#allocation49_spill] sm:$0xff] }
 0x3d2   : > { %v2060_v6 = vpop.f32.mrf.mxu3  ;;  %v2720_v10 = vadd.f32 %v5827_v18, %v2684_v21  ;;  %v6476_v21 = vld [vmem:[#allocation39_spill] sm:$0xff] }
 0x3d3   : > { %v2128_v56 = vadd.f32 %v2060_v6, %v6474_v45  ;;  %v6477_v6 = vld [vmem:[#allocation48_spill] sm:$0xff] }
 0x3d4   : > { %v2429_v53 = vpop.f32.mrf.mxu1  ;;  %v2752_v44 = vmax.f32 %v2720_v10, 0.0 }
 0x3d5   : > { %v2499_v11 = vadd.f32 %v2429_v53, %v2313_v59  ;;  %v2314_v36 = vadd.f32 %v5709_v50, %v2128_v56  ;;  %v5896_v53 = vpop.f32.mrf.mxu0 }
 0x3d7   : > { %v2615_v26 = vpop.f32.mrf.mxu2 }
 0x3d8   : > { %v2685_v24 = vadd.f32 %v2615_v26, %v2499_v11 }
 0x3da   : > { %v2721_v55 = vadd.f32 %v5827_v18, %v2685_v24  ;;  %v2062_v41 = vpop.f32.mrf.mxu3 }
 0x3db   : > { %v2129_v0 = vadd.f32 %v2062_v41, %v6476_v21 }
 0x3dc   : > { %v2753_v1 = vmax.f32 %v2721_v55, 0.0  ;;  %v2432_v22 = vpop.f32.mrf.mxu1  ;;  %4031 = vmatmul.msk.bf16.gmra.mxu2 %vm4925_vm6, %v6475_v29 }
 0x3dd   : > { %v2500_v11 = vadd.f32 %v2432_v22, %v2314_v36  ;;  %v2315_v26 = vadd.f32 %v5722_v17, %v2129_v0  ;;  %v5906_v41 = vpop.f32.mrf.mxu0 }
 0x3de   : > { %v5894_v59 = vpack.c.bf16 %v2753_v1, %v2752_v44 }
 0x3df   : > { %3845 = vmatmul.msk.bf16.gmra.mxu3 %vm4925_vm6, %v6475_v29  ;;  %2471 = vmatmul.bf16.gmra.mxu1 %v6477_v6  ;;  %v2618_v25 = vpop.f32.mrf.mxu2  ;;  %v6478_v6 = vld [vmem:[#allocation53_spill] sm:$0xff] }
 0x3e0   : > { %3008 = vmatmul.bf16.gmra.mxu0 %v5894_v59  ;;  %v2686_v50 = vadd.f32 %v2618_v25, %v2500_v11 }
 0x3e2   : > { %v2065_v61 = vpop.f32.mrf.mxu3  ;;  %v2722_v56 = vadd.f32 %v5827_v18, %v2686_v50 }
 0x3e3   : > { %v2130_v44 = vadd.f32 %v2065_v61, %v5624_v38 }
 0x3e4   : > { %v2434_v10 = vpop.f32.mrf.mxu1  ;;  %v2754_v22 = vmax.f32 %v2722_v56, 0.0 }
 0x3e5   : > { %v2501_v24 = vadd.f32 %v2434_v10, %v2315_v26  ;;  %v2316_v17 = vadd.f32 %v5735_v23, %v2130_v44  ;;  %v5922_v26 = vpop.f32.mrf.mxu0 }
 0x3e7   : > { %v2620_v45 = vpop.f32.mrf.mxu2 }
 0x3e8   : > { %v2687_v55 = vadd.f32 %v2620_v45, %v2501_v24 }
 0x3ea   : > { %v2723_v1 = vadd.f32 %v5827_v18, %v2687_v55  ;;  %v2067_v29 = vpop.f32.mrf.mxu3 }
 0x3eb   : > { %v2131_v25 = vadd.f32 %v2067_v29, %v5631_v57 }
 0x3ec   : > { %v2755_v36 = vmax.f32 %v2723_v1, 0.0  ;;  %v2437_v21 = vpop.f32.mrf.mxu1  ;;  %4034 = vmatmul.msk.bf16.gmra.mxu2 %vm4925_vm6, %v6478_v6 }
 0x3ed   : > { %v2502_v11 = vadd.f32 %v2437_v21, %v2316_v17  ;;  %v2317_v50 = vadd.f32 %v5745_v8, %v2131_v25  ;;  %v5931_v8 = vpop.f32.mrf.mxu0 }
 0x3ee   : > { %v5914_v0 = vpack.c.bf16 %v2755_v36, %v2754_v22  ;;  %v6479_v36 = vld [vmem:[#allocation54_spill] sm:$0xff] }
 0x3ef   : > { %3848 = vmatmul.msk.bf16.gmra.mxu3 %vm4925_vm6, %v6478_v6  ;;  %2476 = vmatmul.bf16.gmra.mxu1 %v5325_v14  ;;  %v2623_v38 = vpop.f32.mrf.mxu2 }
 0x3f0   : > { %3013 = vmatmul.bf16.gmra.mxu0 %v5914_v0  ;;  %v2688_v23 = vadd.f32 %v2623_v38, %v2502_v11 }
 0x3f2   : > { %v2070_v61 = vpop.f32.mrf.mxu3  ;;  %v2724_v57 = vadd.f32 %v5827_v18, %v2688_v23 }
 0x3f3   : > { %v2132_v55 = vadd.f32 %v2070_v61, %v5644_v28 }
 0x3f4   : > { %v2439_v10 = vpop.f32.mrf.mxu1  ;;  %v2756_v1 = vmax.f32 %v2724_v57, 0.0 }
 0x3f5   : > { %v2503_v24 = vadd.f32 %v2439_v10, %v2317_v50  ;;  %v2318_v21 = vadd.f32 %v5755_v30, %v2132_v55  ;;  %v5943_v23 = vpop.f32.mrf.mxu0 }
 0x3f7   : > { %v2625_v45 = vpop.f32.mrf.mxu2 }
 0x3f8   : > { %v2689_v56 = vadd.f32 %v2625_v45, %v2503_v24 }
 0x3fa   : > { %v2725_v14 = vadd.f32 %v5827_v18, %v2689_v56  ;;  %v2072_v44 = vpop.f32.mrf.mxu3 }
 0x3fb   : > { %v2133_v17 = vadd.f32 %v2072_v44, %v5653_v3 }
 0x3fc   : > { %v2757_v29 = vmax.f32 %v2725_v14, 0.0  ;;  %v2442_v22 = vpop.f32.mrf.mxu1  ;;  %4037 = vmatmul.msk.bf16.gmra.mxu2 %vm4925_vm6, %v6479_v36 }
 0x3fd   : > { %v2504_v25 = vadd.f32 %v2442_v22, %v2318_v21  ;;  %v2319_v11 = vadd.f32 %v5771_v35, %v2133_v17 }
 0x3fe   : > { %v5934_v6 = vpack.c.bf16 %v2757_v29, %v2756_v1  ;;  %v5956_v29 = vpop.f32.mrf.mxu0 }
 0x3ff   : > { %3851 = vmatmul.msk.bf16.gmra.mxu3 %vm4925_vm6, %v6479_v36  ;;  %2481 = vmatmul.bf16.gmra.mxu1 %v5351_v63  ;;  %v2628_v28 = vpop.f32.mrf.mxu2 }
 0x400   : > { %3018 = vmatmul.bf16.gmra.mxu0 %v5934_v6  ;;  %v2690_v61 = vadd.f32 %v2628_v28, %v2504_v25 }
 0x402   : > { %v2075_v38 = vpop.f32.mrf.mxu3  ;;  %v2726_v3 = vadd.f32 %v5827_v18, %v2690_v61 }
 0x403   : > { %v2134_v32 = vadd.f32 %v2075_v38, %v5666_v12 }
 0x404   : > { %v2444_v50 = vpop.f32.mrf.mxu1  ;;  %v2758_v57 = vmax.f32 %v2726_v3, 0.0 }
 0x405   : > { %v2505_v30 = vadd.f32 %v2444_v50, %v2319_v11  ;;  %v2320_v35 = vadd.f32 %v5777_v4, %v2134_v32 }
 0x406   : > { %v5960_v38 = vpop.f32.mrf.mxu0 }
 0x407   : > { %v2630_v10 = vpop.f32.mrf.mxu2 }
 0x408   : > { %v2691_v24 = vadd.f32 %v2630_v10, %v2505_v30 }
 0x40a   : > { %v2727_v63 = vadd.f32 %v5827_v18, %v2691_v24  ;;  %v2077_v45 = vpop.f32.mrf.mxu3 }
 0x40b   : > { %v2135_v44 = vadd.f32 %v2077_v45, %v5673_v54 }
 0x40c   : > { %v2759_v56 = vmax.f32 %v2727_v63, 0.0  ;;  %v2447_v55 = vpop.f32.mrf.mxu1  ;;  %2672 = vmatmul.bf16.gmra.mxu2 %v6437_v40 }
 0x40d   : > { %v2506_v12 = vadd.f32 %v2447_v55, %v2320_v35  ;;  %v2321_v36 = vadd.f32 %v5791_v62, %v2135_v44 }
 0x40e   : > { %v5950_v14 = vpack.c.bf16 %v2759_v56, %v2758_v57  ;;  %v5971_v45 = vpop.f32.mrf.mxu0 }
 0x40f   : > { %2486 = vmatmul.bf16.gmra.mxu1 %v6437_v40  ;;  %v2633_v1 = vpop.f32.mrf.mxu2  ;;  %2904 = vmatmul.bf16.vlgmr.msrb.gmra.mxu3 %v5837_v47 }
 0x410   : > { %3023 = vmatmul.bf16.gmra.mxu0 %v5950_v14  ;;  %v2692_v21 = vadd.f32 %v2633_v1, %v2506_v12 }
 0x412   : > { %v2080_v22 = vpop.f32.mrf.mxu3  ;;  %v2728_v25 = vadd.f32 %v5827_v18, %v2692_v21 }
 0x413   : > { %v2136_v40 = vadd.f32 %v2080_v22, %v5684_v46 }
 0x414   : > { %v2449_v17 = vpop.f32.mrf.mxu1  ;;  %v2760_v61 = vmax.f32 %v2728_v25, 0.0 }
 0x415   : > { %v2507_v4 = vadd.f32 %v2449_v17, %v2321_v36  ;;  %v2322_v10 = vadd.f32 %v5800_v16, %v2136_v40  ;;  %v5976_v16 = vld [vmem:[%s6302_s6] sm:$0x3] }
 0x416   : > { %v5982_v12 = vperm.slane %v5976_v16, 1 }
 0x417   : > { %v2635_v28 = vpop.f32.mrf.mxu2 }
 0x418   : > { %v2693_v54 = vadd.f32 %v2635_v28, %v2507_v4 }
 0x41a   : > { %v2729_v47 = vadd.f32 %v5827_v18, %v2693_v54  ;;  %v2082_v11 = vpop.f32.mrf.mxu3 }
 0x41b   : > { %v2137_v3 = vadd.f32 %v2082_v11, %v5688_v39 }
 0x41c   : > { %v2761_v50 = vmax.f32 %v2729_v47, 0.0  ;;  %v2452_v30 = vpop.f32.mrf.mxu1  ;;  %v4336_v47 = vld [vmem:[%s4800_s15 + $0x8] sm:$0xff] }
 0x41d   : > { %v2508_v32 = vadd.f32 %v2452_v30, %v2322_v10  ;;  %v2323_v46 = vadd.f32 %v5812_v15, %v2137_v3 }
 0x41e   : > { %v5965_v62 = vpack.c.bf16 %v2761_v50, %v2760_v61 }
 0x41f   : > { %v2638_v24 = vpop.f32.mrf.mxu2  ;;  %2909 = vmatmul.bf16.gmra.mxu3 %v5856_v5 }
 0x420   : > { %3028 = vmatmul.bf16.gmra.mxu0 %v5965_v62  ;;  %v2694_v57 = vadd.f32 %v2638_v24, %v2508_v32 }
 0x422   : > { %v2085_v63 = vpop.f32.mrf.mxu3  ;;  %v2730_v39 = vadd.f32 %v5827_v18, %v2694_v57 }
 0x423   : > { %v2138_v44 = vadd.f32 %v2085_v63, %v5699_v9  ;;  %v4337_v63 = vld [vmem:[%s4800_s15 + $0x18] sm:$0xff] }
 0x424   : > { %v2454_v56 = vpop.f32.mrf.mxu1  ;;  %v2762_v22 = vmax.f32 %v2730_v39, 0.0 }
 0x425   : > { %v2509_v55 = vadd.f32 %v2454_v56, %v2323_v46  ;;  %v2324_v4 = vadd.f32 %v5824_v60, %v2138_v44 }
 0x427   : > { %v2640_v35 = vpop.f32.mrf.mxu2 }
 0x428   : > { %v2695_v5 = vadd.f32 %v2640_v35, %v2509_v55 }
 0x42a   : > { %v2731_v1 = vadd.f32 %v5827_v18, %v2695_v5  ;;  %v2087_v15 = vpop.f32.mrf.mxu3 }
 0x42b   : > { %v2139_v54 = vadd.f32 %v2087_v15, %v5703_v43 }
 0x42c   : > { %v2763_v36 = vmax.f32 %v2731_v1, 0.0  ;;  %v2457_v21 = vpop.f32.mrf.mxu1 }
 0x42d   : > { %v2994_v17 = vpop.f32.mrf.mxu0  ;;  %v2510_v40 = vadd.f32 %v2457_v21, %v2324_v4  ;;  %v2325_v30 = vadd.f32 %v5835_v20, %v2139_v54  ;;  %v4338_v4 = vld [vmem:[%s4800_s15 + $0x28] sm:$0xff] }
 0x42e   : > { %v2995_v28 = vadd.f32 %v2994_v17, %v5982_v12  ;;  %v5986_v25 = vpack.c.bf16 %v2763_v36, %v2762_v22 }
 0x42f   : > { %v2643_v9 = vpop.f32.mrf.mxu2  ;;  %2914 = vmatmul.bf16.gmra.mxu3 %v5876_v52 }
 0x430   : > { %v3075_v11 = vadd.f32 %v4336_v47, %v2995_v28  ;;  %3033 = vmatmul.bf16.gmra.mxu0 %v5986_v25  ;;  %v2696_v43 = vadd.f32 %v2643_v9, %v2510_v40 }
 0x432   : > { %v3139_v61 = vmax.f32 %v3075_v11, 0.0  ;;  %v2090_v50 = vpop.f32.mrf.mxu3  ;;  %v2732_v32 = vadd.f32 %v5827_v18, %v2696_v43 }
 0x433   : > { %v2140_v20 = vadd.f32 %v2090_v50, %v5716_v37 }
 0x434   : > { %3203 = vst [vmem:[%s5995_s22 + $0x8] sm:$0xff] %v3139_v61  ;;  %v2459_v60 = vpop.f32.mrf.mxu1  ;;  %v2764_v39 = vmax.f32 %v2732_v32, 0.0 }
 0x435   : > { %v2511_v10 = vadd.f32 %v2459_v60, %v2325_v30  ;;  %v2996_v52 = vpop.f32.mrf.mxu0  ;;  %v2326_v15 = vadd.f32 %v5847_v2, %v2140_v20  ;;  %v4339_v30 = vld [vmem:[%s4800_s15 + $0x38] sm:$0xff] }
 0x436   : > { %v2997_v3 = vadd.f32 %v2996_v52, %v5982_v12 }
 0x437   : > { %v2645_v24 = vpop.f32.mrf.mxu2 }
 0x438   : > { %v3077_v46 = vadd.f32 %v4337_v63, %v2997_v3  ;;  %v2697_v57 = vadd.f32 %v2645_v24, %v2511_v10 }
 0x43a   : > { %v3141_v56 = vmax.f32 %v3077_v46, 0.0  ;;  %v2733_v55 = vadd.f32 %v5827_v18, %v2697_v57  ;;  %v2092_v35 = vpop.f32.mrf.mxu3 }
 0x43b   : > { %v2141_v21 = vadd.f32 %v2092_v35, %v5720_v49 }
 0x43c   : > { %3205 = vst [vmem:[%s5995_s22 + $0x18] sm:$0xff] %v3141_v56  ;;  %v2765_v5 = vmax.f32 %v2733_v55, 0.0  ;;  %v2462_v44 = vpop.f32.mrf.mxu1 }
 0x43d   : > { %v2999_v1 = vpop.f32.mrf.mxu0  ;;  %v2512_v17 = vadd.f32 %v2462_v44, %v2326_v15  ;;  %v2327_v40 = vadd.f32 %v5864_v27, %v2141_v21 }
 0x43e   : > { %v3000_v22 = vadd.f32 %v2999_v1, %v5982_v12  ;;  %v6006_v36 = vpack.c.bf16 %v2765_v5, %v2764_v39  ;;  %v4340_v39 = vld [vmem:[%s4800_s15 + $0x48] sm:$0xff] }
 0x43f   : > { %v2648_v37 = vpop.f32.mrf.mxu2  ;;  %2919 = vmatmul.bf16.gmra.mxu3 %v5894_v59 }
 0x440   : > { %v3079_v28 = vadd.f32 %v4338_v4, %v3000_v22  ;;  %3038 = vmatmul.bf16.gmra.mxu0 %v6006_v36  ;;  %v2698_v2 = vadd.f32 %v2648_v37, %v2512_v17  ;;  %v4341_v4 = vld [vmem:[%s4800_s15 + $0x58] sm:$0xff] }
 0x442   : > { %v3143_v54 = vmax.f32 %v3079_v28, 0.0  ;;  %v2095_v9 = vpop.f32.mrf.mxu3  ;;  %v2734_v59 = vadd.f32 %v5827_v18, %v2698_v2 }
 0x443   : > { %v2142_v10 = vadd.f32 %v2095_v9, %v5733_v19 }
 0x444   : > { %3207 = vst [vmem:[%s5995_s22 + $0x28] sm:$0xff] %v3143_v54  ;;  %v2464_v47 = vpop.f32.mrf.mxu1  ;;  %v2766_v24 = vmax.f32 %v2734_v59, 0.0 }
 0x445   : > { %v2513_v11 = vadd.f32 %v2464_v47, %v2327_v40  ;;  %v3001_v61 = vpop.f32.mrf.mxu0  ;;  %v2328_v57 = vadd.f32 %v5870_v34, %v2142_v10  ;;  %v4342_v10 = vld [vmem:[%s4800_s15 + $0x68] sm:$0xff] }
 0x446   : > { %v3002_v49 = vadd.f32 %v3001_v61, %v5982_v12 }
 0x447   : > { %v2650_v50 = vpop.f32.mrf.mxu2 }
 0x448   : > { %v3081_v43 = vadd.f32 %v4339_v30, %v3002_v49  ;;  %v2699_v60 = vadd.f32 %v2650_v50, %v2513_v11 }
 0x44a   : > { %v3145_v52 = vmax.f32 %v3081_v43, 0.0  ;;  %v2735_v27 = vadd.f32 %v5827_v18, %v2699_v60  ;;  %v2097_v3 = vpop.f32.mrf.mxu3 }
 0x44b   : > { %v2143_v55 = vadd.f32 %v2097_v3, %v5739_v42 }
 0x44c   : > { %3209 = vst [vmem:[%s5995_s22 + $0x38] sm:$0xff] %v3145_v52  ;;  %v2767_v32 = vmax.f32 %v2735_v27, 0.0  ;;  %v2467_v63 = vpop.f32.mrf.mxu1 }
 0x44d   : > { %v3004_v46 = vpop.f32.mrf.mxu0  ;;  %v2514_v35 = vadd.f32 %v2467_v63, %v2328_v57  ;;  %v2329_v15 = vadd.f32 %v5885_v7, %v2143_v55 }
 0x44e   : > { %v3005_v20 = vadd.f32 %v3004_v46, %v5982_v12  ;;  %v6022_v56 = vpack.c.bf16 %v2767_v32, %v2766_v24 }
 0x44f   : > { %v2653_v19 = vpop.f32.mrf.mxu2  ;;  %2924 = vmatmul.bf16.gmra.mxu3 %v5914_v0 }
 0x450   : > { %v3083_v5 = vadd.f32 %v4340_v39, %v3005_v20  ;;  %3043 = vmatmul.bf16.gmra.mxu0 %v6022_v56  ;;  %v2700_v34 = vadd.f32 %v2653_v19, %v2514_v35  ;;  %v4343_v20 = vld [vmem:[%s4800_s15 + $0x78] sm:$0xff] }
 0x452   : > { %v3147_v44 = vmax.f32 %v3083_v5, 0.0  ;;  %v2100_v1 = vpop.f32.mrf.mxu3  ;;  %v2736_v0 = vadd.f32 %v5827_v18, %v2700_v34 }
 0x453   : > { %v2144_v9 = vadd.f32 %v2100_v1, %v5752_v13 }
 0x454   : > { %3211 = vst [vmem:[%s5995_s22 + $0x48] sm:$0xff] %v3147_v44  ;;  %v2469_v22 = vpop.f32.mrf.mxu1  ;;  %v2768_v47 = vmax.f32 %v2736_v0, 0.0  ;;  %v4344_v0 = vld [vmem:[%s4800_s15 + $0x88] sm:$0xff] }
 0x455   : > { %v2515_v21 = vadd.f32 %v2469_v22, %v2329_v15  ;;  %v3006_v37 = vpop.f32.mrf.mxu0  ;;  %v2330_v50 = vadd.f32 %v5896_v53, %v2144_v9 }
 0x456   : > { %v3007_v42 = vadd.f32 %v3006_v37, %v5982_v12 }
 0x457   : > { %v2655_v17 = vpop.f32.mrf.mxu2 }
 0x458   : > { %v3085_v28 = vadd.f32 %v4341_v4, %v3007_v42  ;;  %v2701_v54 = vadd.f32 %v2655_v17, %v2515_v21 }
 0x45a   : > { %v3149_v40 = vmax.f32 %v3085_v28, 0.0  ;;  %v2737_v7 = vadd.f32 %v5827_v18, %v2701_v54  ;;  %v2102_v2 = vpop.f32.mrf.mxu3 }
 0x45b   : > { %v2145_v43 = vadd.f32 %v2102_v2, %v5758_v33 }
 0x45c   : > { %3213 = vst [vmem:[%s5995_s22 + $0x58] sm:$0xff] %v3149_v40  ;;  %v2769_v11 = vmax.f32 %v2737_v7, 0.0  ;;  %v2472_v61 = vpop.f32.mrf.mxu1 }
 0x45d   : > { %v3009_v49 = vpop.f32.mrf.mxu0  ;;  %v2516_v60 = vadd.f32 %v2472_v61, %v2330_v50  ;;  %v2331_v24 = vadd.f32 %v5906_v41, %v2145_v43 }
 0x45e   : > { %v3010_v59 = vadd.f32 %v3009_v49, %v5982_v12  ;;  %v6038_v30 = vpack.c.bf16 %v2769_v11, %v2768_v47  ;;  %v4345_v11 = vld [vmem:[%s4800_s15 + $0x98] sm:$0xff] }
 0x45f   : > { %v2658_v13 = vpop.f32.mrf.mxu2  ;;  %2929 = vmatmul.bf16.gmra.mxu3 %v5934_v6 }
 0x460   : > { %v3087_v52 = vadd.f32 %v4342_v10, %v3010_v59  ;;  %3048 = vmatmul.bf16.gmra.mxu0 %v6038_v30  ;;  %v2702_v53 = vadd.f32 %v2658_v13, %v2516_v60 }
 0x462   : > { %v3151_v27 = vmax.f32 %v3087_v52, 0.0  ;;  %v2105_v3 = vpop.f32.mrf.mxu3  ;;  %v2738_v6 = vadd.f32 %v5827_v18, %v2702_v53 }
 0x463   : > { %v2146_v35 = vadd.f32 %v2105_v3, %v5769_v58 }
 0x464   : > { %3215 = vst [vmem:[%s5995_s22 + $0x68] sm:$0xff] %v3151_v27  ;;  %v2474_v32 = vpop.f32.mrf.mxu1  ;;  %v2770_v44 = vmax.f32 %v2738_v6, 0.0 }
 0x465   : > { %v2517_v63 = vadd.f32 %v2474_v32, %v2331_v24  ;;  %v3011_v46 = vpop.f32.mrf.mxu0  ;;  %v2332_v22 = vadd.f32 %v5922_v26, %v2146_v35 }
 0x466   : > { %v3012_v33 = vadd.f32 %v3011_v46, %v5982_v12 }
 0x467   : > { %v2660_v57 = vpop.f32.mrf.mxu2 }
 0x468   : > { %v3089_v55 = vadd.f32 %v4343_v20, %v3012_v33  ;;  %v2703_v19 = vadd.f32 %v2660_v57, %v2517_v63  ;;  %v4346_v63 = vld [vmem:[%s4800_s15 + $0xa8] sm:$0xff] }
 0x46a   : > { %v3153_v39 = vmax.f32 %v3089_v55, 0.0  ;;  %v2739_v41 = vadd.f32 %v5827_v18, %v2703_v19  ;;  %v2107_v5 = vpop.f32.mrf.mxu3 }
 0x46b   : > { %v2147_v42 = vadd.f32 %v2107_v5, %v5775_v48 }
 0x46c   : > { %3217 = vst [vmem:[%s5995_s22 + $0x78] sm:$0xff] %v3153_v39  ;;  %v2771_v1 = vmax.f32 %v2739_v41, 0.0  ;;  %v2477_v15 = vpop.f32.mrf.mxu1  ;;  %v4347_v39 = vld [vmem:[%s4800_s15 + $0xb8] sm:$0xff] }
 0x46d   : > { %v3014_v34 = vpop.f32.mrf.mxu0  ;;  %v2518_v17 = vadd.f32 %v2477_v15, %v2332_v22  ;;  %v2333_v9 = vadd.f32 %v5931_v8, %v2147_v42 }
 0x46e   : > { %v3015_v21 = vadd.f32 %v3014_v34, %v5982_v12  ;;  %v6054_v37 = vpack.c.bf16 %v2771_v1, %v2770_v44  ;;  %v6480_v44 = vld [vmem:[#allocation40_spill] sm:$0xff] }
 0x46f   : > { %v2663_v58 = vpop.f32.mrf.mxu2  ;;  %2934 = vmatmul.bf16.gmra.mxu3 %v5950_v14 }
 0x470   : > { %v3091_v4 = vadd.f32 %v4344_v0, %v3015_v21  ;;  %3053 = vmatmul.bf16.gmra.mxu0 %v6054_v37  ;;  %v2704_v26 = vadd.f32 %v2663_v58, %v2518_v17 }
 0x472   : > { %v3155_v28 = vmax.f32 %v3091_v4, 0.0  ;;  %v2110_v54 = vpop.f32.mrf.mxu3  ;;  %v2740_v14 = vadd.f32 %v5827_v18, %v2704_v26  ;;  %v6091_v26 = vperm.slane %v5976_v16, 0 }
 0x473   : > { %v2148_v50 = vadd.f32 %v2110_v54, %v5788_v51 }
 0x474   : > { %3219 = vst [vmem:[%s5995_s22 + $0x88] sm:$0xff] %v3155_v28  ;;  %v2479_v40 = vpop.f32.mrf.mxu1  ;;  %v2772_v13 = vmax.f32 %v2740_v14, 0.0  ;;  %v6481_v28 = vld [vmem:[#allocation42_spill] sm:$0xff] }
 0x475   : > { %v2519_v7 = vadd.f32 %v2479_v40, %v2333_v9  ;;  %v3016_v2 = vpop.f32.mrf.mxu0  ;;  %v2334_v27 = vadd.f32 %v5943_v23, %v2148_v50 }
 0x476   : > { %v3017_v48 = vadd.f32 %v3016_v2, %v5982_v12 }
 0x477   : > { %v2665_v47 = vpop.f32.mrf.mxu2 }
 0x478   : > { %v3093_v61 = vadd.f32 %v4345_v11, %v3017_v48  ;;  %v2705_v49 = vadd.f32 %v2665_v47, %v2519_v7  ;;  %v4348_v7 = vld [vmem:[%s4800_s15 + $0xc8] sm:$0xff] }
 0x47a   : > { %v3157_v59 = vmax.f32 %v3093_v61, 0.0  ;;  %v2741_v8 = vadd.f32 %v5827_v18, %v2705_v49  ;;  %v2112_v43 = vpop.f32.mrf.mxu3 }
 0x47b   : > { %v2149_v53 = vadd.f32 %v2112_v43, %v5794_v31 }
 0x47c   : > { %3221 = vst [vmem:[%s5995_s22 + $0x98] sm:$0xff] %v3157_v59  ;;  %v2773_v60 = vmax.f32 %v2741_v8, 0.0  ;;  %v2482_v10 = vpop.f32.mrf.mxu1 }
 0x47d   : > { %v3019_v52 = vpop.f32.mrf.mxu0  ;;  %v2520_v32 = vadd.f32 %v2482_v10, %v2334_v27  ;;  %v2335_v6 = vadd.f32 %v5956_v29, %v2149_v53 }
 0x47e   : > { %v3020_v3 = vadd.f32 %v3019_v52, %v5982_v12  ;;  %v6070_v24 = vpack.c.bf16 %v2773_v60, %v2772_v13  ;;  %v4350_v60 = vld [vmem:[%s4800_s15 + $0xd8] sm:$0xff] }
 0x47f   : > { %v2668_v51 = vpop.f32.mrf.mxu2  ;;  %2939 = vmatmul.bf16.gmra.mxu3 %v5965_v62 }
 0x480   : > { %v3095_v46 = vadd.f32 %v4346_v63, %v3020_v3  ;;  %3058 = vmatmul.bf16.gmra.mxu0 %v6070_v24  ;;  %v2706_v23 = vadd.f32 %v2668_v51, %v2520_v32  ;;  %v4351_v63 = vld [vmem:[%s4800_s15 + $0x10] sm:$0xff] }
 0x482   : > { %v3159_v33 = vmax.f32 %v3095_v46, 0.0  ;;  %v2115_v57 = vpop.f32.mrf.mxu3  ;;  %v2742_v62 = vadd.f32 %v5827_v18, %v2706_v23 }
 0x483   : > { %v2150_v1 = vadd.f32 %v2115_v57, %v6480_v44 }
 0x484   : > { %3223 = vst [vmem:[%s5995_s22 + $0xa8] sm:$0xff] %v3159_v33  ;;  %v2484_v20 = vpop.f32.mrf.mxu1  ;;  %v2774_v22 = vmax.f32 %v2742_v62, 0.0 }
 0x485   : > { %v2521_v55 = vadd.f32 %v2484_v20, %v2335_v6  ;;  %v3021_v19 = vpop.f32.mrf.mxu0  ;;  %v2336_v17 = vadd.f32 %v5960_v38, %v2150_v1 }
 0x486   : > { %v3022_v31 = vadd.f32 %v3021_v19, %v5982_v12 }
 0x487   : > { %v2670_v35 = vpop.f32.mrf.mxu2 }
 0x488   : > { %v3097_v41 = vadd.f32 %v4347_v39, %v3022_v31  ;;  %v2707_v5 = vadd.f32 %v2670_v35, %v2521_v55  ;;  %v4353_v35 = vld [vmem:[%s4800_s15 + $0x20] sm:$0xff] }
 0x48a   : > { %v3161_v15 = vmax.f32 %v3097_v41, 0.0  ;;  %v2743_v29 = vadd.f32 %v5827_v18, %v2707_v5  ;;  %v2117_v34 = vpop.f32.mrf.mxu3  ;;  %v4354_v5 = vld [vmem:[%s4800_s15 + $0xf8] sm:$0xff] }
 0x48b   : > { %v2151_v54 = vadd.f32 %v2117_v34, %v6481_v28  ;;  %v4355_v34 = vld [vmem:[%s4800_s15 + $0x30] sm:$0xff] }
 0x48c   : > { %3225 = vst [vmem:[%s5995_s22 + $0xb8] sm:$0xff] %v3161_v15  ;;  %v2775_v21 = vmax.f32 %v2743_v29, 0.0  ;;  %v2487_v42 = vpop.f32.mrf.mxu1 }
 0x48d   : > { %v3024_v58 = vpop.f32.mrf.mxu0  ;;  %v2522_v40 = vadd.f32 %v2487_v42, %v2336_v17  ;;  %v2337_v14 = vadd.f32 %v5971_v45, %v2151_v54  ;;  %v4356_v17 = vld [vmem:[%s4800_s15 + $0x108] sm:$0xff] }
 0x48e   : > { %v3025_v0 = vadd.f32 %v3024_v58, %v5982_v12  ;;  %v6086_v4 = vpack.c.bf16 %v2775_v21, %v2774_v22 }
 0x48f   : > { %v2673_v9 = vpop.f32.mrf.mxu2  ;;  %2944 = vmatmul.bf16.gmra.mxu3 %v5986_v25  ;;  %v4349_v25 = vld [vmem:[%s4800_s15] sm:$0xff] }
 0x490   : > { %v3099_v2 = vadd.f32 %v4348_v7, %v3025_v0  ;;  %3063 = vmatmul.bf16.gmra.mxu0 %v6086_v4  ;;  %v2708_v11 = vadd.f32 %v2673_v9, %v2522_v40  ;;  %v4357_v40 = vld [vmem:[%s4800_s15 + $0x40] sm:$0xff] }
 0x492   : > { %v3163_v38 = vmax.f32 %v3099_v2, 0.0  ;;  %v2905_v48 = vpop.f32.mrf.mxu3  ;;  %v2744_v13 = vadd.f32 %v5827_v18, %v2708_v11 }
 0x493   : > { %v2906_v47 = vadd.f32 %v2905_v48, %v6091_v26 }
 0x494   : > { %3227 = vst [vmem:[%s5995_s22 + $0xc8] sm:$0xff] %v3163_v38  ;;  %v2489_v61 = vpop.f32.mrf.mxu1  ;;  %v2776_v51 = vmax.f32 %v2744_v13, 0.0 }
 0x495   : > { %v3074_v49 = vadd.f32 %v4349_v25, %v2906_v47  ;;  %v2523_v16 = vadd.f32 %v2489_v61, %v2337_v14  ;;  %v3026_v50 = vpop.f32.mrf.mxu0  ;;  %v4358_v47 = vld [vmem:[%s4800_s15 + $0x118] sm:$0xff]  ;;  %v4359_v25 = vld [vmem:[%s4800_s15 + $0x50] sm:$0xff] }
 0x496   : > { %v3027_v59 = vadd.f32 %v3026_v50, %v5982_v12 }
 0x497   : > { %v3138_v8 = vmax.f32 %v3074_v49, 0.0  ;;  %v2675_v43 = vpop.f32.mrf.mxu2 }
 0x498   : > { %v3101_v10 = vadd.f32 %v4350_v60, %v3027_v59  ;;  %v2709_v52 = vadd.f32 %v2675_v43, %v2523_v16 }
 0x499   : > { %3202 = vst [vmem:[%s5995_s22] sm:$0xff] %v3138_v8  ;;  %v4360_v8 = vld [vmem:[%s4800_s15 + $0x128] sm:$0xff] }
 0x49a   : > { %v3165_v45 = vmax.f32 %v3101_v10, 0.0  ;;  %v2745_v27 = vadd.f32 %v5827_v18, %v2709_v52  ;;  %v2907_v3 = vpop.f32.mrf.mxu3  ;;  %v4352_v18 = vld [vmem:[%s4800_s15 + $0xe8] sm:$0xff]  ;;  %v4361_v52 = vld [vmem:[%s4800_s15 + $0x60] sm:$0xff] }
 0x49b   : > { %v2908_v53 = vadd.f32 %v2907_v3, %v6091_v26 }
 0x49c   : > { %3229 = vst [vmem:[%s5995_s22 + $0xd8] sm:$0xff] %v3165_v45  ;;  %v2777_v32 = vmax.f32 %v2745_v27, 0.0 }
 0x49d   : > { %v3076_v46 = vadd.f32 %v4351_v63, %v2908_v53  ;;  %v3029_v33 = vpop.f32.mrf.mxu0 }
 0x49e   : > { %v3030_v57 = vadd.f32 %v3029_v33, %v5982_v12  ;;  %v6108_v6 = vpack.c.bf16 %v2777_v32, %v2776_v51  ;;  %v4362_v51 = vld [vmem:[%s4800_s15 + $0x138] sm:$0xff]  ;;  %v4363_v33 = vld [vmem:[%s4800_s15 + $0x70] sm:$0xff] }
 0x49f   : > { %v3140_v23 = vmax.f32 %v3076_v46, 0.0  ;;  %2949 = vmatmul.bf16.gmra.mxu3 %v6006_v36 }
 0x4a0   : > { %v3103_v20 = vadd.f32 %v4352_v18, %v3030_v57  ;;  %3068 = vmatmul.bf16.gmra.mxu0 %v6108_v6 }
 0x4a1   : > { %3204 = vst [vmem:[%s5995_s22 + $0x10] sm:$0xff] %v3140_v23 }
 0x4a2   : > { %v3167_v55 = vmax.f32 %v3103_v20, 0.0  ;;  %v2910_v19 = vpop.f32.mrf.mxu3 }
 0x4a3   : > { %v2911_v31 = vadd.f32 %v2910_v19, %v6091_v26 }
 0x4a4   : > { %3231 = vst [vmem:[%s5995_s22 + $0xe8] sm:$0xff] %v3167_v55  ;;  %v4364_v55 = vld [vmem:[%s4800_s15 + $0x148] sm:$0xff] }
 0x4a5   : > { %v3078_v62 = vadd.f32 %v4353_v35, %v2911_v31  ;;  %v3031_v39 = vpop.f32.mrf.mxu0 }
 0x4a6   : > { %v3032_v41 = vadd.f32 %v3031_v39, %v5982_v12  ;;  %v4365_v39 = vld [vmem:[%s4800_s15 + $0x80] sm:$0xff] }
 0x4a7   : > { %v3142_v36 = vmax.f32 %v3078_v62, 0.0 }
 0x4a8   : > { %v3105_v44 = vadd.f32 %v4354_v5, %v3032_v41 }
 0x4a9   : > { %3206 = vst [vmem:[%s5995_s22 + $0x20] sm:$0xff] %v3142_v36 }
 0x4aa   : > { %v3169_v1 = vmax.f32 %v3105_v44, 0.0  ;;  %v2912_v15 = vpop.f32.mrf.mxu3 }
 0x4ab   : > { %v2913_v29 = vadd.f32 %v2912_v15, %v6091_v26 }
 0x4ac   : > { %3233 = vst [vmem:[%s5995_s22 + $0xf8] sm:$0xff] %v3169_v1  ;;  %v4366_v1 = vld [vmem:[%s4800_s15 + $0x158] sm:$0xff] }
 0x4ad   : > { %v3080_v22 = vadd.f32 %v4355_v34, %v2913_v29  ;;  %v3034_v21 = vpop.f32.mrf.mxu0 }
 0x4ae   : > { %v3035_v42 = vadd.f32 %v3034_v21, %v5982_v12 }
 0x4af   : > { %v3144_v58 = vmax.f32 %v3080_v22, 0.0  ;;  %2954 = vmatmul.bf16.gmra.mxu3 %v6022_v56  ;;  %v4367_v22 = vld [vmem:[%s4800_s15 + $0x90] sm:$0xff] }
 0x4b0   : > { %v3107_v0 = vadd.f32 %v4356_v17, %v3035_v42 }
 0x4b1   : > { %3208 = vst [vmem:[%s5995_s22 + $0x30] sm:$0xff] %v3144_v58 }
 0x4b2   : > { %v3171_v28 = vmax.f32 %v3107_v0, 0.0  ;;  %v2915_v54 = vpop.f32.mrf.mxu3  ;;  %v4368_v0 = vld [vmem:[%s4800_s15 + $0x168] sm:$0xff] }
 0x4b3   : > { %v2916_v9 = vadd.f32 %v2915_v54, %v6091_v26 }
 0x4b4   : > { %3235 = vst [vmem:[%s5995_s22 + $0x108] sm:$0xff] %v3171_v28 }
 0x4b5   : > { %v3082_v7 = vadd.f32 %v4357_v40, %v2916_v9  ;;  %v3036_v2 = vpop.f32.mrf.mxu0 }
 0x4b6   : > { %v3037_v38 = vadd.f32 %v3036_v2, %v5982_v12 }
 0x4b7   : > { %v3146_v48 = vmax.f32 %v3082_v7, 0.0  ;;  %v4369_v7 = vld [vmem:[%s4800_s15 + $0xa0] sm:$0xff] }
 0x4b8   : > { %v3109_v56 = vadd.f32 %v4358_v47, %v3037_v38 }
 0x4b9   : > { %3210 = vst [vmem:[%s5995_s22 + $0x40] sm:$0xff] %v3146_v48 }
 0x4ba   : > { %v3173_v14 = vmax.f32 %v3109_v56, 0.0  ;;  %v2917_v11 = vpop.f32.mrf.mxu3  ;;  %v4370_v56 = vld [vmem:[%s4800_s15 + $0x178] sm:$0xff] }
 0x4bb   : > { %v2918_v61 = vadd.f32 %v2917_v11, %v6091_v26 }
 0x4bc   : > { %3237 = vst [vmem:[%s5995_s22 + $0x118] sm:$0xff] %v3173_v14 }
 0x4bd   : > { %v3084_v49 = vadd.f32 %v4359_v25, %v2918_v61  ;;  %v3039_v16 = vpop.f32.mrf.mxu0  ;;  %v4371_v25 = vld [vmem:[%s4800_s15 + $0xb0] sm:$0xff] }
 0x4be   : > { %v3040_v50 = vadd.f32 %v3039_v16, %v5982_v12 }
 0x4bf   : > { %v3148_v59 = vmax.f32 %v3084_v49, 0.0  ;;  %2959 = vmatmul.bf16.gmra.mxu3 %v6038_v30 }
 0x4c0   : > { %v3111_v43 = vadd.f32 %v4360_v8, %v3040_v50  ;;  %v4372_v8 = vld [vmem:[%s4800_s15 + $0x188] sm:$0xff] }
 0x4c1   : > { %3212 = vst [vmem:[%s5995_s22 + $0x50] sm:$0xff] %v3148_v59 }
 0x4c2   : > { %v3175_v13 = vmax.f32 %v3111_v43, 0.0  ;;  %v2920_v60 = vpop.f32.mrf.mxu3 }
 0x4c3   : > { %v2921_v10 = vadd.f32 %v2920_v60, %v6091_v26 }
 0x4c4   : > { %3239 = vst [vmem:[%s5995_s22 + $0x128] sm:$0xff] %v3175_v13 }
 0x4c5   : > { %v3086_v45 = vadd.f32 %v4361_v52, %v2921_v10  ;;  %v3041_v27 = vpop.f32.mrf.mxu0  ;;  %v4373_v52 = vld [vmem:[%s4800_s15 + $0xc0] sm:$0xff] }
 0x4c6   : > { %v3042_v3 = vadd.f32 %v3041_v27, %v5982_v12 }
 0x4c7   : > { %v3150_v53 = vmax.f32 %v3086_v45, 0.0 }
 0x4c8   : > { %v3113_v30 = vadd.f32 %v4362_v51, %v3042_v3  ;;  %v4374_v51 = vld [vmem:[%s4800_s15 + $0x198] sm:$0xff] }
 0x4c9   : > { %3214 = vst [vmem:[%s5995_s22 + $0x60] sm:$0xff] %v3150_v53 }
 0x4ca   : > { %v3177_v32 = vmax.f32 %v3113_v30, 0.0  ;;  %v2922_v63 = vpop.f32.mrf.mxu3 }
 0x4cb   : > { %v2923_v46 = vadd.f32 %v2922_v63, %v6091_v26 }
 0x4cc   : > { %3241 = vst [vmem:[%s5995_s22 + $0x138] sm:$0xff] %v3177_v32 }
 0x4cd   : > { %v3088_v57 = vadd.f32 %v4363_v33, %v2923_v46  ;;  %v3044_v23 = vpop.f32.mrf.mxu0  ;;  %v4375_v46 = vld [vmem:[%s4800_s15 + $0xd0] sm:$0xff] }
 0x4ce   : > { %v3045_v18 = vadd.f32 %v3044_v23, %v5982_v12 }
 0x4cf   : > { %v3152_v20 = vmax.f32 %v3088_v57, 0.0  ;;  %2964 = vmatmul.bf16.gmra.mxu3 %v6054_v37 }
 0x4d0   : > { %v3115_v19 = vadd.f32 %v4364_v55, %v3045_v18 }
 0x4d1   : > { %3216 = vst [vmem:[%s5995_s22 + $0x70] sm:$0xff] %v3152_v20  ;;  %v4376_v20 = vld [vmem:[%s4800_s15 + $0x1a8] sm:$0xff] }
 0x4d2   : > { %v3179_v31 = vmax.f32 %v3115_v19, 0.0  ;;  %v2925_v35 = vpop.f32.mrf.mxu3 }
 0x4d3   : > { %v2926_v62 = vadd.f32 %v2925_v35, %v6091_v26 }
 0x4d4   : > { %3243 = vst [vmem:[%s5995_s22 + $0x148] sm:$0xff] %v3179_v31 }
 0x4d5   : > { %v3090_v41 = vadd.f32 %v4365_v39, %v2926_v62  ;;  %v3046_v36 = vpop.f32.mrf.mxu0  ;;  %v4377_v62 = vld [vmem:[%s4800_s15 + $0xe0] sm:$0xff] }
 0x4d6   : > { %v3047_v5 = vadd.f32 %v3046_v36, %v5982_v12 }
 0x4d7   : > { %v3154_v44 = vmax.f32 %v3090_v41, 0.0 }
 0x4d8   : > { %v3117_v37 = vadd.f32 %v4366_v1, %v3047_v5 }
 0x4d9   : > { %3218 = vst [vmem:[%s5995_s22 + $0x80] sm:$0xff] %v3154_v44  ;;  %v4378_v44 = vld [vmem:[%s4800_s15 + $0x1b8] sm:$0xff] }
 0x4da   : > { %v3181_v15 = vmax.f32 %v3117_v37, 0.0  ;;  %v2927_v29 = vpop.f32.mrf.mxu3 }
 0x4db   : > { %v2928_v34 = vadd.f32 %v2927_v29, %v6091_v26  ;;  %v4379_v29 = vld [vmem:[%s4800_s15 + $0xf0] sm:$0xff] }
 0x4dc   : > { %3245 = vst [vmem:[%s5995_s22 + $0x158] sm:$0xff] %v3181_v15 }
 0x4dd   : > { %v3092_v21 = vadd.f32 %v4367_v22, %v2928_v34  ;;  %v3049_v42 = vpop.f32.mrf.mxu0 }
 0x4de   : > { %v3050_v58 = vadd.f32 %v3049_v42, %v5982_v12 }
 0x4df   : > { %v3156_v17 = vmax.f32 %v3092_v21, 0.0  ;;  %2969 = vmatmul.bf16.gmra.mxu3 %v6070_v24 }
 0x4e0   : > { %v3119_v28 = vadd.f32 %v4368_v0, %v3050_v58  ;;  %v4380_v58 = vld [vmem:[%s4800_s15 + $0x1c8] sm:$0xff] }
 0x4e1   : > { %3220 = vst [vmem:[%s5995_s22 + $0x90] sm:$0xff] %v3156_v17 }
 0x4e2   : > { %v3183_v54 = vmax.f32 %v3119_v28, 0.0  ;;  %v2930_v9 = vpop.f32.mrf.mxu3 }
 0x4e3   : > { %v2931_v40 = vadd.f32 %v2930_v9, %v6091_v26  ;;  %v4381_v9 = vld [vmem:[%s4800_s15 + $0x100] sm:$0xff] }
 0x4e4   : > { %3247 = vst [vmem:[%s5995_s22 + $0x168] sm:$0xff] %v3183_v54 }
 0x4e5   : > { %v3094_v2 = vadd.f32 %v4369_v7, %v2931_v40  ;;  %v3051_v38 = vpop.f32.mrf.mxu0 }
 0x4e6   : > { %v3052_v48 = vadd.f32 %v3051_v38, %v5982_v12 }
 0x4e7   : > { %v3158_v47 = vmax.f32 %v3094_v2, 0.0 }
 0x4e8   : > { %v3121_v24 = vadd.f32 %v4370_v56, %v3052_v48  ;;  %v4382_v48 = vld [vmem:[%s4800_s15 + $0x1d8] sm:$0xff] }
 0x4e9   : > { %3222 = vst [vmem:[%s5995_s22 + $0xa0] sm:$0xff] %v3158_v47 }
 0x4ea   : > { %v3185_v14 = vmax.f32 %v3121_v24, 0.0  ;;  %v2932_v11 = vpop.f32.mrf.mxu3 }
 0x4eb   : > { %v2933_v61 = vadd.f32 %v2932_v11, %v6091_v26  ;;  %v4383_v11 = vld [vmem:[%s4800_s15 + $0x110] sm:$0xff] }
 0x4ec   : > { %3249 = vst [vmem:[%s5995_s22 + $0x178] sm:$0xff] %v3185_v14 }
 0x4ed   : > { %v3096_v49 = vadd.f32 %v4371_v25, %v2933_v61  ;;  %v3054_v16 = vpop.f32.mrf.mxu0 }
 0x4ee   : > { %v3055_v50 = vadd.f32 %v3054_v16, %v5982_v12 }
 0x4ef   : > { %v3160_v59 = vmax.f32 %v3096_v49, 0.0  ;;  %2974 = vmatmul.bf16.gmra.mxu3 %v6086_v4 }
 0x4f0   : > { %v3123_v43 = vadd.f32 %v4372_v8, %v3055_v50  ;;  %v4384_v50 = vld [vmem:[%s4800_s15 + $0x1e8] sm:$0xff] }
 0x4f1   : > { %3224 = vst [vmem:[%s5995_s22 + $0xb0] sm:$0xff] %v3160_v59 }
 0x4f2   : > { %v3187_v13 = vmax.f32 %v3123_v43, 0.0  ;;  %v2935_v60 = vpop.f32.mrf.mxu3 }
 0x4f3   : > { %v2936_v10 = vadd.f32 %v2935_v60, %v6091_v26  ;;  %v4385_v60 = vld [vmem:[%s4800_s15 + $0x120] sm:$0xff] }
 0x4f4   : > { %3251 = vst [vmem:[%s5995_s22 + $0x188] sm:$0xff] %v3187_v13 }
 0x4f5   : > { %v3098_v45 = vadd.f32 %v4373_v52, %v2936_v10  ;;  %v3056_v27 = vpop.f32.mrf.mxu0 }
 0x4f6   : > { %v3057_v3 = vadd.f32 %v3056_v27, %v5982_v12 }
 0x4f7   : > { %v3162_v53 = vmax.f32 %v3098_v45, 0.0 }
 0x4f8   : > { %v3125_v4 = vadd.f32 %v4374_v51, %v3057_v3  ;;  %v4386_v3 = vld [vmem:[%s4800_s15 + $0x1f8] sm:$0xff] }
 0x4f9   : > { %3226 = vst [vmem:[%s5995_s22 + $0xc0] sm:$0xff] %v3162_v53 }
 0x4fa   : > { %v3189_v30 = vmax.f32 %v3125_v4, 0.0  ;;  %v2937_v32 = vpop.f32.mrf.mxu3 }
 0x4fb   : > { %v2938_v63 = vadd.f32 %v2937_v32, %v6091_v26  ;;  %v4387_v32 = vld [vmem:[%s4800_s15 + $0x130] sm:$0xff] }
 0x4fc   : > { %3253 = vst [vmem:[%s5995_s22 + $0x198] sm:$0xff] %v3189_v30 }
 0x4fd   : > { %v3100_v33 = vadd.f32 %v4375_v46, %v2938_v63  ;;  %v3059_v57 = vpop.f32.mrf.mxu0 }
 0x4fe   : > { %v3060_v23 = vadd.f32 %v3059_v57, %v5982_v12  ;;  %v4388_v57 = vld [vmem:[%s4800_s15 + $0x140] sm:$0xff] }
 0x4ff   : > { %v3164_v18 = vmax.f32 %v3100_v33, 0.0  ;;  %2979 = vmatmul.bf16.gmra.mxu3 %v6108_v6 }
 0x500   : > { %v3127_v55 = vadd.f32 %v4376_v20, %v3060_v23 }
 0x501   : > { %3228 = vst [vmem:[%s5995_s22 + $0xd0] sm:$0xff] %v3164_v18 }
 0x502   : > { %v3191_v19 = vmax.f32 %v3127_v55, 0.0  ;;  %v2940_v31 = vpop.f32.mrf.mxu3 }
 0x503   : > { %v2941_v35 = vadd.f32 %v2940_v31, %v6091_v26 }
 0x504   : > { %3255 = vst [vmem:[%s5995_s22 + $0x1a8] sm:$0xff] %v3191_v19  ;;  %v4389_v19 = vld [vmem:[%s4800_s15 + $0x150] sm:$0xff] }
 0x505   : > { %v3102_v39 = vadd.f32 %v4377_v62, %v2941_v35  ;;  %v3061_v41 = vpop.f32.mrf.mxu0 }
 0x506   : > { %v3062_v36 = vadd.f32 %v3061_v41, %v5982_v12  ;;  %v4390_v41 = vld [vmem:[%s4800_s15 + $0x160] sm:$0xff] }
 0x507   : > { %v3166_v5 = vmax.f32 %v3102_v39, 0.0 }
 0x508   : > { %v3129_v6 = vadd.f32 %v4378_v44, %v3062_v36 }
 0x509   : > { %3230 = vst [vmem:[%s5995_s22 + $0xe0] sm:$0xff] %v3166_v5 }
 0x50a   : > { %v3193_v1 = vmax.f32 %v3129_v6, 0.0  ;;  %v2942_v37 = vpop.f32.mrf.mxu3 }
 0x50b   : > { %v2943_v15 = vadd.f32 %v2942_v37, %v6091_v26 }
 0x50c   : > { %3257 = vst [vmem:[%s5995_s22 + $0x1b8] sm:$0xff] %v3193_v1  ;;  %v4391_v1 = vld [vmem:[%s4800_s15 + $0x170] sm:$0xff] }
 0x50d   : > { %v3104_v34 = vadd.f32 %v4379_v29, %v2943_v15  ;;  %v3064_v22 = vpop.f32.mrf.mxu0 }
 0x50e   : > { %v3065_v21 = vadd.f32 %v3064_v22, %v5982_v12  ;;  %v4392_v22 = vld [vmem:[%s4800_s15 + $0x180] sm:$0xff] }
 0x50f   : > { %v3168_v42 = vmax.f32 %v3104_v34, 0.0 }
 0x510   : > { %v3131_v17 = vadd.f32 %v4380_v58, %v3065_v21 }
 0x511   : > { %3232 = vst [vmem:[%s5995_s22 + $0xf0] sm:$0xff] %v3168_v42 }
 0x512   : > { %v3195_v0 = vmax.f32 %v3131_v17, 0.0  ;;  %v2945_v28 = vpop.f32.mrf.mxu3 }
 0x513   : > { %v2946_v54 = vadd.f32 %v2945_v28, %v6091_v26 }
 0x514   : > { %3259 = vst [vmem:[%s5995_s22 + $0x1c8] sm:$0xff] %v3195_v0  ;;  %v4393_v0 = vld [vmem:[%s4800_s15 + $0x190] sm:$0xff] }
 0x515   : > { %v3106_v40 = vadd.f32 %v4381_v9, %v2946_v54  ;;  %v3066_v7 = vpop.f32.mrf.mxu0 }
 0x516   : > { %v3067_v2 = vadd.f32 %v3066_v7, %v5982_v12  ;;  %v4394_v7 = vld [vmem:[%s4800_s15 + $0x1a0] sm:$0xff] }
 0x517   : > { %v3170_v38 = vmax.f32 %v3106_v40, 0.0 }
 0x518   : > { %v3133_v47 = vadd.f32 %v4382_v48, %v3067_v2 }
 0x519   : > { %3234 = vst [vmem:[%s5995_s22 + $0x100] sm:$0xff] %v3170_v38 }
 0x51a   : > { %v3197_v56 = vmax.f32 %v3133_v47, 0.0  ;;  %v2947_v24 = vpop.f32.mrf.mxu3 }
 0x51b   : > { %v2948_v14 = vadd.f32 %v2947_v24, %v6091_v26 }
 0x51c   : > { %3261 = vst [vmem:[%s5995_s22 + $0x1d8] sm:$0xff] %v3197_v56  ;;  %v4395_v56 = vld [vmem:[%s4800_s15 + $0x1b0] sm:$0xff] }
 0x51d   : > { %v3108_v61 = vadd.f32 %v4383_v11, %v2948_v14  ;;  %v3069_v25 = vpop.f32.mrf.mxu0 }
 0x51e   : > { %v3070_v49 = vadd.f32 %v3069_v25, %v5982_v12  ;;  %v4396_v25 = vld [vmem:[%s4800_s15 + $0x1c0] sm:$0xff] }
 0x51f   : > { %v3172_v16 = vmax.f32 %v3108_v61, 0.0 }
 0x520   : > { %v3135_v59 = vadd.f32 %v4384_v50, %v3070_v49 }
 0x521   : > { %3236 = vst [vmem:[%s5995_s22 + $0x110] sm:$0xff] %v3172_v16 }
 0x522   : > { %v3199_v8 = vmax.f32 %v3135_v59, 0.0  ;;  %v2950_v43 = vpop.f32.mrf.mxu3 }
 0x523   : > { %v2951_v13 = vadd.f32 %v2950_v43, %v6091_v26 }
 0x524   : > { %3263 = vst [vmem:[%s5995_s22 + $0x1e8] sm:$0xff] %v3199_v8  ;;  %v4397_v8 = vld [vmem:[%s4800_s15 + $0x1d0] sm:$0xff] }
 0x525   : > { %v3110_v10 = vadd.f32 %v4385_v60, %v2951_v13  ;;  %v3071_v52 = vpop.f32.mrf.mxu0 }
 0x526   : > { %v3072_v45 = vadd.f32 %v3071_v52, %v5982_v12  ;;  %v4398_v52 = vld [vmem:[%s4800_s15 + $0x1e0] sm:$0xff] }
 0x527   : > { %v3174_v27 = vmax.f32 %v3110_v10, 0.0 }
 0x528   : > { %v3137_v53 = vadd.f32 %v4386_v3, %v3072_v45 }
 0x529   : > { %3238 = vst [vmem:[%s5995_s22 + $0x120] sm:$0xff] %v3174_v27 }
 0x52a   : > { %v3201_v51 = vmax.f32 %v3137_v53, 0.0  ;;  %v2952_v4 = vpop.f32.mrf.mxu3 }
 0x52b   : > { %v2953_v30 = vadd.f32 %v2952_v4, %v6091_v26 }
 0x52c   : > { %3265 = vst [vmem:[%s5995_s22 + $0x1f8] sm:$0xff] %v3201_v51  ;;  %v4399_v51 = vld [vmem:[%s4800_s15 + $0x1f0] sm:$0xff] }
 0x52d   : > { %v3112_v63 = vadd.f32 %v4387_v32, %v2953_v30 }
 0x52f   : > { %v3176_v46 = vmax.f32 %v3112_v63, 0.0 }
 0x531   : > { %3240 = vst [vmem:[%s5995_s22 + $0x130] sm:$0xff] %v3176_v46 }
 0x532   : > { %v2955_v33 = vpop.f32.mrf.mxu3 }
 0x533   : > { %v2956_v12 = vadd.f32 %v2955_v33, %v6091_v26 }
 0x535   : > { %v3114_v23 = vadd.f32 %v4388_v57, %v2956_v12 }
 0x537   : > { %v3178_v18 = vmax.f32 %v3114_v23, 0.0 }
 0x539   : > { %3242 = vst [vmem:[%s5995_s22 + $0x140] sm:$0xff] %v3178_v18 }
 0x53a   : > { %v2957_v20 = vpop.f32.mrf.mxu3 }
 0x53b   : > { %v2958_v55 = vadd.f32 %v2957_v20, %v6091_v26 }
 0x53d   : > { %v3116_v31 = vadd.f32 %v4389_v19, %v2958_v55 }
 0x53f   : > { %v3180_v35 = vmax.f32 %v3116_v31, 0.0 }
 0x541   : > { %3244 = vst [vmem:[%s5995_s22 + $0x150] sm:$0xff] %v3180_v35 }
 0x542   : > { %v2960_v62 = vpop.f32.mrf.mxu3 }
 0x543   : > { %v2961_v39 = vadd.f32 %v2960_v62, %v6091_v26 }
 0x545   : > { %v3118_v36 = vadd.f32 %v4390_v41, %v2961_v39 }
 0x547   : > { %v3182_v5 = vmax.f32 %v3118_v36, 0.0 }
 0x549   : > { %3246 = vst [vmem:[%s5995_s22 + $0x160] sm:$0xff] %v3182_v5 }
 0x54a   : > { %v2962_v44 = vpop.f32.mrf.mxu3 }
 0x54b   : > { %v2963_v6 = vadd.f32 %v2962_v44, %v6091_v26 }
 0x54d   : > { %v3120_v37 = vadd.f32 %v4391_v1, %v2963_v6 }
 0x54f   : > { %v3184_v15 = vmax.f32 %v3120_v37, 0.0 }
 0x551   : > { %3248 = vst [vmem:[%s5995_s22 + $0x170] sm:$0xff] %v3184_v15 }
 0x552   : > { %v2965_v29 = vpop.f32.mrf.mxu3 }
 0x553   : > { %v2966_v34 = vadd.f32 %v2965_v29, %v6091_v26 }
 0x555   : > { %v3122_v21 = vadd.f32 %v4392_v22, %v2966_v34 }
 0x557   : > { %v3186_v42 = vmax.f32 %v3122_v21, 0.0 }
 0x559   : > { %3250 = vst [vmem:[%s5995_s22 + $0x180] sm:$0xff] %v3186_v42 }
 0x55a   : > { %v2967_v58 = vpop.f32.mrf.mxu3 }
 0x55b   : > { %v2968_v17 = vadd.f32 %v2967_v58, %v6091_v26 }
 0x55d   : > { %v3124_v28 = vadd.f32 %v4393_v0, %v2968_v17 }
 0x55f   : > { %v3188_v54 = vmax.f32 %v3124_v28, 0.0 }
 0x561   : > { %3252 = vst [vmem:[%s5995_s22 + $0x190] sm:$0xff] %v3188_v54 }
 0x562   : > { %v2970_v9 = vpop.f32.mrf.mxu3 }
 0x563   : > { %v2971_v40 = vadd.f32 %v2970_v9, %v6091_v26 }
 0x565   : > { %v3126_v2 = vadd.f32 %v4394_v7, %v2971_v40 }
 0x567   : > { %v3190_v38 = vmax.f32 %v3126_v2, 0.0 }
 0x569   : > { %3254 = vst [vmem:[%s5995_s22 + $0x1a0] sm:$0xff] %v3190_v38 }
 0x56a   : > { %v2972_v48 = vpop.f32.mrf.mxu3 }
 0x56b   : > { %v2973_v47 = vadd.f32 %v2972_v48, %v6091_v26 }
 0x56d   : > { %v3128_v24 = vadd.f32 %v4395_v56, %v2973_v47 }
 0x56f   : > { %v3192_v14 = vmax.f32 %v3128_v24, 0.0 }
 0x571   : > { %3256 = vst [vmem:[%s5995_s22 + $0x1b0] sm:$0xff] %v3192_v14 }
 0x572   : > { %v2975_v11 = vpop.f32.mrf.mxu3 }
 0x573   : > { %v2976_v61 = vadd.f32 %v2975_v11, %v6091_v26 }
 0x575   : > { %v3130_v49 = vadd.f32 %v4396_v25, %v2976_v61 }
 0x577   : > { %v3194_v16 = vmax.f32 %v3130_v49, 0.0 }
 0x579   : > { %3258 = vst [vmem:[%s5995_s22 + $0x1c0] sm:$0xff] %v3194_v16 }
 0x57a   : > { %v2977_v50 = vpop.f32.mrf.mxu3 }
 0x57b   : > { %v2978_v59 = vadd.f32 %v2977_v50, %v6091_v26 }
 0x57d   : > { %v3132_v43 = vadd.f32 %v4397_v8, %v2978_v59 }
 0x57f   : > { %v3196_v13 = vmax.f32 %v3132_v43, 0.0 }
 0x581   : > { %3260 = vst [vmem:[%s5995_s22 + $0x1d0] sm:$0xff] %v3196_v13 }
 0x582   : > { %v2980_v60 = vpop.f32.mrf.mxu3 }
 0x583   : > { %v2981_v10 = vadd.f32 %v2980_v60, %v6091_v26 }
 0x585   : > { %v3134_v45 = vadd.f32 %v4398_v52, %v2981_v10 }
 0x587   : > { %v3198_v27 = vmax.f32 %v3134_v45, 0.0 }
 0x589   : > { %3262 = vst [vmem:[%s5995_s22 + $0x1e0] sm:$0xff] %v3198_v27 }
 0x58a   : > { %v2982_v3 = vpop.f32.mrf.mxu3 }
 0x58b   : > { %v2983_v53 = vadd.f32 %v2982_v3, %v6091_v26 }
 0x58d   : > { %v3136_v4 = vadd.f32 %v4399_v51, %v2983_v53 }
 0x58f   : > { %v3200_v30 = vmax.f32 %v3136_v4, 0.0 }
 0x591   : > { %3264 = vst [vmem:[%s5995_s22 + $0x1f0] sm:$0xff] %v3200_v30 }
 0x592   : > { %4577 = shalt.err (!%p4574_p10)
}
 0x593   : > { %s4638_s9 = smov 256   ;;  %s4639_s15 = smov 16  }
 0x594   : > { %4255 = dma.vmem_to_hbm [thread:$0]  (%p4767_p5), %s3280_s20, 8192, %s3282_s17, %s3267_s10, %s4638_s9, %s4638_s9, %s4639_s15  }
 0x595 PF: > { %s3296_s22 = sand.u32 1, %s4612_s24   ;;  %p6482_p12 = scmp.ge.s32.totalorder %s4624_s27, 2 }
 0x596   : > { %s3297_s16 = scalar_lea.sflag [#allocation4], %s3296_s22 }
 0x597   : > { %p4275_p13 = pnand %p6482_p12, %p4715_p6 }
 0x599   : > { %p4276_p0 = pneg %p4275_p13 }
 0x59b   : > { %4607 = dma.done.wait (%p4276_p0), %s3297_s16, 8192  }
 0x59c   : > { %4609 = vsyncadd (%p4276_p0), %s3297_s16, 4294959104  ;;  %p22_p3 = scmp.ge.s32.totalorder %s4754_s23, 4   ;;  %s6483_s24 = smov %s4616_s25 }
 0x59d   : > { %s6484_s25 = smov %s4620_s26  ;;  %s6485_s26 = smov %s4763_s13 }
 0x59e   : > { %s6486_s27 = smov %s4754_s23  ;;  %24 = sbr.rel (!%p22_p3) target bundleno = 9 (0x9), region = 117 }
 0x5a3   :  { %3303 = vsyncpa [#allocation3], 1 }
 0x5a4   :  { %3305 = vsyncpa [#allocation3 + $0x1], 1 }
 0x5a5   :  { %3306 = vsyncpa [#allocation6], 1 }
 0x5a6   :  { %3307 = vsyncpa [#allocation9], 1 }
 0x5a7   :  { %3308 = vsyncpa [#allocation4], 1 }
 0x5a8   :  { %3310 = vsyncpa [#allocation4 + $0x1], 1 }

</bundles_post_ra>
